<compile_context>
chip_gen: v7x
topology: tpu7x:2x2x1
jax: 0.10.0
libtpu: 0.0.40
codegen_flags: <defaults>
</compile_context>

<pallas_src>
import functools

import jax
import jax.numpy as jnp
from jax import lax
from jax.experimental import pallas as pl
from jax.experimental.pallas import tpu as pltpu


def _elu(x):
    # Keep as a select: exp(x) in the dead branch may overflow to inf but is discarded.
    return jnp.where(x > 0, x, jnp.exp(x) - 1.0)


def lcgn_kernel(img_ref, sem_ref, valid_ref,
                w_kb_ref, b_kb_ref, mem0_ref,
                w_q1_ref, b_q1_ref, w_q2_ref, b_q2_ref,
                w_pkv_ref, b_pkv_ref,
                w_ploc_ref, b_ploc_ref, w_pctx_ref, b_pctx_ref,
                w_qkv_ref, b_qkv_ref,
                w_mem_ref, b_mem_ref, w_comb_ref, b_comb_ref,
                out_ref, *, mxu_dtype=jnp.float32):
    TB, N, D = img_ref.shape
    C = w_kb_ref.shape[1]
    T = w_q2_ref.shape[0]
    rows = TB * N

    def mdot(a, b):  # MXU matmul; optional bf16 inputs, always f32 accumulation
        return jnp.dot(a.astype(mxu_dtype), b.astype(mxu_dtype),
                       preferred_element_type=jnp.float32)

    def bmm(eq, a, b):  # batched einsum on the MXU
        return jnp.einsum(eq, a.astype(mxu_dtype), b.astype(mxu_dtype),
                          preferred_element_type=jnp.float32)

    # ---- loc_ctx_init: F.normalize(images, dim=-1) + initKB -----------------
    img = img_ref[...].reshape(rows, D)
    nrm = jnp.sqrt(jnp.sum(img * img, axis=-1, keepdims=True))
    img = img * pl.reciprocal(jnp.maximum(nrm, 1e-12), approx=False)
    x_loc = mdot(img, w_kb_ref[...]) + b_kb_ref[...]

    # proj_x_loc depends only on x_loc -> hoisted out of the iteration loop
    p_loc = mdot(x_loc, w_ploc_ref[...]) + b_ploc_ref[...]

    # ---- textual command trunk ----------------------------------------------
    sem = sem_ref[:, 0, :]                                    # (TB, CMD)
    h = _elu(mdot(sem, w_q1_ref[...]) + b_q1_ref[...])

    # ---- additive pair mask (0 valid / -1e30 invalid), hoisted ---------------
    valid = valid_ref[:, 0, :]                                # (TB, N)
    pair_ok = valid[:, :, None] * valid[:, None, :]           # (TB, N, N)
    mask_add = jnp.where(pair_ok > 0.5, 0.0, -1e30).astype(jnp.float32)

    # ---- resident weight blocks, loaded once ---------------------------------
    wq_l, wq_c, wq_p = w_qkv_ref[0], w_qkv_ref[1], w_qkv_ref[2]
    wk_l, wk_c, wk_p = w_qkv_ref[3], w_qkv_ref[4], w_qkv_ref[5]
    wv_l, wv_c, wv_p = w_qkv_ref[6], w_qkv_ref[7], w_qkv_ref[8]
    bq, bk, bv = b_qkv_ref[0], b_qkv_ref[1], b_qkv_ref[2]
    w_pk, w_pv = w_pkv_ref[0], w_pkv_ref[1]
    b_pk, b_pv = b_pkv_ref[0], b_pkv_ref[1]
    w_pctx, b_pctx = w_pctx_ref[...], b_pctx_ref[...]
    w_mem_c, w_mem_m, b_mem = w_mem_ref[0], w_mem_ref[1], b_mem_ref[...]

    def propagate(cmd, x_ctx, p_ctx):
        c_keys = mdot(cmd, w_pk) + b_pk                       # (TB, C)
        c_vals = mdot(cmd, w_pv) + b_pv
        prod = p_loc * p_ctx                                  # (rows, C)
        # split accumulating matmuls instead of a (rows, 3C) concat + fused weight
        q = mdot(x_loc, wq_l) + mdot(x_ctx, wq_c) + mdot(prod, wq_p) + bq
        k = mdot(x_loc, wk_l) + mdot(x_ctx, wk_c) + mdot(prod, wk_p) + bk
        v = mdot(x_loc, wv_l) + mdot(x_ctx, wv_c) + mdot(prod, wv_p) + bv
        q = q.reshape(TB, N, C)                               # 1/sqrt(C) folded into wq/bq
        k = k.reshape(TB, N, C) * c_keys[:, None, :]
        v = v.reshape(TB, N, C) * c_vals[:, None, :]
        score = bmm('bnc,bmc->bnm', q, k) + mask_add          # ops.apply_mask2d
        m = jnp.max(score, axis=-1, keepdims=True)
        e = jnp.exp(score - m)
        prob = e * pl.reciprocal(jnp.sum(e, axis=-1, keepdims=True), approx=False)
        msg = bmm('bnm,bmc->bnc', prob, v).reshape(rows, C)
        # mem_update without the (rows, 2C) concat
        return mdot(x_ctx, w_mem_c) + mdot(msg, w_mem_m) + b_mem

    # ---- iteration t = 0 (peeled): x_ctx rows identical -> single-row p_ctx --
    cmd0 = mdot(h, w_q2_ref[0]) + b_q2_ref[0]
    p_ctx0 = mdot(mem0_ref[...], w_pctx) + b_pctx             # (1, C)
    x_ctx = propagate(cmd0,
                      jnp.broadcast_to(mem0_ref[...], (rows, C)),
                      jnp.broadcast_to(p_ctx0, (rows, C)))

    # ---- iterations t = 1..T-1: fori_loop bounds live ranges -----------------
    def body(t, x_ctx):
        cmd = mdot(h, w_q2_ref[t]) + b_q2_ref[t]
        p_ctx = mdot(x_ctx, w_pctx) + b_pctx
        return propagate(cmd, x_ctx, p_ctx)

    x_ctx = lax.fori_loop(1, T, body, x_ctx)

    # ---- combine_kb (split accumulating matmuls) -----------------------------
    x_out = mdot(x_loc, w_comb_ref[0]) + mdot(x_ctx, w_comb_ref[1]) + b_comb_ref[...]
    out_ref[...] = x_out.reshape(TB, N, C)


def _vmem_capacity_bytes():
    try:
        return int(pltpu.get_tpu_info().vmem_capacity_bytes)
    except Exception:
        return 64 * 1024 * 1024   # conservative default (v7x per-TensorCore VMEM)


def seman_lcgn(images, seman_outputs, entity_num, params, msg_iter_num,
               matmul_dtype=jnp.float32, target_rows=1024):
    B, N, D = images.shape
    C = params["w_initKB"].shape[1]
    CMD = params["w_qInput"].shape[0]
    T = msg_iter_num
    assert T >= 1

    f32 = jnp.float32
    images = images.astype(f32)
    sem3 = seman_outputs.reshape(B, 1, CMD).astype(f32)
    valid = (jnp.arange(N, dtype=jnp.int32)[None, :] < entity_num[:, None]).astype(f32)
    valid3 = valid.reshape(B, 1, N)

    # ---- wrapper-side weight plumbing ---------------------------------------
    inv_sqrt_c = 1.0 / float(C) ** 0.5
    wq = params["w_queries"] * inv_sqrt_c     # fold score scaling into the query proj
    bq = params["b_queries"] * inv_sqrt_c
    wk, bk = params["w_keys"], params["b_keys"]
    wv, bv = params["w_vals"], params["b_vals"]
    # split 3C-input projections by input block (x_loc | x_ctx | p_loc*p_ctx)
    w_qkv9 = jnp.stack([wq[:C], wq[C:2 * C], wq[2 * C:],
                        wk[:C], wk[C:2 * C], wk[2 * C:],
                        wv[:C], wv[C:2 * C], wv[2 * C:]])            # (9, C, C)
    b_qkv3 = jnp.stack([bq, bk, bv])                                 # (3, 1, C)
    w_pkv2 = jnp.stack([params["w_proj_keys"], params["w_proj_vals"]])  # (2, CMD, C)
    b_pkv2 = jnp.stack([params["b_proj_keys"], params["b_proj_vals"]])  # (2, 1, C)
    w_mem2 = jnp.stack([params["w_mem"][:C], params["w_mem"][C:]])      # (2, C, C)
    w_comb2 = jnp.stack([params["w_comb"][:C], params["w_comb"][C:]])   # (2, C, C)

    weights = [params["w_initKB"], params["b_initKB"], params["init_mem"],
               params["w_qInput"], params["b_qInput"],
               params["w_qInput2"], params["b_qInput2"],
               w_pkv2, b_pkv2,
               params["w_ploc"], params["b_ploc"], params["w_pctx"], params["b_pctx"],
               w_qkv9, b_qkv3, w_mem2, params["b_mem"], w_comb2, params["b_comb"]]
    weight_bytes = 4 * sum(int(w.size) for w in weights)

    # ---- generation-aware batch-tile selection (VMEM budgeted) ---------------
    cap = _vmem_capacity_bytes()

    def block_bytes(tb):
        r = tb * N
        io = 2 * 4 * (r * D + tb * CMD + tb * N + r * C)   # double-buffered I/O blocks
        acts = 4 * r * (D + 10 * C)                        # normalized img + activations
        attn = 3 * 4 * tb * N * N                          # mask_add, score, prob
        return io + acts + attn

    budget = int(cap * 0.7) - weight_bytes
    divisors = [d for d in range(1, B + 1) if B % d == 0]
    TB = 1
    for d in divisors:                                     # ascending -> keeps largest fit
        if d * N <= target_rows and block_bytes(d) <= budget:
            TB = d
    if B // TB < 2:   # keep >=2 grid steps so the 'parallel' axis spans both v7x TCs
        for d in sorted(divisors, reverse=True):
            if B // d >= 2:
                TB = d
                break
    grid = (B // TB,)

    vmem_limit = int(min(cap,
                         max(2 * weight_bytes + block_bytes(TB) + (8 << 20), 32 << 20)))

    # ---- advisory cost estimate ----------------------------------------------
    rows_t = B * N
    flops = (2 * rows_t * D * C + 2 * rows_t * C * C + 2 * B * CMD * CMD
             + T * (2 * B * CMD * CMD + 4 * B * CMD * C + 2 * rows_t * C * C
                    + 18 * rows_t * C * C + 4 * B * N * N * C + 4 * rows_t * C * C)
             + 4 * rows_t * C * C)
    transcendentals = B * CMD + T * B * N * N
    bytes_accessed = 4 * (images.size + sem3.size + valid3.size + B * N * C) + weight_bytes

    def batch_map(b): return (b, 0, 0)
    def w2_map(b): return (0, 0)
    def w3_map(b): return (0, 0, 0)

    kernel = functools.partial(lcgn_kernel, mxu_dtype=matmul_dtype)
    out_shape = jax.ShapeDtypeStruct((B, N, C), f32)
    out_specs = pl.BlockSpec((TB, N, C), batch_map)

    operands = (images, sem3, valid3,
                params["w_initKB"], params["b_initKB"], params["init_mem"],
                params["w_qInput"], params["b_qInput"],
                params["w_qInput2"], params["b_qInput2"],
                w_pkv2, b_pkv2,
                params["w_ploc"], params["b_ploc"], params["w_pctx"], params["b_pctx"],
                w_qkv9, b_qkv3, w_mem2, params["b_mem"], w_comb2, params["b_comb"])

    def build(weight_pipeline_mode):
        wkw = {} if weight_pipeline_mode is None else dict(pipeline_mode=weight_pipeline_mode)

        def wspec(shape, imap):
            return pl.BlockSpec(shape, imap, **wkw)

        in_specs = [
            pl.BlockSpec((TB, N, D), batch_map),              # images
            pl.BlockSpec((TB, 1, CMD), batch_map),            # seman_outputs
            pl.BlockSpec((TB, 1, N), batch_map),              # validity mask
            wspec((D, C), w2_map), wspec((1, C), w2_map),     # initKB W, b
            wspec((1, C), w2_map),                            # initMem
            wspec((CMD, CMD), w2_map), wspec((1, CMD), w2_map),        # qInput W, b
            wspec((T, CMD, CMD), w3_map), wspec((T, 1, CMD), w3_map),  # qInput%d W, b
            wspec((2, CMD, C), w3_map), wspec((2, 1, C), w3_map),      # proj_keys/vals
            wspec((C, C), w2_map), wspec((1, C), w2_map),              # project_x_loc
            wspec((C, C), w2_map), wspec((1, C), w2_map),              # project_x_ctx
            wspec((9, C, C), w3_map), wspec((3, 1, C), w3_map),        # queries/keys/vals
            wspec((2, C, C), w3_map), wspec((1, C), w2_map),           # mem_update
            wspec((2, C, C), w3_map), wspec((1, C), w2_map),           # combine_kb
        ]
        return pl.pallas_call(
            kernel, grid=grid, in_specs=in_specs, out_specs=out_specs,
            out_shape=out_shape,
            compiler_params=pltpu.CompilerParams(
                dimension_semantics=("parallel",),
                vmem_limit_bytes=vmem_limit),
            cost_estimate=pl.CostEstimate(flops=int(flops),
                                          transcendentals=int(transcendentals),
                                          bytes_accessed=int(bytes_accessed)),
        )

    try:
        # Constant-index weight blocks only need a single VMEM buffer.
        out = build(pl.Buffered(1))(*operands)
        out = jax.block_until_ready(out)
    except Exception:
        out = build(None)(*operands)   # fall back to default double buffering
    return out


def seman_lcgn_ref(images, seman_outputs, entity_num, p, T):
    """Pure-JAX reference mirroring the PyTorch forward (eval mode, unfused weights)."""
    nrm = jnp.sqrt(jnp.sum(images * images, axis=-1, keepdims=True))
    img = images / jnp.maximum(nrm, 1e-12)
    x_loc = img @ p["w_initKB"] + p["b_initKB"]
    B, N, C = x_loc.shape
    x_ctx = jnp.broadcast_to(p["init_mem"], (B, N, C))

    valid = (jnp.arange(N)[None, :] < entity_num[:, None]).astype(jnp.float32)
    pair_ok = (valid[:, :, None] * valid[:, None, :]) > 0.5

    h = _elu(seman_outputs @ p["w_qInput"] + p["b_qInput"])
    for t in range(T):
        cmd = h @ p["w_qInput2"][t] + p["b_qInput2"][t]
        proj_x_loc = x_loc @ p["w_ploc"] + p["b_ploc"]
        proj_x_ctx = x_ctx @ p["w_pctx"] + p["b_pctx"]
        x_joint = jnp.concatenate([x_loc, x_ctx, proj_x_loc * proj_x_ctx], axis=-1)
        q = x_joint @ p["w_queries"] + p["b_queries"]
        k = (x_joint @ p["w_keys"] + p["b_keys"]) * (cmd @ p["w_proj_keys"] + p["b_proj_keys"])[:, None, :]
        v = (x_joint @ p["w_vals"] + p["b_vals"]) * (cmd @ p["w_proj_vals"] + p["b_proj_vals"])[:, None, :]
        score = jnp.einsum('bnc,bmc->bnm', q, k) / jnp.sqrt(jnp.float32(C))
        score = jnp.where(pair_ok, score, -1e30)
        prob = jax.nn.softmax(score, axis=-1)
        msg = jnp.einsum('bnm,bmc->bnc', prob, v)
        x_ctx = jnp.concatenate([x_ctx, msg], axis=-1) @ p["w_mem"] + p["b_mem"]
    x_out = jnp.concatenate([x_loc, x_ctx], axis=-1) @ p["w_comb"] + p["b_comb"]
    return x_out


if __name__ == "__main__":
    # small shapes consistent with the module
    B, N = 2, 16                 # batch, entity slots
    D_FEAT, CTX_DIM, CMD_DIM = 64, 32, 32
    MSG_ITER_NUM = 2

    key = jax.random.PRNGKey(0)
    ks = iter(jax.random.split(key, 40))
    scale = 0.1

    def lin(k, din, dout):
        return scale * jax.random.normal(k, (din, dout), jnp.float32)

    def bias(k, dout):
        return scale * jax.random.normal(k, (1, dout), jnp.float32)

    images = jax.random.normal(next(ks), (B, N, D_FEAT), jnp.float32)
    seman_outputs = jax.random.normal(next(ks), (B, CMD_DIM), jnp.float32)
    entity_num = jnp.array([N, 10], jnp.int32)   # second sample has 10 valid entities

    params = {
        "w_initKB": lin(next(ks), D_FEAT, CTX_DIM), "b_initKB": bias(next(ks), CTX_DIM),
        "init_mem": scale * jax.random.normal(next(ks), (1, CTX_DIM), jnp.float32),
        "w_qInput": lin(next(ks), CMD_DIM, CMD_DIM), "b_qInput": bias(next(ks), CMD_DIM),
        "w_qInput2": jnp.stack([lin(next(ks), CMD_DIM, CMD_DIM) for _ in range(MSG_ITER_NUM)]),
        "b_qInput2": jnp.stack([bias(next(ks), CMD_DIM) for _ in range(MSG_ITER_NUM)]),
        "w_proj_keys": lin(next(ks), CMD_DIM, CTX_DIM), "b_proj_keys": bias(next(ks), CTX_DIM),
        "w_proj_vals": lin(next(ks), CMD_DIM, CTX_DIM), "b_proj_vals": bias(next(ks), CTX_DIM),
        "w_ploc": lin(next(ks), CTX_DIM, CTX_DIM), "b_ploc": bias(next(ks), CTX_DIM),
        "w_pctx": lin(next(ks), CTX_DIM, CTX_DIM), "b_pctx": bias(next(ks), CTX_DIM),
        "w_queries": lin(next(ks), 3 * CTX_DIM, CTX_DIM), "b_queries": bias(next(ks), CTX_DIM),
        "w_keys": lin(next(ks), 3 * CTX_DIM, CTX_DIM), "b_keys": bias(next(ks), CTX_DIM),
        "w_vals": lin(next(ks), 3 * CTX_DIM, CTX_DIM), "b_vals": bias(next(ks), CTX_DIM),
        "w_mem": lin(next(ks), 2 * CTX_DIM, CTX_DIM), "b_mem": bias(next(ks), CTX_DIM),
        "w_comb": lin(next(ks), 2 * CTX_DIM, CTX_DIM), "b_comb": bias(next(ks), CTX_DIM),
    }

    x_out = seman_lcgn(images, seman_outputs, entity_num, params, MSG_ITER_NUM)
    x_out = jax.block_until_ready(x_out)

    x_ref = seman_lcgn_ref(images, seman_outputs, entity_num, params, MSG_ITER_NUM)
    assert x_out.shape == (B, N, CTX_DIM)
    assert jnp.allclose(x_out, x_ref, atol=1e-4, rtol=1e-4), \
        float(jnp.max(jnp.abs(x_out - x_ref)))

    print("KERNEL_OK")
</pallas_src>

<mosaic_0001>
module attributes {stable_mosaic.version = 11 : i64} {
  func.func @lcgn_kernel(%arg0: i32, %arg1: memref<1x16x64xf32, #tpu.memory_space<vmem>>, %arg2: memref<1x1x32xf32, #tpu.memory_space<vmem>>, %arg3: memref<1x1x16xf32, #tpu.memory_space<vmem>>, %arg4: memref<64x32xf32, #tpu.memory_space<vmem>>, %arg5: memref<1x32xf32, #tpu.memory_space<vmem>>, %arg6: memref<1x32xf32, #tpu.memory_space<vmem>>, %arg7: memref<32x32xf32, #tpu.memory_space<vmem>>, %arg8: memref<1x32xf32, #tpu.memory_space<vmem>>, %arg9: memref<2x32x32xf32, #tpu.memory_space<vmem>>, %arg10: memref<2x1x32xf32, #tpu.memory_space<vmem>>, %arg11: memref<2x32x32xf32, #tpu.memory_space<vmem>>, %arg12: memref<2x1x32xf32, #tpu.memory_space<vmem>>, %arg13: memref<32x32xf32, #tpu.memory_space<vmem>>, %arg14: memref<1x32xf32, #tpu.memory_space<vmem>>, %arg15: memref<32x32xf32, #tpu.memory_space<vmem>>, %arg16: memref<1x32xf32, #tpu.memory_space<vmem>>, %arg17: memref<9x32x32xf32, #tpu.memory_space<vmem>>, %arg18: memref<3x1x32xf32, #tpu.memory_space<vmem>>, %arg19: memref<2x32x32xf32, #tpu.memory_space<vmem>>, %arg20: memref<1x32xf32, #tpu.memory_space<vmem>>, %arg21: memref<2x32x32xf32, #tpu.memory_space<vmem>>, %arg22: memref<1x32xf32, #tpu.memory_space<vmem>>, %arg23: memref<1x16x32xf32, #tpu.memory_space<vmem>>) attributes {dimension_semantics = [#tpu.dimension_semantics<parallel>], iteration_bounds = array<i64: 2>, scalar_prefetch = 0 : i64, scratch_operands = 0 : i64, tpu.core_type = #tpu.core_type<tc>, window_params = [{transform_indices = @transform_0, window_bounds = array<i64: 1, 16, 64>}, {transform_indices = @transform_1, window_bounds = array<i64: 1, 1, 32>}, {transform_indices = @transform_2, window_bounds = array<i64: 1, 1, 16>}, {pipeline_mode = #tpu.pipeline_mode<synchronous>, transform_indices = @transform_3, window_bounds = array<i64: 64, 32>}, {pipeline_mode = #tpu.pipeline_mode<synchronous>, transform_indices = @transform_4, window_bounds = array<i64: 1, 32>}, {pipeline_mode = #tpu.pipeline_mode<synchronous>, transform_indices = @transform_5, window_bounds = array<i64: 1, 32>}, {pipeline_mode = #tpu.pipeline_mode<synchronous>, transform_indices = @transform_6, window_bounds = array<i64: 32, 32>}, {pipeline_mode = #tpu.pipeline_mode<synchronous>, transform_indices = @transform_7, window_bounds = array<i64: 1, 32>}, {pipeline_mode = #tpu.pipeline_mode<synchronous>, transform_indices = @transform_8, window_bounds = array<i64: 2, 32, 32>}, {pipeline_mode = #tpu.pipeline_mode<synchronous>, transform_indices = @transform_9, window_bounds = array<i64: 2, 1, 32>}, {pipeline_mode = #tpu.pipeline_mode<synchronous>, transform_indices = @transform_10, window_bounds = array<i64: 2, 32, 32>}, {pipeline_mode = #tpu.pipeline_mode<synchronous>, transform_indices = @transform_11, window_bounds = array<i64: 2, 1, 32>}, {pipeline_mode = #tpu.pipeline_mode<synchronous>, transform_indices = @transform_12, window_bounds = array<i64: 32, 32>}, {pipeline_mode = #tpu.pipeline_mode<synchronous>, transform_indices = @transform_13, window_bounds = array<i64: 1, 32>}, {pipeline_mode = #tpu.pipeline_mode<synchronous>, transform_indices = @transform_14, window_bounds = array<i64: 32, 32>}, {pipeline_mode = #tpu.pipeline_mode<synchronous>, transform_indices = @transform_15, window_bounds = array<i64: 1, 32>}, {pipeline_mode = #tpu.pipeline_mode<synchronous>, transform_indices = @transform_16, window_bounds = array<i64: 9, 32, 32>}, {pipeline_mode = #tpu.pipeline_mode<synchronous>, transform_indices = @transform_17, window_bounds = array<i64: 3, 1, 32>}, {pipeline_mode = #tpu.pipeline_mode<synchronous>, transform_indices = @transform_18, window_bounds = array<i64: 2, 32, 32>}, {pipeline_mode = #tpu.pipeline_mode<synchronous>, transform_indices = @transform_19, window_bounds = array<i64: 1, 32>}, {pipeline_mode = #tpu.pipeline_mode<synchronous>, transform_indices = @transform_20, window_bounds = array<i64: 2, 32, 32>}, {pipeline_mode = #tpu.pipeline_mode<synchronous>, transform_indices = @transform_21, window_bounds = array<i64: 1, 32>}, {transform_indices = @transform_22, window_bounds = array<i64: 1, 16, 32>}]} {
    %c0 = arith.constant 0 : index
    %c0_0 = arith.constant 0 : index
    %c0_1 = arith.constant 0 : index
    %0 = vector.load %arg1[%c0, %c0_0, %c0_1] : memref<1x16x64xf32, #tpu.memory_space<vmem>>, vector<1x16x64xf32>
    %1 = vector.shape_cast %0 : vector<1x16x64xf32> to vector<16x64xf32>
    %2 = arith.mulf %1, %1 : vector<16x64xf32>
    %cst = arith.constant dense<0.000000e+00> : vector<16xf32>
    %3 = vector.multi_reduction <add>, %2, %cst [1] : vector<16x64xf32> to vector<16xf32>
    %4 = vector.shape_cast %3 : vector<16xf32> to vector<16x1xf32>
    %5 = math.sqrt %4 : vector<16x1xf32>
    %cst_2 = arith.constant 9.99999996E-13 : f32
    %6 = vector.broadcast %cst_2 : f32 to vector<16x1xf32>
    %7 = arith.maximumf %5, %6 : vector<16x1xf32>
    %8 = tpu.reciprocal %7 : vector<16x1xf32> -> vector<16x1xf32>
    %9 = vector.broadcast %8 : vector<16x1xf32> to vector<16x64xf32>
    %10 = arith.mulf %1, %9 : vector<16x64xf32>
    %c0_3 = arith.constant 0 : index
    %c0_4 = arith.constant 0 : index
    %11 = vector.load %arg4[%c0_3, %c0_4] : memref<64x32xf32, #tpu.memory_space<vmem>>, vector<64x32xf32>
    %cst_5 = arith.constant dense<0.000000e+00> : vector<16x32xf32>
    %12 = tpu.matmul %10, %11, %cst_5 {dimension_numbers = #tpu.dot_dimension_numbers<[1], [0], [0], [1], [0, 0, 1, 1], [], []>} : vector<16x64xf32>, vector<64x32xf32>, vector<16x32xf32> -> vector<16x32xf32>
    %c0_6 = arith.constant 0 : index
    %c0_7 = arith.constant 0 : index
    %13 = vector.load %arg5[%c0_6, %c0_7] : memref<1x32xf32, #tpu.memory_space<vmem>>, vector<1x32xf32>
    %14 = vector.broadcast %13 : vector<1x32xf32> to vector<16x32xf32>
    %15 = arith.addf %12, %14 : vector<16x32xf32>
    %c0_8 = arith.constant 0 : index
    %c0_9 = arith.constant 0 : index
    %16 = vector.load %arg13[%c0_8, %c0_9] : memref<32x32xf32, #tpu.memory_space<vmem>>, vector<32x32xf32>
    %cst_10 = arith.constant dense<0.000000e+00> : vector<16x32xf32>
    %17 = tpu.matmul %15, %16, %cst_10 {dimension_numbers = #tpu.dot_dimension_numbers<[1], [0], [0], [1], [0, 0, 1, 1], [], []>} : vector<16x32xf32>, vector<32x32xf32>, vector<16x32xf32> -> vector<16x32xf32>
    %c0_11 = arith.constant 0 : index
    %c0_12 = arith.constant 0 : index
    %18 = vector.load %arg14[%c0_11, %c0_12] : memref<1x32xf32, #tpu.memory_space<vmem>>, vector<1x32xf32>
    %19 = vector.broadcast %18 : vector<1x32xf32> to vector<16x32xf32>
    %20 = arith.addf %17, %19 : vector<16x32xf32>
    %c0_13 = arith.constant 0 : index
    %c0_14 = arith.constant 0 : index
    %c0_15 = arith.constant 0 : index
    %21 = vector.load %arg2[%c0_13, %c0_14, %c0_15] : memref<1x1x32xf32, #tpu.memory_space<vmem>>, vector<1x1x32xf32>
    %22 = vector.shape_cast %21 : vector<1x1x32xf32> to vector<1x32xf32>
    %c0_16 = arith.constant 0 : index
    %c0_17 = arith.constant 0 : index
    %23 = vector.load %arg7[%c0_16, %c0_17] : memref<32x32xf32, #tpu.memory_space<vmem>>, vector<32x32xf32>
    %cst_18 = arith.constant dense<0.000000e+00> : vector<1x32xf32>
    %24 = tpu.matmul %22, %23, %cst_18 {dimension_numbers = #tpu.dot_dimension_numbers<[1], [0], [0], [1], [0, 0, 1, 1], [], []>} : vector<1x32xf32>, vector<32x32xf32>, vector<1x32xf32> -> vector<1x32xf32>
    %c0_19 = arith.constant 0 : index
    %c0_20 = arith.constant 0 : index
    %25 = vector.load %arg8[%c0_19, %c0_20] : memref<1x32xf32, #tpu.memory_space<vmem>>, vector<1x32xf32>
    %26 = arith.addf %24, %25 : vector<1x32xf32>
    %cst_21 = arith.constant 0.000000e+00 : f32
    %27 = vector.broadcast %cst_21 : f32 to vector<1x32xf32>
    %28 = arith.cmpf ogt, %26, %27 : vector<1x32xf32>
    %29 = math.exp %26 : vector<1x32xf32>
    %cst_22 = arith.constant 1.000000e+00 : f32
    %30 = vector.broadcast %cst_22 : f32 to vector<1x32xf32>
    %31 = arith.subf %29, %30 : vector<1x32xf32>
    %32 = arith.select %28, %26, %31 : vector<1x32xi1>, vector<1x32xf32>
    %c0_23 = arith.constant 0 : index
    %c0_24 = arith.constant 0 : index
    %c0_25 = arith.constant 0 : index
    %33 = vector.load %arg3[%c0_23, %c0_24, %c0_25] : memref<1x1x16xf32, #tpu.memory_space<vmem>>, vector<1x1x16xf32>
    %34 = vector.shape_cast %33 : vector<1x1x16xf32> to vector<1x16xf32>
    %35 = vector.shape_cast %34 : vector<1x16xf32> to vector<1x16x1xf32>
    %36 = vector.shape_cast %34 : vector<1x16xf32> to vector<1x1x16xf32>
    %37 = vector.broadcast %35 : vector<1x16x1xf32> to vector<1x16x16xf32>
    %38 = vector.broadcast %36 : vector<1x1x16xf32> to vector<1x16x16xf32>
    %39 = arith.mulf %37, %38 : vector<1x16x16xf32>
    %cst_26 = arith.constant 5.000000e-01 : f32
    %40 = vector.broadcast %cst_26 : f32 to vector<1x16x16xf32>
    %41 = arith.cmpf ogt, %39, %40 : vector<1x16x16xf32>
    %cst_27 = arith.constant 0.000000e+00 : f32
    %cst_28 = arith.constant -1.000000e+30 : f32
    %42 = vector.broadcast %cst_27 : f32 to vector<1x16x16xf32>
    %43 = vector.broadcast %cst_28 : f32 to vector<1x16x16xf32>
    %44 = arith.select %41, %42, %43 : vector<1x16x16xi1>, vector<1x16x16xf32>
    %c0_29 = arith.constant 0 : index
    %c0_30 = arith.constant 0 : index
    %c0_31 = arith.constant 0 : index
    %45 = vector.load %arg17[%c0_29, %c0_30, %c0_31] : memref<9x32x32xf32, #tpu.memory_space<vmem>>, vector<1x32x32xf32>
    %46 = vector.shape_cast %45 : vector<1x32x32xf32> to vector<32x32xf32>
    %c1 = arith.constant 1 : index
    %c0_32 = arith.constant 0 : index
    %c0_33 = arith.constant 0 : index
    %47 = vector.load %arg17[%c1, %c0_32, %c0_33] : memref<9x32x32xf32, #tpu.memory_space<vmem>>, vector<1x32x32xf32>
    %48 = vector.shape_cast %47 : vector<1x32x32xf32> to vector<32x32xf32>
    %c2 = arith.constant 2 : index
    %c0_34 = arith.constant 0 : index
    %c0_35 = arith.constant 0 : index
    %49 = vector.load %arg17[%c2, %c0_34, %c0_35] : memref<9x32x32xf32, #tpu.memory_space<vmem>>, vector<1x32x32xf32>
    %50 = vector.shape_cast %49 : vector<1x32x32xf32> to vector<32x32xf32>
    %c3 = arith.constant 3 : index
    %c0_36 = arith.constant 0 : index
    %c0_37 = arith.constant 0 : index
    %51 = vector.load %arg17[%c3, %c0_36, %c0_37] : memref<9x32x32xf32, #tpu.memory_space<vmem>>, vector<1x32x32xf32>
    %52 = vector.shape_cast %51 : vector<1x32x32xf32> to vector<32x32xf32>
    %c4 = arith.constant 4 : index
    %c0_38 = arith.constant 0 : index
    %c0_39 = arith.constant 0 : index
    %53 = vector.load %arg17[%c4, %c0_38, %c0_39] : memref<9x32x32xf32, #tpu.memory_space<vmem>>, vector<1x32x32xf32>
    %54 = vector.shape_cast %53 : vector<1x32x32xf32> to vector<32x32xf32>
    %c5 = arith.constant 5 : index
    %c0_40 = arith.constant 0 : index
    %c0_41 = arith.constant 0 : index
    %55 = vector.load %arg17[%c5, %c0_40, %c0_41] : memref<9x32x32xf32, #tpu.memory_space<vmem>>, vector<1x32x32xf32>
    %56 = vector.shape_cast %55 : vector<1x32x32xf32> to vector<32x32xf32>
    %c6 = arith.constant 6 : index
    %c0_42 = arith.constant 0 : index
    %c0_43 = arith.constant 0 : index
    %57 = vector.load %arg17[%c6, %c0_42, %c0_43] : memref<9x32x32xf32, #tpu.memory_space<vmem>>, vector<1x32x32xf32>
    %58 = vector.shape_cast %57 : vector<1x32x32xf32> to vector<32x32xf32>
    %c7 = arith.constant 7 : index
    %c0_44 = arith.constant 0 : index
    %c0_45 = arith.constant 0 : index
    %59 = vector.load %arg17[%c7, %c0_44, %c0_45] : memref<9x32x32xf32, #tpu.memory_space<vmem>>, vector<1x32x32xf32>
    %60 = vector.shape_cast %59 : vector<1x32x32xf32> to vector<32x32xf32>
    %c8 = arith.constant 8 : index
    %c0_46 = arith.constant 0 : index
    %c0_47 = arith.constant 0 : index
    %61 = vector.load %arg17[%c8, %c0_46, %c0_47] : memref<9x32x32xf32, #tpu.memory_space<vmem>>, vector<1x32x32xf32>
    %62 = vector.shape_cast %61 : vector<1x32x32xf32> to vector<32x32xf32>
    %c0_48 = arith.constant 0 : index
    %c0_49 = arith.constant 0 : index
    %c0_50 = arith.constant 0 : index
    %63 = vector.load %arg18[%c0_48, %c0_49, %c0_50] : memref<3x1x32xf32, #tpu.memory_space<vmem>>, vector<1x1x32xf32>
    %64 = vector.shape_cast %63 : vector<1x1x32xf32> to vector<1x32xf32>
    %c1_51 = arith.constant 1 : index
    %c0_52 = arith.constant 0 : index
    %c0_53 = arith.constant 0 : index
    %65 = vector.load %arg18[%c1_51, %c0_52, %c0_53] : memref<3x1x32xf32, #tpu.memory_space<vmem>>, vector<1x1x32xf32>
    %66 = vector.shape_cast %65 : vector<1x1x32xf32> to vector<1x32xf32>
    %c2_54 = arith.constant 2 : index
    %c0_55 = arith.constant 0 : index
    %c0_56 = arith.constant 0 : index
    %67 = vector.load %arg18[%c2_54, %c0_55, %c0_56] : memref<3x1x32xf32, #tpu.memory_space<vmem>>, vector<1x1x32xf32>
    %68 = vector.shape_cast %67 : vector<1x1x32xf32> to vector<1x32xf32>
    %c0_57 = arith.constant 0 : index
    %c0_58 = arith.constant 0 : index
    %c0_59 = arith.constant 0 : index
    %69 = vector.load %arg11[%c0_57, %c0_58, %c0_59] : memref<2x32x32xf32, #tpu.memory_space<vmem>>, vector<1x32x32xf32>
    %70 = vector.shape_cast %69 : vector<1x32x32xf32> to vector<32x32xf32>
    %c1_60 = arith.constant 1 : index
    %c0_61 = arith.constant 0 : index
    %c0_62 = arith.constant 0 : index
    %71 = vector.load %arg11[%c1_60, %c0_61, %c0_62] : memref<2x32x32xf32, #tpu.memory_space<vmem>>, vector<1x32x32xf32>
    %72 = vector.shape_cast %71 : vector<1x32x32xf32> to vector<32x32xf32>
    %c0_63 = arith.constant 0 : index
    %c0_64 = arith.constant 0 : index
    %c0_65 = arith.constant 0 : index
    %73 = vector.load %arg12[%c0_63, %c0_64, %c0_65] : memref<2x1x32xf32, #tpu.memory_space<vmem>>, vector<1x1x32xf32>
    %74 = vector.shape_cast %73 : vector<1x1x32xf32> to vector<1x32xf32>
    %c1_66 = arith.constant 1 : index
    %c0_67 = arith.constant 0 : index
    %c0_68 = arith.constant 0 : index
    %75 = vector.load %arg12[%c1_66, %c0_67, %c0_68] : memref<2x1x32xf32, #tpu.memory_space<vmem>>, vector<1x1x32xf32>
    %76 = vector.shape_cast %75 : vector<1x1x32xf32> to vector<1x32xf32>
    %c0_69 = arith.constant 0 : index
    %c0_70 = arith.constant 0 : index
    %77 = vector.load %arg15[%c0_69, %c0_70] : memref<32x32xf32, #tpu.memory_space<vmem>>, vector<32x32xf32>
    %c0_71 = arith.constant 0 : index
    %c0_72 = arith.constant 0 : index
    %78 = vector.load %arg16[%c0_71, %c0_72] : memref<1x32xf32, #tpu.memory_space<vmem>>, vector<1x32xf32>
    %c0_73 = arith.constant 0 : index
    %c0_74 = arith.constant 0 : index
    %c0_75 = arith.constant 0 : index
    %79 = vector.load %arg19[%c0_73, %c0_74, %c0_75] : memref<2x32x32xf32, #tpu.memory_space<vmem>>, vector<1x32x32xf32>
    %80 = vector.shape_cast %79 : vector<1x32x32xf32> to vector<32x32xf32>
    %c1_76 = arith.constant 1 : index
    %c0_77 = arith.constant 0 : index
    %c0_78 = arith.constant 0 : index
    %81 = vector.load %arg19[%c1_76, %c0_77, %c0_78] : memref<2x32x32xf32, #tpu.memory_space<vmem>>, vector<1x32x32xf32>
    %82 = vector.shape_cast %81 : vector<1x32x32xf32> to vector<32x32xf32>
    %c0_79 = arith.constant 0 : index
    %c0_80 = arith.constant 0 : index
    %83 = vector.load %arg20[%c0_79, %c0_80] : memref<1x32xf32, #tpu.memory_space<vmem>>, vector<1x32xf32>
    %c0_81 = arith.constant 0 : index
    %c0_82 = arith.constant 0 : index
    %c0_83 = arith.constant 0 : index
    %84 = vector.load %arg9[%c0_81, %c0_82, %c0_83] : memref<2x32x32xf32, #tpu.memory_space<vmem>>, vector<1x32x32xf32>
    %85 = vector.shape_cast %84 : vector<1x32x32xf32> to vector<32x32xf32>
    %cst_84 = arith.constant dense<0.000000e+00> : vector<1x32xf32>
    %86 = tpu.matmul %32, %85, %cst_84 {dimension_numbers = #tpu.dot_dimension_numbers<[1], [0], [0], [1], [0, 0, 1, 1], [], []>} : vector<1x32xf32>, vector<32x32xf32>, vector<1x32xf32> -> vector<1x32xf32>
    %c0_85 = arith.constant 0 : index
    %c0_86 = arith.constant 0 : index
    %c0_87 = arith.constant 0 : index
    %87 = vector.load %arg10[%c0_85, %c0_86, %c0_87] : memref<2x1x32xf32, #tpu.memory_space<vmem>>, vector<1x1x32xf32>
    %88 = vector.shape_cast %87 : vector<1x1x32xf32> to vector<1x32xf32>
    %89 = arith.addf %86, %88 : vector<1x32xf32>
    %c0_88 = arith.constant 0 : index
    %c0_89 = arith.constant 0 : index
    %90 = vector.load %arg6[%c0_88, %c0_89] : memref<1x32xf32, #tpu.memory_space<vmem>>, vector<1x32xf32>
    %cst_90 = arith.constant dense<0.000000e+00> : vector<1x32xf32>
    %91 = tpu.matmul %90, %77, %cst_90 {dimension_numbers = #tpu.dot_dimension_numbers<[1], [0], [0], [1], [0, 0, 1, 1], [], []>} : vector<1x32xf32>, vector<32x32xf32>, vector<1x32xf32> -> vector<1x32xf32>
    %92 = arith.addf %91, %78 : vector<1x32xf32>
    %c0_91 = arith.constant 0 : index
    %c0_92 = arith.constant 0 : index
    %93 = vector.load %arg6[%c0_91, %c0_92] : memref<1x32xf32, #tpu.memory_space<vmem>>, vector<1x32xf32>
    %94 = vector.shape_cast %93 : vector<1x32xf32> to vector<1x32xf32>
    %95 = vector.broadcast %94 : vector<1x32xf32> to vector<16x32xf32>
    %96 = vector.shape_cast %92 : vector<1x32xf32> to vector<1x32xf32>
    %97 = vector.broadcast %96 : vector<1x32xf32> to vector<16x32xf32>
    %cst_93 = arith.constant dense<0.000000e+00> : vector<1x32xf32>
    %98 = tpu.matmul %89, %70, %cst_93 {dimension_numbers = #tpu.dot_dimension_numbers<[1], [0], [0], [1], [0, 0, 1, 1], [], []>} : vector<1x32xf32>, vector<32x32xf32>, vector<1x32xf32> -> vector<1x32xf32>
    %99 = arith.addf %98, %74 : vector<1x32xf32>
    %cst_94 = arith.constant dense<0.000000e+00> : vector<1x32xf32>
    %100 = tpu.matmul %89, %72, %cst_94 {dimension_numbers = #tpu.dot_dimension_numbers<[1], [0], [0], [1], [0, 0, 1, 1], [], []>} : vector<1x32xf32>, vector<32x32xf32>, vector<1x32xf32> -> vector<1x32xf32>
    %101 = arith.addf %100, %76 : vector<1x32xf32>
    %102 = arith.mulf %20, %97 : vector<16x32xf32>
    %cst_95 = arith.constant dense<0.000000e+00> : vector<16x32xf32>
    %103 = tpu.matmul %15, %46, %cst_95 {dimension_numbers = #tpu.dot_dimension_numbers<[1], [0], [0], [1], [0, 0, 1, 1], [], []>} : vector<16x32xf32>, vector<32x32xf32>, vector<16x32xf32> -> vector<16x32xf32>
    %cst_96 = arith.constant dense<0.000000e+00> : vector<16x32xf32>
    %104 = tpu.matmul %95, %48, %cst_96 {dimension_numbers = #tpu.dot_dimension_numbers<[1], [0], [0], [1], [0, 0, 1, 1], [], []>} : vector<16x32xf32>, vector<32x32xf32>, vector<16x32xf32> -> vector<16x32xf32>
    %105 = arith.addf %103, %104 : vector<16x32xf32>
    %cst_97 = arith.constant dense<0.000000e+00> : vector<16x32xf32>
    %106 = tpu.matmul %102, %50, %cst_97 {dimension_numbers = #tpu.dot_dimension_numbers<[1], [0], [0], [1], [0, 0, 1, 1], [], []>} : vector<16x32xf32>, vector<32x32xf32>, vector<16x32xf32> -> vector<16x32xf32>
    %107 = arith.addf %105, %106 : vector<16x32xf32>
    %108 = vector.broadcast %64 : vector<1x32xf32> to vector<16x32xf32>
    %109 = arith.addf %107, %108 : vector<16x32xf32>
    %cst_98 = arith.constant dense<0.000000e+00> : vector<16x32xf32>
    %110 = tpu.matmul %15, %52, %cst_98 {dimension_numbers = #tpu.dot_dimension_numbers<[1], [0], [0], [1], [0, 0, 1, 1], [], []>} : vector<16x32xf32>, vector<32x32xf32>, vector<16x32xf32> -> vector<16x32xf32>
    %cst_99 = arith.constant dense<0.000000e+00> : vector<16x32xf32>
    %111 = tpu.matmul %95, %54, %cst_99 {dimension_numbers = #tpu.dot_dimension_numbers<[1], [0], [0], [1], [0, 0, 1, 1], [], []>} : vector<16x32xf32>, vector<32x32xf32>, vector<16x32xf32> -> vector<16x32xf32>
    %112 = arith.addf %110, %111 : vector<16x32xf32>
    %cst_100 = arith.constant dense<0.000000e+00> : vector<16x32xf32>
    %113 = tpu.matmul %102, %56, %cst_100 {dimension_numbers = #tpu.dot_dimension_numbers<[1], [0], [0], [1], [0, 0, 1, 1], [], []>} : vector<16x32xf32>, vector<32x32xf32>, vector<16x32xf32> -> vector<16x32xf32>
    %114 = arith.addf %112, %113 : vector<16x32xf32>
    %115 = vector.broadcast %66 : vector<1x32xf32> to vector<16x32xf32>
    %116 = arith.addf %114, %115 : vector<16x32xf32>
    %cst_101 = arith.constant dense<0.000000e+00> : vector<16x32xf32>
    %117 = tpu.matmul %15, %58, %cst_101 {dimension_numbers = #tpu.dot_dimension_numbers<[1], [0], [0], [1], [0, 0, 1, 1], [], []>} : vector<16x32xf32>, vector<32x32xf32>, vector<16x32xf32> -> vector<16x32xf32>
    %cst_102 = arith.constant dense<0.000000e+00> : vector<16x32xf32>
    %118 = tpu.matmul %95, %60, %cst_102 {dimension_numbers = #tpu.dot_dimension_numbers<[1], [0], [0], [1], [0, 0, 1, 1], [], []>} : vector<16x32xf32>, vector<32x32xf32>, vector<16x32xf32> -> vector<16x32xf32>
    %119 = arith.addf %117, %118 : vector<16x32xf32>
    %cst_103 = arith.constant dense<0.000000e+00> : vector<16x32xf32>
    %120 = tpu.matmul %102, %62, %cst_103 {dimension_numbers = #tpu.dot_dimension_numbers<[1], [0], [0], [1], [0, 0, 1, 1], [], []>} : vector<16x32xf32>, vector<32x32xf32>, vector<16x32xf32> -> vector<16x32xf32>
    %121 = arith.addf %119, %120 : vector<16x32xf32>
    %122 = vector.broadcast %68 : vector<1x32xf32> to vector<16x32xf32>
    %123 = arith.addf %121, %122 : vector<16x32xf32>
    %124 = vector.shape_cast %109 : vector<16x32xf32> to vector<1x16x32xf32>
    %125 = vector.shape_cast %116 : vector<16x32xf32> to vector<1x16x32xf32>
    %126 = vector.shape_cast %99 : vector<1x32xf32> to vector<1x1x32xf32>
    %127 = vector.broadcast %126 : vector<1x1x32xf32> to vector<1x16x32xf32>
    %128 = arith.mulf %125, %127 : vector<1x16x32xf32>
    %129 = vector.shape_cast %123 : vector<16x32xf32> to vector<1x16x32xf32>
    %130 = vector.shape_cast %101 : vector<1x32xf32> to vector<1x1x32xf32>
    %131 = vector.broadcast %130 : vector<1x1x32xf32> to vector<1x16x32xf32>
    %132 = arith.mulf %129, %131 : vector<1x16x32xf32>
    "tpu.trace_start"() <{level = 10 : i32, message = "bnc,bmc->bnm"}> : () -> ()
    %cst_104 = arith.constant dense<0.000000e+00> : vector<1x16x16xf32>
    %133 = tpu.matmul %124, %128, %cst_104 {dimension_numbers = #tpu.dot_dimension_numbers<[2], [2], [1], [1], [0, 0, 0, 1, 1, 1], [0], [0]>} : vector<1x16x32xf32>, vector<1x16x32xf32>, vector<1x16x16xf32> -> vector<1x16x16xf32>
    "tpu.trace_stop"() : () -> ()
    %134 = arith.addf %133, %44 : vector<1x16x16xf32>
    %cst_105 = arith.constant dense<0xFF800000> : vector<1x16xf32>
    %135 = vector.multi_reduction <maximumf>, %134, %cst_105 [2] : vector<1x16x16xf32> to vector<1x16xf32>
    %136 = vector.shape_cast %135 : vector<1x16xf32> to vector<1x16x1xf32>
    %137 = vector.broadcast %136 : vector<1x16x1xf32> to vector<1x16x16xf32>
    %138 = arith.subf %134, %137 : vector<1x16x16xf32>
    %139 = math.exp %138 : vector<1x16x16xf32>
    %cst_106 = arith.constant dense<0.000000e+00> : vector<1x16xf32>
    %140 = vector.multi_reduction <add>, %139, %cst_106 [2] : vector<1x16x16xf32> to vector<1x16xf32>
    %141 = vector.shape_cast %140 : vector<1x16xf32> to vector<1x16x1xf32>
    %142 = tpu.reciprocal %141 : vector<1x16x1xf32> -> vector<1x16x1xf32>
    %143 = vector.broadcast %142 : vector<1x16x1xf32> to vector<1x16x16xf32>
    %144 = arith.mulf %139, %143 : vector<1x16x16xf32>
    "tpu.trace_start"() <{level = 10 : i32, message = "bnm,bmc->bnc"}> : () -> ()
    %cst_107 = arith.constant dense<0.000000e+00> : vector<1x16x32xf32>
    %145 = tpu.matmul %144, %132, %cst_107 {dimension_numbers = #tpu.dot_dimension_numbers<[2], [1], [1], [2], [0, 0, 0, 1, 1, 2], [0], [0]>} : vector<1x16x16xf32>, vector<1x16x32xf32>, vector<1x16x32xf32> -> vector<1x16x32xf32>
    "tpu.trace_stop"() : () -> ()
    %146 = vector.shape_cast %145 : vector<1x16x32xf32> to vector<16x32xf32>
    %cst_108 = arith.constant dense<0.000000e+00> : vector<16x32xf32>
    %147 = tpu.matmul %95, %80, %cst_108 {dimension_numbers = #tpu.dot_dimension_numbers<[1], [0], [0], [1], [0, 0, 1, 1], [], []>} : vector<16x32xf32>, vector<32x32xf32>, vector<16x32xf32> -> vector<16x32xf32>
    %cst_109 = arith.constant dense<0.000000e+00> : vector<16x32xf32>
    %148 = tpu.matmul %146, %82, %cst_109 {dimension_numbers = #tpu.dot_dimension_numbers<[1], [0], [0], [1], [0, 0, 1, 1], [], []>} : vector<16x32xf32>, vector<32x32xf32>, vector<16x32xf32> -> vector<16x32xf32>
    %149 = arith.addf %147, %148 : vector<16x32xf32>
    %150 = vector.broadcast %83 : vector<1x32xf32> to vector<16x32xf32>
    %151 = arith.addf %149, %150 : vector<16x32xf32>
    %c1_i32 = arith.constant 1 : i32
    %152 = arith.index_cast %c1_i32 : i32 to index
    %c0_110 = arith.constant 0 : index
    %c0_111 = arith.constant 0 : index
    %153 = vector.load %arg9[%152, %c0_110, %c0_111] : memref<2x32x32xf32, #tpu.memory_space<vmem>>, vector<1x32x32xf32>
    %154 = vector.shape_cast %153 : vector<1x32x32xf32> to vector<32x32xf32>
    %cst_112 = arith.constant dense<0.000000e+00> : vector<1x32xf32>
    %155 = tpu.matmul %32, %154, %cst_112 {dimension_numbers = #tpu.dot_dimension_numbers<[1], [0], [0], [1], [0, 0, 1, 1], [], []>} : vector<1x32xf32>, vector<32x32xf32>, vector<1x32xf32> -> vector<1x32xf32>
    %156 = arith.index_cast %c1_i32 : i32 to index
    %c0_113 = arith.constant 0 : index
    %c0_114 = arith.constant 0 : index
    %157 = vector.load %arg10[%156, %c0_113, %c0_114] : memref<2x1x32xf32, #tpu.memory_space<vmem>>, vector<1x1x32xf32>
    %158 = vector.shape_cast %157 : vector<1x1x32xf32> to vector<1x32xf32>
    %159 = arith.addf %155, %158 : vector<1x32xf32>
    %cst_115 = arith.constant dense<0.000000e+00> : vector<16x32xf32>
    %160 = tpu.matmul %151, %77, %cst_115 {dimension_numbers = #tpu.dot_dimension_numbers<[1], [0], [0], [1], [0, 0, 1, 1], [], []>} : vector<16x32xf32>, vector<32x32xf32>, vector<16x32xf32> -> vector<16x32xf32>
    %161 = vector.broadcast %78 : vector<1x32xf32> to vector<16x32xf32>
    %162 = arith.addf %160, %161 : vector<16x32xf32>
    %cst_116 = arith.constant dense<0.000000e+00> : vector<1x32xf32>
    %163 = tpu.matmul %159, %70, %cst_116 {dimension_numbers = #tpu.dot_dimension_numbers<[1], [0], [0], [1], [0, 0, 1, 1], [], []>} : vector<1x32xf32>, vector<32x32xf32>, vector<1x32xf32> -> vector<1x32xf32>
    %164 = arith.addf %163, %74 : vector<1x32xf32>
    %cst_117 = arith.constant dense<0.000000e+00> : vector<1x32xf32>
    %165 = tpu.matmul %159, %72, %cst_117 {dimension_numbers = #tpu.dot_dimension_numbers<[1], [0], [0], [1], [0, 0, 1, 1], [], []>} : vector<1x32xf32>, vector<32x32xf32>, vector<1x32xf32> -> vector<1x32xf32>
    %166 = arith.addf %165, %76 : vector<1x32xf32>
    %167 = arith.mulf %20, %162 : vector<16x32xf32>
    %cst_118 = arith.constant dense<0.000000e+00> : vector<16x32xf32>
    %168 = tpu.matmul %15, %46, %cst_118 {dimension_numbers = #tpu.dot_dimension_numbers<[1], [0], [0], [1], [0, 0, 1, 1], [], []>} : vector<16x32xf32>, vector<32x32xf32>, vector<16x32xf32> -> vector<16x32xf32>
    %cst_119 = arith.constant dense<0.000000e+00> : vector<16x32xf32>
    %169 = tpu.matmul %151, %48, %cst_119 {dimension_numbers = #tpu.dot_dimension_numbers<[1], [0], [0], [1], [0, 0, 1, 1], [], []>} : vector<16x32xf32>, vector<32x32xf32>, vector<16x32xf32> -> vector<16x32xf32>
    %170 = arith.addf %168, %169 : vector<16x32xf32>
    %cst_120 = arith.constant dense<0.000000e+00> : vector<16x32xf32>
    %171 = tpu.matmul %167, %50, %cst_120 {dimension_numbers = #tpu.dot_dimension_numbers<[1], [0], [0], [1], [0, 0, 1, 1], [], []>} : vector<16x32xf32>, vector<32x32xf32>, vector<16x32xf32> -> vector<16x32xf32>
    %172 = arith.addf %170, %171 : vector<16x32xf32>
    %173 = vector.broadcast %64 : vector<1x32xf32> to vector<16x32xf32>
    %174 = arith.addf %172, %173 : vector<16x32xf32>
    %cst_121 = arith.constant dense<0.000000e+00> : vector<16x32xf32>
    %175 = tpu.matmul %15, %52, %cst_121 {dimension_numbers = #tpu.dot_dimension_numbers<[1], [0], [0], [1], [0, 0, 1, 1], [], []>} : vector<16x32xf32>, vector<32x32xf32>, vector<16x32xf32> -> vector<16x32xf32>
    %cst_122 = arith.constant dense<0.000000e+00> : vector<16x32xf32>
    %176 = tpu.matmul %151, %54, %cst_122 {dimension_numbers = #tpu.dot_dimension_numbers<[1], [0], [0], [1], [0, 0, 1, 1], [], []>} : vector<16x32xf32>, vector<32x32xf32>, vector<16x32xf32> -> vector<16x32xf32>
    %177 = arith.addf %175, %176 : vector<16x32xf32>
    %cst_123 = arith.constant dense<0.000000e+00> : vector<16x32xf32>
    %178 = tpu.matmul %167, %56, %cst_123 {dimension_numbers = #tpu.dot_dimension_numbers<[1], [0], [0], [1], [0, 0, 1, 1], [], []>} : vector<16x32xf32>, vector<32x32xf32>, vector<16x32xf32> -> vector<16x32xf32>
    %179 = arith.addf %177, %178 : vector<16x32xf32>
    %180 = vector.broadcast %66 : vector<1x32xf32> to vector<16x32xf32>
    %181 = arith.addf %179, %180 : vector<16x32xf32>
    %cst_124 = arith.constant dense<0.000000e+00> : vector<16x32xf32>
    %182 = tpu.matmul %15, %58, %cst_124 {dimension_numbers = #tpu.dot_dimension_numbers<[1], [0], [0], [1], [0, 0, 1, 1], [], []>} : vector<16x32xf32>, vector<32x32xf32>, vector<16x32xf32> -> vector<16x32xf32>
    %cst_125 = arith.constant dense<0.000000e+00> : vector<16x32xf32>
    %183 = tpu.matmul %151, %60, %cst_125 {dimension_numbers = #tpu.dot_dimension_numbers<[1], [0], [0], [1], [0, 0, 1, 1], [], []>} : vector<16x32xf32>, vector<32x32xf32>, vector<16x32xf32> -> vector<16x32xf32>
    %184 = arith.addf %182, %183 : vector<16x32xf32>
    %cst_126 = arith.constant dense<0.000000e+00> : vector<16x32xf32>
    %185 = tpu.matmul %167, %62, %cst_126 {dimension_numbers = #tpu.dot_dimension_numbers<[1], [0], [0], [1], [0, 0, 1, 1], [], []>} : vector<16x32xf32>, vector<32x32xf32>, vector<16x32xf32> -> vector<16x32xf32>
    %186 = arith.addf %184, %185 : vector<16x32xf32>
    %187 = vector.broadcast %68 : vector<1x32xf32> to vector<16x32xf32>
    %188 = arith.addf %186, %187 : vector<16x32xf32>
    %189 = vector.shape_cast %174 : vector<16x32xf32> to vector<1x16x32xf32>
    %190 = vector.shape_cast %181 : vector<16x32xf32> to vector<1x16x32xf32>
    %191 = vector.shape_cast %164 : vector<1x32xf32> to vector<1x1x32xf32>
    %192 = vector.broadcast %191 : vector<1x1x32xf32> to vector<1x16x32xf32>
    %193 = arith.mulf %190, %192 : vector<1x16x32xf32>
    %194 = vector.shape_cast %188 : vector<16x32xf32> to vector<1x16x32xf32>
    %195 = vector.shape_cast %166 : vector<1x32xf32> to vector<1x1x32xf32>
    %196 = vector.broadcast %195 : vector<1x1x32xf32> to vector<1x16x32xf32>
    %197 = arith.mulf %194, %196 : vector<1x16x32xf32>
    "tpu.trace_start"() <{level = 10 : i32, message = "bnc,bmc->bnm"}> : () -> ()
    %cst_127 = arith.constant dense<0.000000e+00> : vector<1x16x16xf32>
    %198 = tpu.matmul %189, %193, %cst_127 {dimension_numbers = #tpu.dot_dimension_numbers<[2], [2], [1], [1], [0, 0, 0, 1, 1, 1], [0], [0]>} : vector<1x16x32xf32>, vector<1x16x32xf32>, vector<1x16x16xf32> -> vector<1x16x16xf32>
    "tpu.trace_stop"() : () -> ()
    %199 = arith.addf %198, %44 : vector<1x16x16xf32>
    %cst_128 = arith.constant dense<0xFF800000> : vector<1x16xf32>
    %200 = vector.multi_reduction <maximumf>, %199, %cst_128 [2] : vector<1x16x16xf32> to vector<1x16xf32>
    %201 = vector.shape_cast %200 : vector<1x16xf32> to vector<1x16x1xf32>
    %202 = vector.broadcast %201 : vector<1x16x1xf32> to vector<1x16x16xf32>
    %203 = arith.subf %199, %202 : vector<1x16x16xf32>
    %204 = math.exp %203 : vector<1x16x16xf32>
    %cst_129 = arith.constant dense<0.000000e+00> : vector<1x16xf32>
    %205 = vector.multi_reduction <add>, %204, %cst_129 [2] : vector<1x16x16xf32> to vector<1x16xf32>
    %206 = vector.shape_cast %205 : vector<1x16xf32> to vector<1x16x1xf32>
    %207 = tpu.reciprocal %206 : vector<1x16x1xf32> -> vector<1x16x1xf32>
    %208 = vector.broadcast %207 : vector<1x16x1xf32> to vector<1x16x16xf32>
    %209 = arith.mulf %204, %208 : vector<1x16x16xf32>
    "tpu.trace_start"() <{level = 10 : i32, message = "bnm,bmc->bnc"}> : () -> ()
    %cst_130 = arith.constant dense<0.000000e+00> : vector<1x16x32xf32>
    %210 = tpu.matmul %209, %197, %cst_130 {dimension_numbers = #tpu.dot_dimension_numbers<[2], [1], [1], [2], [0, 0, 0, 1, 1, 2], [0], [0]>} : vector<1x16x16xf32>, vector<1x16x32xf32>, vector<1x16x32xf32> -> vector<1x16x32xf32>
    "tpu.trace_stop"() : () -> ()
    %211 = vector.shape_cast %210 : vector<1x16x32xf32> to vector<16x32xf32>
    %cst_131 = arith.constant dense<0.000000e+00> : vector<16x32xf32>
    %212 = tpu.matmul %151, %80, %cst_131 {dimension_numbers = #tpu.dot_dimension_numbers<[1], [0], [0], [1], [0, 0, 1, 1], [], []>} : vector<16x32xf32>, vector<32x32xf32>, vector<16x32xf32> -> vector<16x32xf32>
    %cst_132 = arith.constant dense<0.000000e+00> : vector<16x32xf32>
    %213 = tpu.matmul %211, %82, %cst_132 {dimension_numbers = #tpu.dot_dimension_numbers<[1], [0], [0], [1], [0, 0, 1, 1], [], []>} : vector<16x32xf32>, vector<32x32xf32>, vector<16x32xf32> -> vector<16x32xf32>
    %214 = arith.addf %212, %213 : vector<16x32xf32>
    %215 = vector.broadcast %83 : vector<1x32xf32> to vector<16x32xf32>
    %216 = arith.addf %214, %215 : vector<16x32xf32>
    %c1_i32_133 = arith.constant 1 : i32
    %c0_134 = arith.constant 0 : index
    %c0_135 = arith.constant 0 : index
    %c0_136 = arith.constant 0 : index
    %217 = vector.load %arg21[%c0_134, %c0_135, %c0_136] : memref<2x32x32xf32, #tpu.memory_space<vmem>>, vector<1x32x32xf32>
    %218 = vector.shape_cast %217 : vector<1x32x32xf32> to vector<32x32xf32>
    %cst_137 = arith.constant dense<0.000000e+00> : vector<16x32xf32>
    %219 = tpu.matmul %15, %218, %cst_137 {dimension_numbers = #tpu.dot_dimension_numbers<[1], [0], [0], [1], [0, 0, 1, 1], [], []>} : vector<16x32xf32>, vector<32x32xf32>, vector<16x32xf32> -> vector<16x32xf32>
    %c1_138 = arith.constant 1 : index
    %c0_139 = arith.constant 0 : index
    %c0_140 = arith.constant 0 : index
    %220 = vector.load %arg21[%c1_138, %c0_139, %c0_140] : memref<2x32x32xf32, #tpu.memory_space<vmem>>, vector<1x32x32xf32>
    %221 = vector.shape_cast %220 : vector<1x32x32xf32> to vector<32x32xf32>
    %cst_141 = arith.constant dense<0.000000e+00> : vector<16x32xf32>
    %222 = tpu.matmul %216, %221, %cst_141 {dimension_numbers = #tpu.dot_dimension_numbers<[1], [0], [0], [1], [0, 0, 1, 1], [], []>} : vector<16x32xf32>, vector<32x32xf32>, vector<16x32xf32> -> vector<16x32xf32>
    %223 = arith.addf %219, %222 : vector<16x32xf32>
    %c0_142 = arith.constant 0 : index
    %c0_143 = arith.constant 0 : index
    %224 = vector.load %arg22[%c0_142, %c0_143] : memref<1x32xf32, #tpu.memory_space<vmem>>, vector<1x32xf32>
    %225 = vector.broadcast %224 : vector<1x32xf32> to vector<16x32xf32>
    %226 = arith.addf %223, %225 : vector<16x32xf32>
    %227 = vector.shape_cast %226 : vector<16x32xf32> to vector<1x16x32xf32>
    %c0_144 = arith.constant 0 : index
    %c0_145 = arith.constant 0 : index
    %c0_146 = arith.constant 0 : index
    %228 = vector.load %arg23[%c0_144, %c0_145, %c0_146] : memref<1x16x32xf32, #tpu.memory_space<vmem>>, vector<1x16x32xf32>
    tpu.vector_store %arg23[%c0_144, %c0_145, %c0_146], %227 {strides = array<i32>} : memref<1x16x32xf32, #tpu.memory_space<vmem>>, vector<1x16x32xf32>,
    return
  }
  func.func @transform_0(%arg0: i32) -> (i32, i32, i32) {
    %c0_i32 = arith.constant 0 : i32
    %c0_i32_0 = arith.constant 0 : i32
    %c0_i32_1 = arith.constant 0 : i32
    return %arg0, %c0_i32, %c0_i32_0 : i32, i32, i32
  }
  func.func @transform_1(%arg0: i32) -> (i32, i32, i32) {
    %c0_i32 = arith.constant 0 : i32
    %c0_i32_0 = arith.constant 0 : i32
    %c0_i32_1 = arith.constant 0 : i32
    return %arg0, %c0_i32, %c0_i32_0 : i32, i32, i32
  }
  func.func @transform_2(%arg0: i32) -> (i32, i32, i32) {
    %c0_i32 = arith.constant 0 : i32
    %c0_i32_0 = arith.constant 0 : i32
    %c0_i32_1 = arith.constant 0 : i32
    return %arg0, %c0_i32, %c0_i32_0 : i32, i32, i32
  }
  func.func @transform_3(%arg0: i32) -> (i32, i32) {
    %c0_i32 = arith.constant 0 : i32
    %c0_i32_0 = arith.constant 0 : i32
    %c0_i32_1 = arith.constant 0 : i32
    return %c0_i32, %c0_i32_0 : i32, i32
  }
  func.func @transform_4(%arg0: i32) -> (i32, i32) {
    %c0_i32 = arith.constant 0 : i32
    %c0_i32_0 = arith.constant 0 : i32
    %c0_i32_1 = arith.constant 0 : i32
    return %c0_i32, %c0_i32_0 : i32, i32
  }
  func.func @transform_5(%arg0: i32) -> (i32, i32) {
    %c0_i32 = arith.constant 0 : i32
    %c0_i32_0 = arith.constant 0 : i32
    %c0_i32_1 = arith.constant 0 : i32
    return %c0_i32, %c0_i32_0 : i32, i32
  }
  func.func @transform_6(%arg0: i32) -> (i32, i32) {
    %c0_i32 = arith.constant 0 : i32
    %c0_i32_0 = arith.constant 0 : i32
    %c0_i32_1 = arith.constant 0 : i32
    return %c0_i32, %c0_i32_0 : i32, i32
  }
  func.func @transform_7(%arg0: i32) -> (i32, i32) {
    %c0_i32 = arith.constant 0 : i32
    %c0_i32_0 = arith.constant 0 : i32
    %c0_i32_1 = arith.constant 0 : i32
    return %c0_i32, %c0_i32_0 : i32, i32
  }
  func.func @transform_8(%arg0: i32) -> (i32, i32, i32) {
    %c0_i32 = arith.constant 0 : i32
    %c0_i32_0 = arith.constant 0 : i32
    %c0_i32_1 = arith.constant 0 : i32
    %c0_i32_2 = arith.constant 0 : i32
    return %c0_i32, %c0_i32_0, %c0_i32_1 : i32, i32, i32
  }
  func.func @transform_9(%arg0: i32) -> (i32, i32, i32) {
    %c0_i32 = arith.constant 0 : i32
    %c0_i32_0 = arith.constant 0 : i32
    %c0_i32_1 = arith.constant 0 : i32
    %c0_i32_2 = arith.constant 0 : i32
    return %c0_i32, %c0_i32_0, %c0_i32_1 : i32, i32, i32
  }
  func.func @transform_10(%arg0: i32) -> (i32, i32, i32) {
    %c0_i32 = arith.constant 0 : i32
    %c0_i32_0 = arith.constant 0 : i32
    %c0_i32_1 = arith.constant 0 : i32
    %c0_i32_2 = arith.constant 0 : i32
    return %c0_i32, %c0_i32_0, %c0_i32_1 : i32, i32, i32
  }
  func.func @transform_11(%arg0: i32) -> (i32, i32, i32) {
    %c0_i32 = arith.constant 0 : i32
    %c0_i32_0 = arith.constant 0 : i32
    %c0_i32_1 = arith.constant 0 : i32
    %c0_i32_2 = arith.constant 0 : i32
    return %c0_i32, %c0_i32_0, %c0_i32_1 : i32, i32, i32
  }
  func.func @transform_12(%arg0: i32) -> (i32, i32) {
    %c0_i32 = arith.constant 0 : i32
    %c0_i32_0 = arith.constant 0 : i32
    %c0_i32_1 = arith.constant 0 : i32
    return %c0_i32, %c0_i32_0 : i32, i32
  }
  func.func @transform_13(%arg0: i32) -> (i32, i32) {
    %c0_i32 = arith.constant 0 : i32
    %c0_i32_0 = arith.constant 0 : i32
    %c0_i32_1 = arith.constant 0 : i32
    return %c0_i32, %c0_i32_0 : i32, i32
  }
  func.func @transform_14(%arg0: i32) -> (i32, i32) {
    %c0_i32 = arith.constant 0 : i32
    %c0_i32_0 = arith.constant 0 : i32
    %c0_i32_1 = arith.constant 0 : i32
    return %c0_i32, %c0_i32_0 : i32, i32
  }
  func.func @transform_15(%arg0: i32) -> (i32, i32) {
    %c0_i32 = arith.constant 0 : i32
    %c0_i32_0 = arith.constant 0 : i32
    %c0_i32_1 = arith.constant 0 : i32
    return %c0_i32, %c0_i32_0 : i32, i32
  }
  func.func @transform_16(%arg0: i32) -> (i32, i32, i32) {
    %c0_i32 = arith.constant 0 : i32
    %c0_i32_0 = arith.constant 0 : i32
    %c0_i32_1 = arith.constant 0 : i32
    %c0_i32_2 = arith.constant 0 : i32
    return %c0_i32, %c0_i32_0, %c0_i32_1 : i32, i32, i32
  }
  func.func @transform_17(%arg0: i32) -> (i32, i32, i32) {
    %c0_i32 = arith.constant 0 : i32
    %c0_i32_0 = arith.constant 0 : i32
    %c0_i32_1 = arith.constant 0 : i32
    %c0_i32_2 = arith.constant 0 : i32
    return %c0_i32, %c0_i32_0, %c0_i32_1 : i32, i32, i32
  }
  func.func @transform_18(%arg0: i32) -> (i32, i32, i32) {
    %c0_i32 = arith.constant 0 : i32
    %c0_i32_0 = arith.constant 0 : i32
    %c0_i32_1 = arith.constant 0 : i32
    %c0_i32_2 = arith.constant 0 : i32
    return %c0_i32, %c0_i32_0, %c0_i32_1 : i32, i32, i32
  }
  func.func @transform_19(%arg0: i32) -> (i32, i32) {
    %c0_i32 = arith.constant 0 : i32
    %c0_i32_0 = arith.constant 0 : i32
    %c0_i32_1 = arith.constant 0 : i32
    return %c0_i32, %c0_i32_0 : i32, i32
  }
  func.func @transform_20(%arg0: i32) -> (i32, i32, i32) {
    %c0_i32 = arith.constant 0 : i32
    %c0_i32_0 = arith.constant 0 : i32
    %c0_i32_1 = arith.constant 0 : i32
    %c0_i32_2 = arith.constant 0 : i32
    return %c0_i32, %c0_i32_0, %c0_i32_1 : i32, i32, i32
  }
  func.func @transform_21(%arg0: i32) -> (i32, i32) {
    %c0_i32 = arith.constant 0 : i32
    %c0_i32_0 = arith.constant 0 : i32
    %c0_i32_1 = arith.constant 0 : i32
    return %c0_i32, %c0_i32_0 : i32, i32
  }
  func.func @transform_22(%arg0: i32) -> (i32, i32, i32) {
    %c0_i32 = arith.constant 0 : i32
    %c0_i32_0 = arith.constant 0 : i32
    %c0_i32_1 = arith.constant 0 : i32
    return %arg0, %c0_i32, %c0_i32_0 : i32, i32, i32
  }
}

module attributes {stable_mosaic.version = 11 : i64} {
  func.func @lcgn_kernel(%arg0: i32, %arg1: memref<1x16x64xf32, #tpu.memory_space<vmem>>, %arg2: memref<1x1x32xf32, #tpu.memory_space<vmem>>, %arg3: memref<1x1x16xf32, #tpu.memory_space<vmem>>, %arg4: memref<64x32xf32, #tpu.memory_space<vmem>>, %arg5: memref<1x32xf32, #tpu.memory_space<vmem>>, %arg6: memref<1x32xf32, #tpu.memory_space<vmem>>, %arg7: memref<32x32xf32, #tpu.memory_space<vmem>>, %arg8: memref<1x32xf32, #tpu.memory_space<vmem>>, %arg9: memref<2x32x32xf32, #tpu.memory_space<vmem>>, %arg10: memref<2x1x32xf32, #tpu.memory_space<vmem>>, %arg11: memref<2x32x32xf32, #tpu.memory_space<vmem>>, %arg12: memref<2x1x32xf32, #tpu.memory_space<vmem>>, %arg13: memref<32x32xf32, #tpu.memory_space<vmem>>, %arg14: memref<1x32xf32, #tpu.memory_space<vmem>>, %arg15: memref<32x32xf32, #tpu.memory_space<vmem>>, %arg16: memref<1x32xf32, #tpu.memory_space<vmem>>, %arg17: memref<9x32x32xf32, #tpu.memory_space<vmem>>, %arg18: memref<3x1x32xf32, #tpu.memory_space<vmem>>, %arg19: memref<2x32x32xf32, #tpu.memory_space<vmem>>, %arg20: memref<1x32xf32, #tpu.memory_space<vmem>>, %arg21: memref<2x32x32xf32, #tpu.memory_space<vmem>>, %arg22: memref<1x32xf32, #tpu.memory_space<vmem>>, %arg23: memref<1x16x32xf32, #tpu.memory_space<vmem>>) attributes {dimension_semantics = [#tpu.dimension_semantics<parallel>], iteration_bounds = array<i64: 2>, scalar_prefetch = 0 : i64, scratch_operands = 0 : i64, tpu.core_type = #tpu.core_type<tc>, window_params = [{transform_indices = @transform_0, window_bounds = array<i64: 1, 16, 64>}, {transform_indices = @transform_1, window_bounds = array<i64: 1, 1, 32>}, {transform_indices = @transform_2, window_bounds = array<i64: 1, 1, 16>}, {pipeline_mode = #tpu.pipeline_mode<synchronous>, transform_indices = @transform_3, window_bounds = array<i64: 64, 32>}, {pipeline_mode = #tpu.pipeline_mode<synchronous>, transform_indices = @transform_4, window_bounds = array<i64: 1, 32>}, {pipeline_mode = #tpu.pipeline_mode<synchronous>, transform_indices = @transform_5, window_bounds = array<i64: 1, 32>}, {pipeline_mode = #tpu.pipeline_mode<synchronous>, transform_indices = @transform_6, window_bounds = array<i64: 32, 32>}, {pipeline_mode = #tpu.pipeline_mode<synchronous>, transform_indices = @transform_7, window_bounds = array<i64: 1, 32>}, {pipeline_mode = #tpu.pipeline_mode<synchronous>, transform_indices = @transform_8, window_bounds = array<i64: 2, 32, 32>}, {pipeline_mode = #tpu.pipeline_mode<synchronous>, transform_indices = @transform_9, window_bounds = array<i64: 2, 1, 32>}, {pipeline_mode = #tpu.pipeline_mode<synchronous>, transform_indices = @transform_10, window_bounds = array<i64: 2, 32, 32>}, {pipeline_mode = #tpu.pipeline_mode<synchronous>, transform_indices = @transform_11, window_bounds = array<i64: 2, 1, 32>}, {pipeline_mode = #tpu.pipeline_mode<synchronous>, transform_indices = @transform_12, window_bounds = array<i64: 32, 32>}, {pipeline_mode = #tpu.pipeline_mode<synchronous>, transform_indices = @transform_13, window_bounds = array<i64: 1, 32>}, {pipeline_mode = #tpu.pipeline_mode<synchronous>, transform_indices = @transform_14, window_bounds = array<i64: 32, 32>}, {pipeline_mode = #tpu.pipeline_mode<synchronous>, transform_indices = @transform_15, window_bounds = array<i64: 1, 32>}, {pipeline_mode = #tpu.pipeline_mode<synchronous>, transform_indices = @transform_16, window_bounds = array<i64: 9, 32, 32>}, {pipeline_mode = #tpu.pipeline_mode<synchronous>, transform_indices = @transform_17, window_bounds = array<i64: 3, 1, 32>}, {pipeline_mode = #tpu.pipeline_mode<synchronous>, transform_indices = @transform_18, window_bounds = array<i64: 2, 32, 32>}, {pipeline_mode = #tpu.pipeline_mode<synchronous>, transform_indices = @transform_19, window_bounds = array<i64: 1, 32>}, {pipeline_mode = #tpu.pipeline_mode<synchronous>, transform_indices = @transform_20, window_bounds = array<i64: 2, 32, 32>}, {pipeline_mode = #tpu.pipeline_mode<synchronous>, transform_indices = @transform_21, window_bounds = array<i64: 1, 32>}, {transform_indices = @transform_22, window_bounds = array<i64: 1, 16, 32>}]} {
    %c0 = arith.constant 0 : index
    %c0_0 = arith.constant 0 : index
    %c0_1 = arith.constant 0 : index
    %0 = vector.load %arg1[%c0, %c0_0, %c0_1] : memref<1x16x64xf32, #tpu.memory_space<vmem>>, vector<1x16x64xf32>
    %1 = vector.shape_cast %0 : vector<1x16x64xf32> to vector<16x64xf32>
    %2 = arith.mulf %1, %1 : vector<16x64xf32>
    %cst = arith.constant dense<0.000000e+00> : vector<16xf32>
    %3 = vector.multi_reduction <add>, %2, %cst [1] : vector<16x64xf32> to vector<16xf32>
    %4 = vector.shape_cast %3 : vector<16xf32> to vector<16x1xf32>
    %5 = math.sqrt %4 : vector<16x1xf32>
    %cst_2 = arith.constant 9.99999996E-13 : f32
    %6 = vector.broadcast %cst_2 : f32 to vector<16x1xf32>
    %7 = arith.maximumf %5, %6 : vector<16x1xf32>
    %8 = tpu.reciprocal %7 : vector<16x1xf32> -> vector<16x1xf32>
    %9 = vector.broadcast %8 : vector<16x1xf32> to vector<16x64xf32>
    %10 = arith.mulf %1, %9 : vector<16x64xf32>
    %c0_3 = arith.constant 0 : index
    %c0_4 = arith.constant 0 : index
    %11 = vector.load %arg4[%c0_3, %c0_4] : memref<64x32xf32, #tpu.memory_space<vmem>>, vector<64x32xf32>
    %cst_5 = arith.constant dense<0.000000e+00> : vector<16x32xf32>
    %12 = tpu.matmul %10, %11, %cst_5 {dimension_numbers = #tpu.dot_dimension_numbers<[1], [0], [0], [1], [0, 0, 1, 1], [], []>} : vector<16x64xf32>, vector<64x32xf32>, vector<16x32xf32> -> vector<16x32xf32>
    %c0_6 = arith.constant 0 : index
    %c0_7 = arith.constant 0 : index
    %13 = vector.load %arg5[%c0_6, %c0_7] : memref<1x32xf32, #tpu.memory_space<vmem>>, vector<1x32xf32>
    %14 = vector.broadcast %13 : vector<1x32xf32> to vector<16x32xf32>
    %15 = arith.addf %12, %14 : vector<16x32xf32>
    %c0_8 = arith.constant 0 : index
    %c0_9 = arith.constant 0 : index
    %16 = vector.load %arg13[%c0_8, %c0_9] : memref<32x32xf32, #tpu.memory_space<vmem>>, vector<32x32xf32>
    %cst_10 = arith.constant dense<0.000000e+00> : vector<16x32xf32>
    %17 = tpu.matmul %15, %16, %cst_10 {dimension_numbers = #tpu.dot_dimension_numbers<[1], [0], [0], [1], [0, 0, 1, 1], [], []>} : vector<16x32xf32>, vector<32x32xf32>, vector<16x32xf32> -> vector<16x32xf32>
    %c0_11 = arith.constant 0 : index
    %c0_12 = arith.constant 0 : index
    %18 = vector.load %arg14[%c0_11, %c0_12] : memref<1x32xf32, #tpu.memory_space<vmem>>, vector<1x32xf32>
    %19 = vector.broadcast %18 : vector<1x32xf32> to vector<16x32xf32>
    %20 = arith.addf %17, %19 : vector<16x32xf32>
    %c0_13 = arith.constant 0 : index
    %c0_14 = arith.constant 0 : index
    %c0_15 = arith.constant 0 : index
    %21 = vector.load %arg2[%c0_13, %c0_14, %c0_15] : memref<1x1x32xf32, #tpu.memory_space<vmem>>, vector<1x1x32xf32>
    %22 = vector.shape_cast %21 : vector<1x1x32xf32> to vector<1x32xf32>
    %c0_16 = arith.constant 0 : index
    %c0_17 = arith.constant 0 : index
    %23 = vector.load %arg7[%c0_16, %c0_17] : memref<32x32xf32, #tpu.memory_space<vmem>>, vector<32x32xf32>
    %cst_18 = arith.constant dense<0.000000e+00> : vector<1x32xf32>
    %24 = tpu.matmul %22, %23, %cst_18 {dimension_numbers = #tpu.dot_dimension_numbers<[1], [0], [0], [1], [0, 0, 1, 1], [], []>} : vector<1x32xf32>, vector<32x32xf32>, vector<1x32xf32> -> vector<1x32xf32>
    %c0_19 = arith.constant 0 : index
    %c0_20 = arith.constant 0 : index
    %25 = vector.load %arg8[%c0_19, %c0_20] : memref<1x32xf32, #tpu.memory_space<vmem>>, vector<1x32xf32>
    %26 = arith.addf %24, %25 : vector<1x32xf32>
    %cst_21 = arith.constant 0.000000e+00 : f32
    %27 = vector.broadcast %cst_21 : f32 to vector<1x32xf32>
    %28 = arith.cmpf ogt, %26, %27 : vector<1x32xf32>
    %29 = math.exp %26 : vector<1x32xf32>
    %cst_22 = arith.constant 1.000000e+00 : f32
    %30 = vector.broadcast %cst_22 : f32 to vector<1x32xf32>
    %31 = arith.subf %29, %30 : vector<1x32xf32>
    %32 = arith.select %28, %26, %31 : vector<1x32xi1>, vector<1x32xf32>
    %c0_23 = arith.constant 0 : index
    %c0_24 = arith.constant 0 : index
    %c0_25 = arith.constant 0 : index
    %33 = vector.load %arg3[%c0_23, %c0_24, %c0_25] : memref<1x1x16xf32, #tpu.memory_space<vmem>>, vector<1x1x16xf32>
    %34 = vector.shape_cast %33 : vector<1x1x16xf32> to vector<1x16xf32>
    %35 = vector.shape_cast %34 : vector<1x16xf32> to vector<1x16x1xf32>
    %36 = vector.shape_cast %34 : vector<1x16xf32> to vector<1x1x16xf32>
    %37 = vector.broadcast %35 : vector<1x16x1xf32> to vector<1x16x16xf32>
    %38 = vector.broadcast %36 : vector<1x1x16xf32> to vector<1x16x16xf32>
    %39 = arith.mulf %37, %38 : vector<1x16x16xf32>
    %cst_26 = arith.constant 5.000000e-01 : f32
    %40 = vector.broadcast %cst_26 : f32 to vector<1x16x16xf32>
    %41 = arith.cmpf ogt, %39, %40 : vector<1x16x16xf32>
    %cst_27 = arith.constant 0.000000e+00 : f32
    %cst_28 = arith.constant -1.000000e+30 : f32
    %42 = vector.broadcast %cst_27 : f32 to vector<1x16x16xf32>
    %43 = vector.broadcast %cst_28 : f32 to vector<1x16x16xf32>
    %44 = arith.select %41, %42, %43 : vector<1x16x16xi1>, vector<1x16x16xf32>
    %c0_29 = arith.constant 0 : index
    %c0_30 = arith.constant 0 : index
    %c0_31 = arith.constant 0 : index
    %45 = vector.load %arg17[%c0_29, %c0_30, %c0_31] : memref<9x32x32xf32, #tpu.memory_space<vmem>>, vector<1x32x32xf32>
    %46 = vector.shape_cast %45 : vector<1x32x32xf32> to vector<32x32xf32>
    %c1 = arith.constant 1 : index
    %c0_32 = arith.constant 0 : index
    %c0_33 = arith.constant 0 : index
    %47 = vector.load %arg17[%c1, %c0_32, %c0_33] : memref<9x32x32xf32, #tpu.memory_space<vmem>>, vector<1x32x32xf32>
    %48 = vector.shape_cast %47 : vector<1x32x32xf32> to vector<32x32xf32>
    %c2 = arith.constant 2 : index
    %c0_34 = arith.constant 0 : index
    %c0_35 = arith.constant 0 : index
    %49 = vector.load %arg17[%c2, %c0_34, %c0_35] : memref<9x32x32xf32, #tpu.memory_space<vmem>>, vector<1x32x32xf32>
    %50 = vector.shape_cast %49 : vector<1x32x32xf32> to vector<32x32xf32>
    %c3 = arith.constant 3 : index
    %c0_36 = arith.constant 0 : index
    %c0_37 = arith.constant 0 : index
    %51 = vector.load %arg17[%c3, %c0_36, %c0_37] : memref<9x32x32xf32, #tpu.memory_space<vmem>>, vector<1x32x32xf32>
    %52 = vector.shape_cast %51 : vector<1x32x32xf32> to vector<32x32xf32>
    %c4 = arith.constant 4 : index
    %c0_38 = arith.constant 0 : index
    %c0_39 = arith.constant 0 : index
    %53 = vector.load %arg17[%c4, %c0_38, %c0_39] : memref<9x32x32xf32, #tpu.memory_space<vmem>>, vector<1x32x32xf32>
    %54 = vector.shape_cast %53 : vector<1x32x32xf32> to vector<32x32xf32>
    %c5 = arith.constant 5 : index
    %c0_40 = arith.constant 0 : index
    %c0_41 = arith.constant 0 : index
    %55 = vector.load %arg17[%c5, %c0_40, %c0_41] : memref<9x32x32xf32, #tpu.memory_space<vmem>>, vector<1x32x32xf32>
    %56 = vector.shape_cast %55 : vector<1x32x32xf32> to vector<32x32xf32>
    %c6 = arith.constant 6 : index
    %c0_42 = arith.constant 0 : index
    %c0_43 = arith.constant 0 : index
    %57 = vector.load %arg17[%c6, %c0_42, %c0_43] : memref<9x32x32xf32, #tpu.memory_space<vmem>>, vector<1x32x32xf32>
    %58 = vector.shape_cast %57 : vector<1x32x32xf32> to vector<32x32xf32>
    %c7 = arith.constant 7 : index
    %c0_44 = arith.constant 0 : index
    %c0_45 = arith.constant 0 : index
    %59 = vector.load %arg17[%c7, %c0_44, %c0_45] : memref<9x32x32xf32, #tpu.memory_space<vmem>>, vector<1x32x32xf32>
    %60 = vector.shape_cast %59 : vector<1x32x32xf32> to vector<32x32xf32>
    %c8 = arith.constant 8 : index
    %c0_46 = arith.constant 0 : index
    %c0_47 = arith.constant 0 : index
    %61 = vector.load %arg17[%c8, %c0_46, %c0_47] : memref<9x32x32xf32, #tpu.memory_space<vmem>>, vector<1x32x32xf32>
    %62 = vector.shape_cast %61 : vector<1x32x32xf32> to vector<32x32xf32>
    %c0_48 = arith.constant 0 : index
    %c0_49 = arith.constant 0 : index
    %c0_50 = arith.constant 0 : index
    %63 = vector.load %arg18[%c0_48, %c0_49, %c0_50] : memref<3x1x32xf32, #tpu.memory_space<vmem>>, vector<1x1x32xf32>
    %64 = vector.shape_cast %63 : vector<1x1x32xf32> to vector<1x32xf32>
    %c1_51 = arith.constant 1 : index
    %c0_52 = arith.constant 0 : index
    %c0_53 = arith.constant 0 : index
    %65 = vector.load %arg18[%c1_51, %c0_52, %c0_53] : memref<3x1x32xf32, #tpu.memory_space<vmem>>, vector<1x1x32xf32>
    %66 = vector.shape_cast %65 : vector<1x1x32xf32> to vector<1x32xf32>
    %c2_54 = arith.constant 2 : index
    %c0_55 = arith.constant 0 : index
    %c0_56 = arith.constant 0 : index
    %67 = vector.load %arg18[%c2_54, %c0_55, %c0_56] : memref<3x1x32xf32, #tpu.memory_space<vmem>>, vector<1x1x32xf32>
    %68 = vector.shape_cast %67 : vector<1x1x32xf32> to vector<1x32xf32>
    %c0_57 = arith.constant 0 : index
    %c0_58 = arith.constant 0 : index
    %c0_59 = arith.constant 0 : index
    %69 = vector.load %arg11[%c0_57, %c0_58, %c0_59] : memref<2x32x32xf32, #tpu.memory_space<vmem>>, vector<1x32x32xf32>
    %70 = vector.shape_cast %69 : vector<1x32x32xf32> to vector<32x32xf32>
    %c1_60 = arith.constant 1 : index
    %c0_61 = arith.constant 0 : index
    %c0_62 = arith.constant 0 : index
    %71 = vector.load %arg11[%c1_60, %c0_61, %c0_62] : memref<2x32x32xf32, #tpu.memory_space<vmem>>, vector<1x32x32xf32>
    %72 = vector.shape_cast %71 : vector<1x32x32xf32> to vector<32x32xf32>
    %c0_63 = arith.constant 0 : index
    %c0_64 = arith.constant 0 : index
    %c0_65 = arith.constant 0 : index
    %73 = vector.load %arg12[%c0_63, %c0_64, %c0_65] : memref<2x1x32xf32, #tpu.memory_space<vmem>>, vector<1x1x32xf32>
    %74 = vector.shape_cast %73 : vector<1x1x32xf32> to vector<1x32xf32>
    %c1_66 = arith.constant 1 : index
    %c0_67 = arith.constant 0 : index
    %c0_68 = arith.constant 0 : index
    %75 = vector.load %arg12[%c1_66, %c0_67, %c0_68] : memref<2x1x32xf32, #tpu.memory_space<vmem>>, vector<1x1x32xf32>
    %76 = vector.shape_cast %75 : vector<1x1x32xf32> to vector<1x32xf32>
    %c0_69 = arith.constant 0 : index
    %c0_70 = arith.constant 0 : index
    %77 = vector.load %arg15[%c0_69, %c0_70] : memref<32x32xf32, #tpu.memory_space<vmem>>, vector<32x32xf32>
    %c0_71 = arith.constant 0 : index
    %c0_72 = arith.constant 0 : index
    %78 = vector.load %arg16[%c0_71, %c0_72] : memref<1x32xf32, #tpu.memory_space<vmem>>, vector<1x32xf32>
    %c0_73 = arith.constant 0 : index
    %c0_74 = arith.constant 0 : index
    %c0_75 = arith.constant 0 : index
    %79 = vector.load %arg19[%c0_73, %c0_74, %c0_75] : memref<2x32x32xf32, #tpu.memory_space<vmem>>, vector<1x32x32xf32>
    %80 = vector.shape_cast %79 : vector<1x32x32xf32> to vector<32x32xf32>
    %c1_76 = arith.constant 1 : index
    %c0_77 = arith.constant 0 : index
    %c0_78 = arith.constant 0 : index
    %81 = vector.load %arg19[%c1_76, %c0_77, %c0_78] : memref<2x32x32xf32, #tpu.memory_space<vmem>>, vector<1x32x32xf32>
    %82 = vector.shape_cast %81 : vector<1x32x32xf32> to vector<32x32xf32>
    %c0_79 = arith.constant 0 : index
    %c0_80 = arith.constant 0 : index
    %83 = vector.load %arg20[%c0_79, %c0_80] : memref<1x32xf32, #tpu.memory_space<vmem>>, vector<1x32xf32>
    %c0_81 = arith.constant 0 : index
    %c0_82 = arith.constant 0 : index
    %c0_83 = arith.constant 0 : index
    %84 = vector.load %arg9[%c0_81, %c0_82, %c0_83] : memref<2x32x32xf32, #tpu.memory_space<vmem>>, vector<1x32x32xf32>
    %85 = vector.shape_cast %84 : vector<1x32x32xf32> to vector<32x32xf32>
    %cst_84 = arith.constant dense<0.000000e+00> : vector<1x32xf32>
    %86 = tpu.matmul %32, %85, %cst_84 {dimension_numbers = #tpu.dot_dimension_numbers<[1], [0], [0], [1], [0, 0, 1, 1], [], []>} : vector<1x32xf32>, vector<32x32xf32>, vector<1x32xf32> -> vector<1x32xf32>
    %c0_85 = arith.constant 0 : index
    %c0_86 = arith.constant 0 : index
    %c0_87 = arith.constant 0 : index
    %87 = vector.load %arg10[%c0_85, %c0_86, %c0_87] : memref<2x1x32xf32, #tpu.memory_space<vmem>>, vector<1x1x32xf32>
    %88 = vector.shape_cast %87 : vector<1x1x32xf32> to vector<1x32xf32>
    %89 = arith.addf %86, %88 : vector<1x32xf32>
    %c0_88 = arith.constant 0 : index
    %c0_89 = arith.constant 0 : index
    %90 = vector.load %arg6[%c0_88, %c0_89] : memref<1x32xf32, #tpu.memory_space<vmem>>, vector<1x32xf32>
    %cst_90 = arith.constant dense<0.000000e+00> : vector<1x32xf32>
    %91 = tpu.matmul %90, %77, %cst_90 {dimension_numbers = #tpu.dot_dimension_numbers<[1], [0], [0], [1], [0, 0, 1, 1], [], []>} : vector<1x32xf32>, vector<32x32xf32>, vector<1x32xf32> -> vector<1x32xf32>
    %92 = arith.addf %91, %78 : vector<1x32xf32>
    %c0_91 = arith.constant 0 : index
    %c0_92 = arith.constant 0 : index
    %93 = vector.load %arg6[%c0_91, %c0_92] : memref<1x32xf32, #tpu.memory_space<vmem>>, vector<1x32xf32>
    %94 = vector.shape_cast %93 : vector<1x32xf32> to vector<1x32xf32>
    %95 = vector.broadcast %94 : vector<1x32xf32> to vector<16x32xf32>
    %96 = vector.shape_cast %92 : vector<1x32xf32> to vector<1x32xf32>
    %97 = vector.broadcast %96 : vector<1x32xf32> to vector<16x32xf32>
    %cst_93 = arith.constant dense<0.000000e+00> : vector<1x32xf32>
    %98 = tpu.matmul %89, %70, %cst_93 {dimension_numbers = #tpu.dot_dimension_numbers<[1], [0], [0], [1], [0, 0, 1, 1], [], []>} : vector<1x32xf32>, vector<32x32xf32>, vector<1x32xf32> -> vector<1x32xf32>
    %99 = arith.addf %98, %74 : vector<1x32xf32>
    %cst_94 = arith.constant dense<0.000000e+00> : vector<1x32xf32>
    %100 = tpu.matmul %89, %72, %cst_94 {dimension_numbers = #tpu.dot_dimension_numbers<[1], [0], [0], [1], [0, 0, 1, 1], [], []>} : vector<1x32xf32>, vector<32x32xf32>, vector<1x32xf32> -> vector<1x32xf32>
    %101 = arith.addf %100, %76 : vector<1x32xf32>
    %102 = arith.mulf %20, %97 : vector<16x32xf32>
    %cst_95 = arith.constant dense<0.000000e+00> : vector<16x32xf32>
    %103 = tpu.matmul %15, %46, %cst_95 {dimension_numbers = #tpu.dot_dimension_numbers<[1], [0], [0], [1], [0, 0, 1, 1], [], []>} : vector<16x32xf32>, vector<32x32xf32>, vector<16x32xf32> -> vector<16x32xf32>
    %cst_96 = arith.constant dense<0.000000e+00> : vector<16x32xf32>
    %104 = tpu.matmul %95, %48, %cst_96 {dimension_numbers = #tpu.dot_dimension_numbers<[1], [0], [0], [1], [0, 0, 1, 1], [], []>} : vector<16x32xf32>, vector<32x32xf32>, vector<16x32xf32> -> vector<16x32xf32>
    %105 = arith.addf %103, %104 : vector<16x32xf32>
    %cst_97 = arith.constant dense<0.000000e+00> : vector<16x32xf32>
    %106 = tpu.matmul %102, %50, %cst_97 {dimension_numbers = #tpu.dot_dimension_numbers<[1], [0], [0], [1], [0, 0, 1, 1], [], []>} : vector<16x32xf32>, vector<32x32xf32>, vector<16x32xf32> -> vector<16x32xf32>
    %107 = arith.addf %105, %106 : vector<16x32xf32>
    %108 = vector.broadcast %64 : vector<1x32xf32> to vector<16x32xf32>
    %109 = arith.addf %107, %108 : vector<16x32xf32>
    %cst_98 = arith.constant dense<0.000000e+00> : vector<16x32xf32>
    %110 = tpu.matmul %15, %52, %cst_98 {dimension_numbers = #tpu.dot_dimension_numbers<[1], [0], [0], [1], [0, 0, 1, 1], [], []>} : vector<16x32xf32>, vector<32x32xf32>, vector<16x32xf32> -> vector<16x32xf32>
    %cst_99 = arith.constant dense<0.000000e+00> : vector<16x32xf32>
    %111 = tpu.matmul %95, %54, %cst_99 {dimension_numbers = #tpu.dot_dimension_numbers<[1], [0], [0], [1], [0, 0, 1, 1], [], []>} : vector<16x32xf32>, vector<32x32xf32>, vector<16x32xf32> -> vector<16x32xf32>
    %112 = arith.addf %110, %111 : vector<16x32xf32>
    %cst_100 = arith.constant dense<0.000000e+00> : vector<16x32xf32>
    %113 = tpu.matmul %102, %56, %cst_100 {dimension_numbers = #tpu.dot_dimension_numbers<[1], [0], [0], [1], [0, 0, 1, 1], [], []>} : vector<16x32xf32>, vector<32x32xf32>, vector<16x32xf32> -> vector<16x32xf32>
    %114 = arith.addf %112, %113 : vector<16x32xf32>
    %115 = vector.broadcast %66 : vector<1x32xf32> to vector<16x32xf32>
    %116 = arith.addf %114, %115 : vector<16x32xf32>
    %cst_101 = arith.constant dense<0.000000e+00> : vector<16x32xf32>
    %117 = tpu.matmul %15, %58, %cst_101 {dimension_numbers = #tpu.dot_dimension_numbers<[1], [0], [0], [1], [0, 0, 1, 1], [], []>} : vector<16x32xf32>, vector<32x32xf32>, vector<16x32xf32> -> vector<16x32xf32>
    %cst_102 = arith.constant dense<0.000000e+00> : vector<16x32xf32>
    %118 = tpu.matmul %95, %60, %cst_102 {dimension_numbers = #tpu.dot_dimension_numbers<[1], [0], [0], [1], [0, 0, 1, 1], [], []>} : vector<16x32xf32>, vector<32x32xf32>, vector<16x32xf32> -> vector<16x32xf32>
    %119 = arith.addf %117, %118 : vector<16x32xf32>
    %cst_103 = arith.constant dense<0.000000e+00> : vector<16x32xf32>
    %120 = tpu.matmul %102, %62, %cst_103 {dimension_numbers = #tpu.dot_dimension_numbers<[1], [0], [0], [1], [0, 0, 1, 1], [], []>} : vector<16x32xf32>, vector<32x32xf32>, vector<16x32xf32> -> vector<16x32xf32>
    %121 = arith.addf %119, %120 : vector<16x32xf32>
    %122 = vector.broadcast %68 : vector<1x32xf32> to vector<16x32xf32>
    %123 = arith.addf %121, %122 : vector<16x32xf32>
    %124 = vector.shape_cast %109 : vector<16x32xf32> to vector<1x16x32xf32>
    %125 = vector.shape_cast %116 : vector<16x32xf32> to vector<1x16x32xf32>
    %126 = vector.shape_cast %99 : vector<1x32xf32> to vector<1x1x32xf32>
    %127 = vector.broadcast %126 : vector<1x1x32xf32> to vector<1x16x32xf32>
    %128 = arith.mulf %125, %127 : vector<1x16x32xf32>
    %129 = vector.shape_cast %123 : vector<16x32xf32> to vector<1x16x32xf32>
    %130 = vector.shape_cast %101 : vector<1x32xf32> to vector<1x1x32xf32>
    %131 = vector.broadcast %130 : vector<1x1x32xf32> to vector<1x16x32xf32>
    %132 = arith.mulf %129, %131 : vector<1x16x32xf32>
    "tpu.trace_start"() <{level = 10 : i32, message = "bnc,bmc->bnm"}> : () -> ()
    %cst_104 = arith.constant dense<0.000000e+00> : vector<1x16x16xf32>
    %133 = tpu.matmul %124, %128, %cst_104 {dimension_numbers = #tpu.dot_dimension_numbers<[2], [2], [1], [1], [0, 0, 0, 1, 1, 1], [0], [0]>} : vector<1x16x32xf32>, vector<1x16x32xf32>, vector<1x16x16xf32> -> vector<1x16x16xf32>
    "tpu.trace_stop"() : () -> ()
    %134 = arith.addf %133, %44 : vector<1x16x16xf32>
    %cst_105 = arith.constant dense<0xFF800000> : vector<1x16xf32>
    %135 = vector.multi_reduction <maximumf>, %134, %cst_105 [2] : vector<1x16x16xf32> to vector<1x16xf32>
    %136 = vector.shape_cast %135 : vector<1x16xf32> to vector<1x16x1xf32>
    %137 = vector.broadcast %136 : vector<1x16x1xf32> to vector<1x16x16xf32>
    %138 = arith.subf %134, %137 : vector<1x16x16xf32>
    %139 = math.exp %138 : vector<1x16x16xf32>
    %cst_106 = arith.constant dense<0.000000e+00> : vector<1x16xf32>
    %140 = vector.multi_reduction <add>, %139, %cst_106 [2] : vector<1x16x16xf32> to vector<1x16xf32>
    %141 = vector.shape_cast %140 : vector<1x16xf32> to vector<1x16x1xf32>
    %142 = tpu.reciprocal %141 : vector<1x16x1xf32> -> vector<1x16x1xf32>
    %143 = vector.broadcast %142 : vector<1x16x1xf32> to vector<1x16x16xf32>
    %144 = arith.mulf %139, %143 : vector<1x16x16xf32>
    "tpu.trace_start"() <{level = 10 : i32, message = "bnm,bmc->bnc"}> : () -> ()
    %cst_107 = arith.constant dense<0.000000e+00> : vector<1x16x32xf32>
    %145 = tpu.matmul %144, %132, %cst_107 {dimension_numbers = #tpu.dot_dimension_numbers<[2], [1], [1], [2], [0, 0, 0, 1, 1, 2], [0], [0]>} : vector<1x16x16xf32>, vector<1x16x32xf32>, vector<1x16x32xf32> -> vector<1x16x32xf32>
    "tpu.trace_stop"() : () -> ()
    %146 = vector.shape_cast %145 : vector<1x16x32xf32> to vector<16x32xf32>
    %cst_108 = arith.constant dense<0.000000e+00> : vector<16x32xf32>
    %147 = tpu.matmul %95, %80, %cst_108 {dimension_numbers = #tpu.dot_dimension_numbers<[1], [0], [0], [1], [0, 0, 1, 1], [], []>} : vector<16x32xf32>, vector<32x32xf32>, vector<16x32xf32> -> vector<16x32xf32>
    %cst_109 = arith.constant dense<0.000000e+00> : vector<16x32xf32>
    %148 = tpu.matmul %146, %82, %cst_109 {dimension_numbers = #tpu.dot_dimension_numbers<[1], [0], [0], [1], [0, 0, 1, 1], [], []>} : vector<16x32xf32>, vector<32x32xf32>, vector<16x32xf32> -> vector<16x32xf32>
    %149 = arith.addf %147, %148 : vector<16x32xf32>
    %150 = vector.broadcast %83 : vector<1x32xf32> to vector<16x32xf32>
    %151 = arith.addf %149, %150 : vector<16x32xf32>
    %c1_i32 = arith.constant 1 : i32
    %152 = arith.index_cast %c1_i32 : i32 to index
    %c0_110 = arith.constant 0 : index
    %c0_111 = arith.constant 0 : index
    %153 = vector.load %arg9[%152, %c0_110, %c0_111] : memref<2x32x32xf32, #tpu.memory_space<vmem>>, vector<1x32x32xf32>
    %154 = vector.shape_cast %153 : vector<1x32x32xf32> to vector<32x32xf32>
    %cst_112 = arith.constant dense<0.000000e+00> : vector<1x32xf32>
    %155 = tpu.matmul %32, %154, %cst_112 {dimension_numbers = #tpu.dot_dimension_numbers<[1], [0], [0], [1], [0, 0, 1, 1], [], []>} : vector<1x32xf32>, vector<32x32xf32>, vector<1x32xf32> -> vector<1x32xf32>
    %156 = arith.index_cast %c1_i32 : i32 to index
    %c0_113 = arith.constant 0 : index
    %c0_114 = arith.constant 0 : index
    %157 = vector.load %arg10[%156, %c0_113, %c0_114] : memref<2x1x32xf32, #tpu.memory_space<vmem>>, vector<1x1x32xf32>
    %158 = vector.shape_cast %157 : vector<1x1x32xf32> to vector<1x32xf32>
    %159 = arith.addf %155, %158 : vector<1x32xf32>
    %cst_115 = arith.constant dense<0.000000e+00> : vector<16x32xf32>
    %160 = tpu.matmul %151, %77, %cst_115 {dimension_numbers = #tpu.dot_dimension_numbers<[1], [0], [0], [1], [0, 0, 1, 1], [], []>} : vector<16x32xf32>, vector<32x32xf32>, vector<16x32xf32> -> vector<16x32xf32>
    %161 = vector.broadcast %78 : vector<1x32xf32> to vector<16x32xf32>
    %162 = arith.addf %160, %161 : vector<16x32xf32>
    %cst_116 = arith.constant dense<0.000000e+00> : vector<1x32xf32>
    %163 = tpu.matmul %159, %70, %cst_116 {dimension_numbers = #tpu.dot_dimension_numbers<[1], [0], [0], [1], [0, 0, 1, 1], [], []>} : vector<1x32xf32>, vector<32x32xf32>, vector<1x32xf32> -> vector<1x32xf32>
    %164 = arith.addf %163, %74 : vector<1x32xf32>
    %cst_117 = arith.constant dense<0.000000e+00> : vector<1x32xf32>
    %165 = tpu.matmul %159, %72, %cst_117 {dimension_numbers = #tpu.dot_dimension_numbers<[1], [0], [0], [1], [0, 0, 1, 1], [], []>} : vector<1x32xf32>, vector<32x32xf32>, vector<1x32xf32> -> vector<1x32xf32>
    %166 = arith.addf %165, %76 : vector<1x32xf32>
    %167 = arith.mulf %20, %162 : vector<16x32xf32>
    %cst_118 = arith.constant dense<0.000000e+00> : vector<16x32xf32>
    %168 = tpu.matmul %15, %46, %cst_118 {dimension_numbers = #tpu.dot_dimension_numbers<[1], [0], [0], [1], [0, 0, 1, 1], [], []>} : vector<16x32xf32>, vector<32x32xf32>, vector<16x32xf32> -> vector<16x32xf32>
    %cst_119 = arith.constant dense<0.000000e+00> : vector<16x32xf32>
    %169 = tpu.matmul %151, %48, %cst_119 {dimension_numbers = #tpu.dot_dimension_numbers<[1], [0], [0], [1], [0, 0, 1, 1], [], []>} : vector<16x32xf32>, vector<32x32xf32>, vector<16x32xf32> -> vector<16x32xf32>
    %170 = arith.addf %168, %169 : vector<16x32xf32>
    %cst_120 = arith.constant dense<0.000000e+00> : vector<16x32xf32>
    %171 = tpu.matmul %167, %50, %cst_120 {dimension_numbers = #tpu.dot_dimension_numbers<[1], [0], [0], [1], [0, 0, 1, 1], [], []>} : vector<16x32xf32>, vector<32x32xf32>, vector<16x32xf32> -> vector<16x32xf32>
    %172 = arith.addf %170, %171 : vector<16x32xf32>
    %173 = vector.broadcast %64 : vector<1x32xf32> to vector<16x32xf32>
    %174 = arith.addf %172, %173 : vector<16x32xf32>
    %cst_121 = arith.constant dense<0.000000e+00> : vector<16x32xf32>
    %175 = tpu.matmul %15, %52, %cst_121 {dimension_numbers = #tpu.dot_dimension_numbers<[1], [0], [0], [1], [0, 0, 1, 1], [], []>} : vector<16x32xf32>, vector<32x32xf32>, vector<16x32xf32> -> vector<16x32xf32>
    %cst_122 = arith.constant dense<0.000000e+00> : vector<16x32xf32>
    %176 = tpu.matmul %151, %54, %cst_122 {dimension_numbers = #tpu.dot_dimension_numbers<[1], [0], [0], [1], [0, 0, 1, 1], [], []>} : vector<16x32xf32>, vector<32x32xf32>, vector<16x32xf32> -> vector<16x32xf32>
    %177 = arith.addf %175, %176 : vector<16x32xf32>
    %cst_123 = arith.constant dense<0.000000e+00> : vector<16x32xf32>
    %178 = tpu.matmul %167, %56, %cst_123 {dimension_numbers = #tpu.dot_dimension_numbers<[1], [0], [0], [1], [0, 0, 1, 1], [], []>} : vector<16x32xf32>, vector<32x32xf32>, vector<16x32xf32> -> vector<16x32xf32>
    %179 = arith.addf %177, %178 : vector<16x32xf32>
    %180 = vector.broadcast %66 : vector<1x32xf32> to vector<16x32xf32>
    %181 = arith.addf %179, %180 : vector<16x32xf32>
    %cst_124 = arith.constant dense<0.000000e+00> : vector<16x32xf32>
    %182 = tpu.matmul %15, %58, %cst_124 {dimension_numbers = #tpu.dot_dimension_numbers<[1], [0], [0], [1], [0, 0, 1, 1], [], []>} : vector<16x32xf32>, vector<32x32xf32>, vector<16x32xf32> -> vector<16x32xf32>
    %cst_125 = arith.constant dense<0.000000e+00> : vector<16x32xf32>
    %183 = tpu.matmul %151, %60, %cst_125 {dimension_numbers = #tpu.dot_dimension_numbers<[1], [0], [0], [1], [0, 0, 1, 1], [], []>} : vector<16x32xf32>, vector<32x32xf32>, vector<16x32xf32> -> vector<16x32xf32>
    %184 = arith.addf %182, %183 : vector<16x32xf32>
    %cst_126 = arith.constant dense<0.000000e+00> : vector<16x32xf32>
    %185 = tpu.matmul %167, %62, %cst_126 {dimension_numbers = #tpu.dot_dimension_numbers<[1], [0], [0], [1], [0, 0, 1, 1], [], []>} : vector<16x32xf32>, vector<32x32xf32>, vector<16x32xf32> -> vector<16x32xf32>
    %186 = arith.addf %184, %185 : vector<16x32xf32>
    %187 = vector.broadcast %68 : vector<1x32xf32> to vector<16x32xf32>
    %188 = arith.addf %186, %187 : vector<16x32xf32>
    %189 = vector.shape_cast %174 : vector<16x32xf32> to vector<1x16x32xf32>
    %190 = vector.shape_cast %181 : vector<16x32xf32> to vector<1x16x32xf32>
    %191 = vector.shape_cast %164 : vector<1x32xf32> to vector<1x1x32xf32>
    %192 = vector.broadcast %191 : vector<1x1x32xf32> to vector<1x16x32xf32>
    %193 = arith.mulf %190, %192 : vector<1x16x32xf32>
    %194 = vector.shape_cast %188 : vector<16x32xf32> to vector<1x16x32xf32>
    %195 = vector.shape_cast %166 : vector<1x32xf32> to vector<1x1x32xf32>
    %196 = vector.broadcast %195 : vector<1x1x32xf32> to vector<1x16x32xf32>
    %197 = arith.mulf %194, %196 : vector<1x16x32xf32>
    "tpu.trace_start"() <{level = 10 : i32, message = "bnc,bmc->bnm"}> : () -> ()
    %cst_127 = arith.constant dense<0.000000e+00> : vector<1x16x16xf32>
    %198 = tpu.matmul %189, %193, %cst_127 {dimension_numbers = #tpu.dot_dimension_numbers<[2], [2], [1], [1], [0, 0, 0, 1, 1, 1], [0], [0]>} : vector<1x16x32xf32>, vector<1x16x32xf32>, vector<1x16x16xf32> -> vector<1x16x16xf32>
    "tpu.trace_stop"() : () -> ()
    %199 = arith.addf %198, %44 : vector<1x16x16xf32>
    %cst_128 = arith.constant dense<0xFF800000> : vector<1x16xf32>
    %200 = vector.multi_reduction <maximumf>, %199, %cst_128 [2] : vector<1x16x16xf32> to vector<1x16xf32>
    %201 = vector.shape_cast %200 : vector<1x16xf32> to vector<1x16x1xf32>
    %202 = vector.broadcast %201 : vector<1x16x1xf32> to vector<1x16x16xf32>
    %203 = arith.subf %199, %202 : vector<1x16x16xf32>
    %204 = math.exp %203 : vector<1x16x16xf32>
    %cst_129 = arith.constant dense<0.000000e+00> : vector<1x16xf32>
    %205 = vector.multi_reduction <add>, %204, %cst_129 [2] : vector<1x16x16xf32> to vector<1x16xf32>
    %206 = vector.shape_cast %205 : vector<1x16xf32> to vector<1x16x1xf32>
    %207 = tpu.reciprocal %206 : vector<1x16x1xf32> -> vector<1x16x1xf32>
    %208 = vector.broadcast %207 : vector<1x16x1xf32> to vector<1x16x16xf32>
    %209 = arith.mulf %204, %208 : vector<1x16x16xf32>
    "tpu.trace_start"() <{level = 10 : i32, message = "bnm,bmc->bnc"}> : () -> ()
    %cst_130 = arith.constant dense<0.000000e+00> : vector<1x16x32xf32>
    %210 = tpu.matmul %209, %197, %cst_130 {dimension_numbers = #tpu.dot_dimension_numbers<[2], [1], [1], [2], [0, 0, 0, 1, 1, 2], [0], [0]>} : vector<1x16x16xf32>, vector<1x16x32xf32>, vector<1x16x32xf32> -> vector<1x16x32xf32>
    "tpu.trace_stop"() : () -> ()
    %211 = vector.shape_cast %210 : vector<1x16x32xf32> to vector<16x32xf32>
    %cst_131 = arith.constant dense<0.000000e+00> : vector<16x32xf32>
    %212 = tpu.matmul %151, %80, %cst_131 {dimension_numbers = #tpu.dot_dimension_numbers<[1], [0], [0], [1], [0, 0, 1, 1], [], []>} : vector<16x32xf32>, vector<32x32xf32>, vector<16x32xf32> -> vector<16x32xf32>
    %cst_132 = arith.constant dense<0.000000e+00> : vector<16x32xf32>
    %213 = tpu.matmul %211, %82, %cst_132 {dimension_numbers = #tpu.dot_dimension_numbers<[1], [0], [0], [1], [0, 0, 1, 1], [], []>} : vector<16x32xf32>, vector<32x32xf32>, vector<16x32xf32> -> vector<16x32xf32>
    %214 = arith.addf %212, %213 : vector<16x32xf32>
    %215 = vector.broadcast %83 : vector<1x32xf32> to vector<16x32xf32>
    %216 = arith.addf %214, %215 : vector<16x32xf32>
    %c1_i32_133 = arith.constant 1 : i32
    %c0_134 = arith.constant 0 : index
    %c0_135 = arith.constant 0 : index
    %c0_136 = arith.constant 0 : index
    %217 = vector.load %arg21[%c0_134, %c0_135, %c0_136] : memref<2x32x32xf32, #tpu.memory_space<vmem>>, vector<1x32x32xf32>
    %218 = vector.shape_cast %217 : vector<1x32x32xf32> to vector<32x32xf32>
    %cst_137 = arith.constant dense<0.000000e+00> : vector<16x32xf32>
    %219 = tpu.matmul %15, %218, %cst_137 {dimension_numbers = #tpu.dot_dimension_numbers<[1], [0], [0], [1], [0, 0, 1, 1], [], []>} : vector<16x32xf32>, vector<32x32xf32>, vector<16x32xf32> -> vector<16x32xf32>
    %c1_138 = arith.constant 1 : index
    %c0_139 = arith.constant 0 : index
    %c0_140 = arith.constant 0 : index
    %220 = vector.load %arg21[%c1_138, %c0_139, %c0_140] : memref<2x32x32xf32, #tpu.memory_space<vmem>>, vector<1x32x32xf32>
    %221 = vector.shape_cast %220 : vector<1x32x32xf32> to vector<32x32xf32>
    %cst_141 = arith.constant dense<0.000000e+00> : vector<16x32xf32>
    %222 = tpu.matmul %216, %221, %cst_141 {dimension_numbers = #tpu.dot_dimension_numbers<[1], [0], [0], [1], [0, 0, 1, 1], [], []>} : vector<16x32xf32>, vector<32x32xf32>, vector<16x32xf32> -> vector<16x32xf32>
    %223 = arith.addf %219, %222 : vector<16x32xf32>
    %c0_142 = arith.constant 0 : index
    %c0_143 = arith.constant 0 : index
    %224 = vector.load %arg22[%c0_142, %c0_143] : memref<1x32xf32, #tpu.memory_space<vmem>>, vector<1x32xf32>
    %225 = vector.broadcast %224 : vector<1x32xf32> to vector<16x32xf32>
    %226 = arith.addf %223, %225 : vector<16x32xf32>
    %227 = vector.shape_cast %226 : vector<16x32xf32> to vector<1x16x32xf32>
    %c0_144 = arith.constant 0 : index
    %c0_145 = arith.constant 0 : index
    %c0_146 = arith.constant 0 : index
    %228 = vector.load %arg23[%c0_144, %c0_145, %c0_146] : memref<1x16x32xf32, #tpu.memory_space<vmem>>, vector<1x16x32xf32>
    tpu.vector_store %arg23[%c0_144, %c0_145, %c0_146], %227 {strides = array<i32>} : memref<1x16x32xf32, #tpu.memory_space<vmem>>, vector<1x16x32xf32>,
    return
  }
  func.func @transform_0(%arg0: i32) -> (i32, i32, i32) {
    %c0_i32 = arith.constant 0 : i32
    %c0_i32_0 = arith.constant 0 : i32
    %c0_i32_1 = arith.constant 0 : i32
    return %arg0, %c0_i32, %c0_i32_0 : i32, i32, i32
  }
  func.func @transform_1(%arg0: i32) -> (i32, i32, i32) {
    %c0_i32 = arith.constant 0 : i32
    %c0_i32_0 = arith.constant 0 : i32
    %c0_i32_1 = arith.constant 0 : i32
    return %arg0, %c0_i32, %c0_i32_0 : i32, i32, i32
  }
  func.func @transform_2(%arg0: i32) -> (i32, i32, i32) {
    %c0_i32 = arith.constant 0 : i32
    %c0_i32_0 = arith.constant 0 : i32
    %c0_i32_1 = arith.constant 0 : i32
    return %arg0, %c0_i32, %c0_i32_0 : i32, i32, i32
  }
  func.func @transform_3(%arg0: i32) -> (i32, i32) {
    %c0_i32 = arith.constant 0 : i32
    %c0_i32_0 = arith.constant 0 : i32
    %c0_i32_1 = arith.constant 0 : i32
    return %c0_i32, %c0_i32_0 : i32, i32
  }
  func.func @transform_4(%arg0: i32) -> (i32, i32) {
    %c0_i32 = arith.constant 0 : i32
    %c0_i32_0 = arith.constant 0 : i32
    %c0_i32_1 = arith.constant 0 : i32
    return %c0_i32, %c0_i32_0 : i32, i32
  }
  func.func @transform_5(%arg0: i32) -> (i32, i32) {
    %c0_i32 = arith.constant 0 : i32
    %c0_i32_0 = arith.constant 0 : i32
    %c0_i32_1 = arith.constant 0 : i32
    return %c0_i32, %c0_i32_0 : i32, i32
  }
  func.func @transform_6(%arg0: i32) -> (i32, i32) {
    %c0_i32 = arith.constant 0 : i32
    %c0_i32_0 = arith.constant 0 : i32
    %c0_i32_1 = arith.constant 0 : i32
    return %c0_i32, %c0_i32_0 : i32, i32
  }
  func.func @transform_7(%arg0: i32) -> (i32, i32) {
    %c0_i32 = arith.constant 0 : i32
    %c0_i32_0 = arith.constant 0 : i32
    %c0_i32_1 = arith.constant 0 : i32
    return %c0_i32, %c0_i32_0 : i32, i32
  }
  func.func @transform_8(%arg0: i32) -> (i32, i32, i32) {
    %c0_i32 = arith.constant 0 : i32
    %c0_i32_0 = arith.constant 0 : i32
    %c0_i32_1 = arith.constant 0 : i32
    %c0_i32_2 = arith.constant 0 : i32
    return %c0_i32, %c0_i32_0, %c0_i32_1 : i32, i32, i32
  }
  func.func @transform_9(%arg0: i32) -> (i32, i32, i32) {
    %c0_i32 = arith.constant 0 : i32
    %c0_i32_0 = arith.constant 0 : i32
    %c0_i32_1 = arith.constant 0 : i32
    %c0_i32_2 = arith.constant 0 : i32
    return %c0_i32, %c0_i32_0, %c0_i32_1 : i32, i32, i32
  }
  func.func @transform_10(%arg0: i32) -> (i32, i32, i32) {
    %c0_i32 = arith.constant 0 : i32
    %c0_i32_0 = arith.constant 0 : i32
    %c0_i32_1 = arith.constant 0 : i32
    %c0_i32_2 = arith.constant 0 : i32
    return %c0_i32, %c0_i32_0, %c0_i32_1 : i32, i32, i32
  }
  func.func @transform_11(%arg0: i32) -> (i32, i32, i32) {
    %c0_i32 = arith.constant 0 : i32
    %c0_i32_0 = arith.constant 0 : i32
    %c0_i32_1 = arith.constant 0 : i32
    %c0_i32_2 = arith.constant 0 : i32
    return %c0_i32, %c0_i32_0, %c0_i32_1 : i32, i32, i32
  }
  func.func @transform_12(%arg0: i32) -> (i32, i32) {
    %c0_i32 = arith.constant 0 : i32
    %c0_i32_0 = arith.constant 0 : i32
    %c0_i32_1 = arith.constant 0 : i32
    return %c0_i32, %c0_i32_0 : i32, i32
  }
  func.func @transform_13(%arg0: i32) -> (i32, i32) {
    %c0_i32 = arith.constant 0 : i32
    %c0_i32_0 = arith.constant 0 : i32
    %c0_i32_1 = arith.constant 0 : i32
    return %c0_i32, %c0_i32_0 : i32, i32
  }
  func.func @transform_14(%arg0: i32) -> (i32, i32) {
    %c0_i32 = arith.constant 0 : i32
    %c0_i32_0 = arith.constant 0 : i32
    %c0_i32_1 = arith.constant 0 : i32
    return %c0_i32, %c0_i32_0 : i32, i32
  }
  func.func @transform_15(%arg0: i32) -> (i32, i32) {
    %c0_i32 = arith.constant 0 : i32
    %c0_i32_0 = arith.constant 0 : i32
    %c0_i32_1 = arith.constant 0 : i32
    return %c0_i32, %c0_i32_0 : i32, i32
  }
  func.func @transform_16(%arg0: i32) -> (i32, i32, i32) {
    %c0_i32 = arith.constant 0 : i32
    %c0_i32_0 = arith.constant 0 : i32
    %c0_i32_1 = arith.constant 0 : i32
    %c0_i32_2 = arith.constant 0 : i32
    return %c0_i32, %c0_i32_0, %c0_i32_1 : i32, i32, i32
  }
  func.func @transform_17(%arg0: i32) -> (i32, i32, i32) {
    %c0_i32 = arith.constant 0 : i32
    %c0_i32_0 = arith.constant 0 : i32
    %c0_i32_1 = arith.constant 0 : i32
    %c0_i32_2 = arith.constant 0 : i32
    return %c0_i32, %c0_i32_0, %c0_i32_1 : i32, i32, i32
  }
  func.func @transform_18(%arg0: i32) -> (i32, i32, i32) {
    %c0_i32 = arith.constant 0 : i32
    %c0_i32_0 = arith.constant 0 : i32
    %c0_i32_1 = arith.constant 0 : i32
    %c0_i32_2 = arith.constant 0 : i32
    return %c0_i32, %c0_i32_0, %c0_i32_1 : i32, i32, i32
  }
  func.func @transform_19(%arg0: i32) -> (i32, i32) {
    %c0_i32 = arith.constant 0 : i32
    %c0_i32_0 = arith.constant 0 : i32
    %c0_i32_1 = arith.constant 0 : i32
    return %c0_i32, %c0_i32_0 : i32, i32
  }
  func.func @transform_20(%arg0: i32) -> (i32, i32, i32) {
    %c0_i32 = arith.constant 0 : i32
    %c0_i32_0 = arith.constant 0 : i32
    %c0_i32_1 = arith.constant 0 : i32
    %c0_i32_2 = arith.constant 0 : i32
    return %c0_i32, %c0_i32_0, %c0_i32_1 : i32, i32, i32
  }
  func.func @transform_21(%arg0: i32) -> (i32, i32) {
    %c0_i32 = arith.constant 0 : i32
    %c0_i32_0 = arith.constant 0 : i32
    %c0_i32_1 = arith.constant 0 : i32
    return %c0_i32, %c0_i32_0 : i32, i32
  }
  func.func @transform_22(%arg0: i32) -> (i32, i32, i32) {
    %c0_i32 = arith.constant 0 : i32
    %c0_i32_0 = arith.constant 0 : i32
    %c0_i32_1 = arith.constant 0 : i32
    return %arg0, %c0_i32, %c0_i32_0 : i32, i32, i32
  }
}

</mosaic_0001>

<bundles_post_ra>
// kernel: tpu_custom_call.1
= control target key start
LH: loop header
LB: loop body
LE: loop exit
PB: predicated region body
PF: predicated region fallthrough
CT: control target
= control target key end

     0   :  { %s7281_s0 = inlined_call_operand.hbm [shape: f32[2,16,64], index: 0, kind: input, shape index: {}]   ;;  %s7282_s1 = inlined_call_operand.vmem [shape: f32[2,1,32], index: 1, kind: input, shape index: {}]   ;;  %s7283_s2 = inlined_call_operand.hbm [shape: f32[2,1,16], index: 2, kind: input, shape index: {}]   ;;  %s7284_s3 = inlined_call_operand.vmem [shape: f32[64,32], index: 3, kind: input, shape index: {}]   ;;  %s7285_s4 = inlined_call_operand.hbm [shape: f32[1,32], index: 4, kind: input, shape index: {}]   ;;  %s7286_s5 = inlined_call_operand.hbm [shape: f32[1,32], index: 5, kind: input, shape index: {}]   ;;  %s7287_s6 = inlined_call_operand.hbm [shape: f32[32,32], index: 6, kind: input, shape index: {}]   ;;  %s7288_s7 = inlined_call_operand.hbm [shape: f32[1,32], index: 7, kind: input, shape index: {}]   ;;  %s7289_s8 = inlined_call_operand.vmem [shape: f32[2,32,32], index: 8, kind: input, shape index: {}]   ;;  %s7290_s9 = inlined_call_operand.hbm [shape: f32[2,1,32], index: 9, kind: input, shape index: {}]   ;;  %s7291_s10 = inlined_call_operand.vmem [shape: f32[2,32,32], index: 10, kind: input, shape index: {}]   ;;  %s7292_s11 = inlined_call_operand.vmem [shape: f32[2,1,32], index: 11, kind: input, shape index: {}]   ;;  %s7293_s12 = inlined_call_operand.hbm [shape: f32[32,32], index: 12, kind: input, shape index: {}]   ;;  %s7294_s13 = inlined_call_operand.vmem [shape: f32[1,32], index: 13, kind: input, shape index: {}]   ;;  %s7295_s14 = inlined_call_operand.hbm [shape: f32[32,32], index: 14, kind: input, shape index: {}]   ;;  %s7296_s15 = inlined_call_operand.vmem [shape: f32[1,32], index: 15, kind: input, shape index: {}]   ;;  %s7297_s16 = inlined_call_operand.hbm [shape: f32[9,32,32], index: 16, kind: input, shape index: {}]   ;;  %s7298_s17 = inlined_call_operand.vmem [shape: f32[3,1,32], index: 17, kind: input, shape index: {}]   ;;  %s7299_s18 = inlined_call_operand.hbm [shape: f32[2,32,32], index: 18, kind: input, shape index: {}]   ;;  %s7300_s19 = inlined_call_operand.vmem [shape: f32[1,32], index: 19, kind: input, shape index: {}]   ;;  %s7301_s20 = inlined_call_operand.hbm [shape: f32[2,32,32], index: 20, kind: input, shape index: {}]   ;;  %s7302_s21 = inlined_call_operand.vmem [shape: f32[1,32], index: 21, kind: input, shape index: {}]   ;;  %s7303_s22 = inlined_call_operand.hbm [shape: f32[2,16,32], index: 22, kind: output, shape index: {}]  }
   0x1   :  { %7324 = sst [smem:[#allocation32_spill]] %s7281_s0 }
   0x2   :  { %7325 = sst [smem:[#allocation33_spill]] %s7282_s1 }
   0x3   :  { %7326 = sst [smem:[#allocation34_spill]] %s7283_s2 }
   0x4   :  { %7327 = sst [smem:[#allocation35_spill]] %s7284_s3 }
   0x5   :  { %7328 = sst [smem:[#allocation36_spill]] %s7285_s4 }
   0x6   :  { %7329 = sst [smem:[#allocation37_spill]] %s7286_s5 }
   0x7   :  { %7330 = sst [smem:[#allocation38_spill]] %s7287_s6 }
   0x8   :  { %7331 = sst [smem:[#allocation39_spill]] %s7288_s7 }
   0x9   :  { %7332 = sst [smem:[#allocation40_spill]] %s7290_s9 }
   0xa   :  { %7333 = sst [smem:[#allocation41_spill]] %s7292_s11 }
   0xb   :  { %7334 = sst [smem:[#allocation42_spill]] %s7293_s12 }
   0xc   :  { %7335 = sst [smem:[#allocation43_spill]] %s7294_s13 }
   0xd   :  { %7336 = sst [smem:[#allocation44_spill]] %s7295_s14 }
   0xe   :  { %7337 = sst [smem:[#allocation45_spill]] %s7296_s15 }
   0xf   :  { %7338 = sst [smem:[#allocation46_spill]] %s7297_s16 }
  0x10   :  { %7339 = sst [smem:[#allocation47_spill]] %s7298_s17 }
  0x11   :  { %7340 = sst [smem:[#allocation48_spill]] %s7299_s18 }
  0x12   :  { %7341 = sst [smem:[#allocation49_spill]] %s7300_s19 }
  0x13   :  { %7342 = sst [smem:[#allocation50_spill]] %s7301_s20 }
  0x14   :  { %7343 = sst [smem:[#allocation51_spill]] %s7302_s21 }
  0x15   :  { %7344 = sst [smem:[#allocation52_spill]] %s7303_s22 }
  0x16   :  { %27 = vsyncpa [#allocation3], 0 }
  0x17   :  { %29 = vsyncpa [#allocation3 + $0x1], 0 }
  0x18   :  { %30 = vsyncpa [#allocation6], 0 }
  0x19   :  { %32 = vsyncpa [#allocation6 + $0x1], 0 }
  0x1a   :  { %33 = vsyncpa [#allocation9], 0 }
  0x1b   :  { %34 = vsyncpa [#allocation12], 0 }
  0x1c   :  { %35 = vsyncpa [#allocation15], 0 }
  0x1d   :  { %36 = vsyncpa [#allocation18], 0 }
  0x1e   :  { %37 = vsyncpa [#allocation21], 0 }
  0x1f   :  { %38 = vsyncpa [#allocation4], 0 }
  0x20   :  { %40 = vsyncpa [#allocation4 + $0x1], 0  ;;  %s6285_s3 = smov 0   ;;  %s6287_s28 = smov 0  }
  0x21   :  { %s6289_s29 = smov 0   ;;  %s6291_s30 = smov 0  }
  0x22 LB: > { %s6147_s4 = smov [#allocation7]   ;;  %s6306_s23 = sadd.s32 4294967295, %s6145_s30   ;;  %s6145_s30 = sphi %s6291_s30, %s7400_s30   ;;  %s6141_s29 = sphi %s6289_s29, %s7399_s29   ;;  %s6137_s28 = sphi %s6287_s28, %s7398_s28   ;;  %s6133_s3 = sphi %s6285_s3, %s7397_s3  }
  0x23   : > { %s570_s0 = sshll.u32 %s6147_s4, 4  ;;  %p4428_p0 = scmp.ge.s32.totalorder %s6145_s30, 1  ;;  %s6311_s0 = int_to_ptr.vmem [resolvable:$true] %s570_s0 }
  0x24   : > { %p7314_p1 = scmp.eq.s32.totalorder %s6306_s23, 0  ;;  %p554_p2 = scmp.lt.s32.totalorder %s6145_s30, 3 }
  0x25   : > { %s6148_s5 = smov [#allocation8]   ;;  %s6149_s6 = smov [#allocation11]  }
  0x26   : > { %p6313_p3 = pnand %p4428_p0, %p554_p2  ;;  %s581_s24 = sshll.u32 %s6148_s5, 4  ;;  %s6320_s24 = int_to_ptr.vmem [resolvable:$true] %s581_s24 }
  0x27   : > { %s605_s25 = sshll.u32 %s6149_s6, 4  ;;  %s7347_s4 = sld [smem:[#allocation36_spill]]  ;;  %s6328_s25 = int_to_ptr.vmem [resolvable:$true] %s605_s25 }
  0x28   : > { %s7345_s1 = scalar_select %p6313_p3, 1, 0 }
  0x29   : > { %p5569_p5 = pneg %p6313_p3 }
  0x2b   : > { %p6324_p6 = pnand %p5569_p5, %p7314_p1 }
  0x2d   : > { %s5711_s22 = scalar_lea.hbm %s7347_s4, 16  ;;  %p6338_p8 = pneg %p6324_p6 }
  0x2e   : > { %p5712_p7 = scmp.ne.s32.totalorder %s7347_s4, %s5711_s22  ;;  %p5718_p11 = scmp.lt.u32.totalorder %s5711_s22, %s7347_s4 }
  0x30   : > { %p5714_p9 = pnand %p6338_p8, %p5712_p7 }
  0x32   : > { %p5715_p10 = pneg %p5714_p9 }
  0x34   : > { %p5720_p12 = pnand %p5718_p11, %p5715_p10 }
  0x36   : > { %5723 = shalt.err (!%p5720_p12)
}
  0x37   : > { %s5724_s19 = scalar_lea.vmem %s6311_s0, 16  ;;  %s5731_s21 = scalar_lea.vmem %s6311_s0, 32 }
  0x38   : > { %p5725_p13 = scmp.ne.s32.totalorder %s6311_s0, %s5724_s19  ;;  %p5732_p5 = scmp.lt.s32.totalorder %s6311_s0, %s6311_s0 }
  0x39   : > { %p5733_p7 = scmp.lt.s32.totalorder %s5731_s21, %s5724_s19 }
  0x3a   : > { %p5727_p0 = pnand %p5725_p13, %p6338_p8 }
  0x3b   : > { %p5734_p9 = por %p5733_p7, %p5732_p5 }
  0x3c   : > { %p5728_p2 = pneg %p5727_p0 }
  0x3e   : > { %p5735_p4 = pnand %p5734_p9, %p5728_p2 }
  0x40   : > { %5738 = shalt.err (!%p5735_p4)
}
  0x41   : > { %5572 = dma.hbm_to_vmem [thread:$0]  (!%p6324_p6), %s7347_s4, 16, %s6311_s0, [#allocation6]  }
  0x42   : > { %s7349_s6 = sld [smem:[#allocation37_spill]] }
  0x48   : > { %s5739_s11 = scalar_lea.hbm %s7349_s6, 16 }
  0x49   : > { %p5740_p10 = scmp.ne.s32.totalorder %s7349_s6, %s5739_s11  ;;  %p5746_p4 = scmp.lt.u32.totalorder %s5739_s11, %s7349_s6 }
  0x4b   : > { %p5742_p11 = pnand %p5740_p10, %p6338_p8 }
  0x4d   : > { %p5743_p12 = pneg %p5742_p11 }
  0x4f   : > { %p5748_p13 = pnand %p5746_p4, %p5743_p12 }
  0x51   : > { %5751 = shalt.err (!%p5748_p13)
}
  0x52   : > { %s5752_s0 = scalar_lea.vmem %s6320_s24, 16  ;;  %s5759_s13 = scalar_lea.vmem %s6320_s24, 32 }
  0x53   : > { %p5753_p0 = scmp.ne.s32.totalorder %s6320_s24, %s5752_s0  ;;  %p5760_p7 = scmp.lt.s32.totalorder %s6320_s24, %s6320_s24 }
  0x54   : > { %p5761_p9 = scmp.lt.s32.totalorder %s5759_s13, %s5752_s0 }
  0x55   : > { %p5755_p2 = pnand %p5753_p0, %p6338_p8 }
  0x56   : > { %p5762_p10 = por %p5761_p9, %p5760_p7 }
  0x57   : > { %p5756_p5 = pneg %p5755_p2 }
  0x59   : > { %p5763_p11 = pnand %p5762_p10, %p5756_p5 }
  0x5b   : > { %5766 = shalt.err (!%p5763_p11)
}
  0x5c   : > { %5575 = dma.hbm_to_vmem [thread:$0]  (!%p6324_p6), %s7349_s6, 16, %s6320_s24, [#allocation9]  }
  0x5d   : > { %s7350_s7 = sld [smem:[#allocation39_spill]] }
  0x63   : > { %s5767_s2 = scalar_lea.hbm %s7350_s7, 16 }
  0x64   : > { %p5768_p12 = scmp.ne.s32.totalorder %s7350_s7, %s5767_s2  ;;  %p5774_p0 = scmp.lt.u32.totalorder %s5767_s2, %s7350_s7 }
  0x66   : > { %p5770_p4 = pnand %p5768_p12, %p6338_p8 }
  0x68   : > { %p5771_p13 = pneg %p5770_p4 }
  0x6a   : > { %p5776_p2 = pnand %p5774_p0, %p5771_p13 }
  0x6c   : > { %5779 = shalt.err (!%p5776_p2)
}
  0x6d   : > { %s5780_s24 = scalar_lea.vmem %s6328_s25, 16  ;;  %s5787_s13 = scalar_lea.vmem %s6328_s25, 32 }
  0x6e   : > { %p5781_p5 = scmp.ne.s32.totalorder %s6328_s25, %s5780_s24  ;;  %p5788_p10 = scmp.lt.s32.totalorder %s6328_s25, %s6328_s25 }
  0x6f   : > { %p5789_p11 = scmp.lt.s32.totalorder %s5787_s13, %s5780_s24 }
  0x70   : > { %p5783_p7 = pnand %p5781_p5, %p6338_p8 }
  0x71   : > { %p5790_p12 = por %p5789_p11, %p5788_p10 }
  0x72   : > { %p5784_p9 = pneg %p5783_p7 }
  0x74   : > { %p5791_p4 = pnand %p5790_p12, %p5784_p9 }
  0x76   : > { %5794 = shalt.err (!%p5791_p4)
}
  0x77   : > { %5581 = dma.hbm_to_vmem [thread:$0]  (!%p6324_p6), %s7350_s7, 16, %s6328_s25, [#allocation12]  }
  0x78   : > { %s6150_s17 = smov [#allocation14]   ;;  %s6151_s2 = smov [#allocation17]  }
  0x79   : > { %s637_s22 = sshll.u32 %s6150_s17, 4  ;;  %s669_s27 = sshll.u32 %s6151_s2, 4  ;;  %s638_s22 = int_to_ptr.vmem [resolvable:$true] %s637_s22  ;;  %s670_s27 = int_to_ptr.vmem [resolvable:$true] %s669_s27 }
  0x7a   : > { %s7351_s12 = sld [smem:[#allocation42_spill]] }
  0x80   : > { %s5795_s0 = scalar_lea.hbm %s7351_s12, 512 }
  0x81   : > { %p5796_p13 = scmp.ne.s32.totalorder %s7351_s12, %s5795_s0  ;;  %p5802_p5 = scmp.lt.u32.totalorder %s5795_s0, %s7351_s12 }
  0x83   : > { %p5798_p0 = pnand %p5796_p13, %p6338_p8 }
  0x85   : > { %p5799_p2 = pneg %p5798_p0 }
  0x87   : > { %p5804_p7 = pnand %p5802_p5, %p5799_p2 }
  0x89   : > { %5807 = shalt.err (!%p5804_p7)
}
  0x8a   : > { %s5808_s25 = scalar_lea.vmem %s638_s22, 512  ;;  %p5816_p12 = scmp.lt.s32.totalorder %s638_s22, %s638_s22 }
  0x8b   : > { %p5809_p9 = scmp.ne.s32.totalorder %s638_s22, %s5808_s25  ;;  %p5817_p4 = scmp.lt.s32.totalorder %s5808_s25, %s5808_s25 }
  0x8d   : > { %p5811_p10 = pnand %p5809_p9, %p6338_p8  ;;  %p5818_p1 = por %p5817_p4, %p5816_p12 }
  0x8f   : > { %p5812_p11 = pneg %p5811_p10 }
  0x91   : > { %p5819_p3 = pnand %p5818_p1, %p5812_p11 }
  0x93   : > { %5822 = shalt.err (!%p5819_p3)
}
  0x94   : > { %s7317_s15 = smov 128   ;;  %s7319_s17 = smov 8  }
  0x95   : > { %5587 = dma.hbm_to_vmem [thread:$0]  (!%p6324_p6), %s7351_s12, 512, %s638_s22, [#allocation15], %s7317_s15, %s7317_s15, %s7319_s17  }
  0x96   : > { %s7352_s16 = sld [smem:[#allocation46_spill]] }
  0x9c   : > { %s5823_s0 = scalar_lea.hbm %s7352_s16, 4608 }
  0x9d   : > { %p5824_p1 = scmp.ne.s32.totalorder %s7352_s16, %s5823_s0  ;;  %p5830_p0 = scmp.lt.u32.totalorder %s5823_s0, %s7352_s16 }
  0x9f   : > { %p5826_p3 = pnand %p5824_p1, %p6338_p8 }
  0xa1   : > { %p5827_p13 = pneg %p5826_p3 }
  0xa3   : > { %p5832_p2 = pnand %p5830_p0, %p5827_p13 }
  0xa5   : > { %5835 = shalt.err (!%p5832_p2)
}
  0xa6   : > { %s5836_s4 = scalar_lea.vmem %s670_s27, 4608  ;;  %p5844_p10 = scmp.lt.s32.totalorder %s670_s27, %s670_s27 }
  0xa7   : > { %p5837_p5 = scmp.ne.s32.totalorder %s670_s27, %s5836_s4  ;;  %p5845_p11 = scmp.lt.s32.totalorder %s5836_s4, %s5836_s4 }
  0xa9   : > { %p5839_p7 = pnand %p5837_p5, %p6338_p8  ;;  %p5846_p12 = por %p5845_p11, %p5844_p10 }
  0xab   : > { %p5840_p9 = pneg %p5839_p7 }
  0xad   : > { %p5847_p4 = pnand %p5846_p12, %p5840_p9 }
  0xaf   : > { %5850 = shalt.err (!%p5847_p4)
}
  0xb0   : > { %5593 = dma.hbm_to_vmem [thread:$0]  (!%p6324_p6), %s7352_s16, 4608, %s670_s27, [#allocation18], %s7317_s15, %s7317_s15, %s7319_s17  }
  0xb1   : > { %s6154_s19 = smov [#allocation10]   ;;  %s6155_s0 = smov [#allocation13]  }
  0xb2   : > { %s591_s21 = sshll.u32 %s6154_s19, 4  ;;  %s618_s24 = sshll.u32 %s6155_s0, 4  ;;  %s592_s21 = int_to_ptr.vmem [resolvable:$true] %s591_s21  ;;  %s619_s24 = int_to_ptr.vmem [resolvable:$true] %s618_s24 }
  0xb3   : > { %s7353_s25 = sld [smem:[#allocation38_spill]] }
  0xb9   : > { %s5851_s4 = scalar_lea.hbm %s7353_s25, 512 }
  0xba   : > { %p5852_p1 = scmp.ne.s32.totalorder %s7353_s25, %s5851_s4  ;;  %p5858_p0 = scmp.lt.u32.totalorder %s5851_s4, %s7353_s25 }
  0xbc   : > { %p5854_p3 = pnand %p5852_p1, %p6338_p8 }
  0xbe   : > { %p5855_p13 = pneg %p5854_p3 }
  0xc0   : > { %p5860_p2 = pnand %p5858_p0, %p5855_p13 }
  0xc2   : > { %5863 = shalt.err (!%p5860_p2)
}
  0xc3   : > { %s5864_s27 = scalar_lea.vmem %s592_s21, 512  ;;  %p5872_p10 = scmp.lt.s32.totalorder %s592_s21, %s592_s21 }
  0xc4   : > { %p5865_p5 = scmp.ne.s32.totalorder %s592_s21, %s5864_s27  ;;  %p5873_p11 = scmp.lt.s32.totalorder %s5864_s27, %s5864_s27 }
  0xc6   : > { %p5867_p7 = pnand %p5865_p5, %p6338_p8  ;;  %p5874_p12 = por %p5873_p11, %p5872_p10 }
  0xc8   : > { %p5868_p9 = pneg %p5867_p7 }
  0xca   : > { %p5875_p4 = pnand %p5874_p12, %p5868_p9 }
  0xcc   : > { %5878 = shalt.err (!%p5875_p4)
}
  0xcd   : > { %5578 = dma.hbm_to_vmem [thread:$0]  (!%p6324_p6), %s7353_s25, 512, %s592_s21, [#allocation9], %s7317_s15, %s7317_s15, %s7319_s17  }
  0xce   : > { %s7354_s9 = sld [smem:[#allocation40_spill]] }
  0xd4   : > { %s5879_s19 = scalar_lea.hbm %s7354_s9, 32 }
  0xd5   : > { %p5880_p1 = scmp.ne.s32.totalorder %s7354_s9, %s5879_s19  ;;  %p5886_p0 = scmp.lt.u32.totalorder %s5879_s19, %s7354_s9 }
  0xd7   : > { %p5882_p3 = pnand %p5880_p1, %p6338_p8 }
  0xd9   : > { %p5883_p13 = pneg %p5882_p3 }
  0xdb   : > { %p5888_p2 = pnand %p5886_p0, %p5883_p13 }
  0xdd   : > { %5891 = shalt.err (!%p5888_p2)
}
  0xde   : > { %s5892_s22 = scalar_lea.vmem %s619_s24, 32  ;;  %p5900_p10 = scmp.lt.s32.totalorder %s619_s24, %s619_s24 }
  0xdf   : > { %p5893_p5 = scmp.ne.s32.totalorder %s619_s24, %s5892_s22  ;;  %p5901_p11 = scmp.lt.s32.totalorder %s5892_s22, %s5892_s22 }
  0xe1   : > { %p5895_p7 = pnand %p5893_p5, %p6338_p8  ;;  %p5902_p12 = por %p5901_p11, %p5900_p10 }
  0xe3   : > { %p5896_p9 = pneg %p5895_p7 }
  0xe5   : > { %p5903_p4 = pnand %p5902_p12, %p5896_p9 }
  0xe7   : > { %5906 = shalt.err (!%p5903_p4)
}
  0xe8   : > { %s6156_s21 = smov 16   ;;  %s6157_s27 = smov 1  }
  0xe9   : > { %5584 = dma.hbm_to_vmem [thread:$0]  (!%p6324_p6), %s7354_s9, 32, %s619_s24, [#allocation12], %s6156_s21, %s6156_s21, %s6157_s27  }
  0xea   : > { %s6158_s6 = smov [#allocation16]   ;;  %s6159_s19 = smov [#allocation19]  }
  0xeb   : > { %s653_s2 = sshll.u32 %s6158_s6, 4  ;;  %s685_s0 = sshll.u32 %s6159_s19, 4  ;;  %s654_s2 = int_to_ptr.vmem [resolvable:$true] %s653_s2  ;;  %s686_s0 = int_to_ptr.vmem [resolvable:$true] %s685_s0 }
  0xec   : > { %s7355_s14 = sld [smem:[#allocation44_spill]] }
  0xf2   : > { %s5907_s4 = scalar_lea.hbm %s7355_s14, 512 }
  0xf3   : > { %p5908_p1 = scmp.ne.s32.totalorder %s7355_s14, %s5907_s4  ;;  %p5914_p0 = scmp.lt.u32.totalorder %s5907_s4, %s7355_s14 }
  0xf5   : > { %p5910_p3 = pnand %p5908_p1, %p6338_p8 }
  0xf7   : > { %p5911_p13 = pneg %p5910_p3 }
  0xf9   : > { %p5916_p2 = pnand %p5914_p0, %p5911_p13 }
  0xfb   : > { %5919 = shalt.err (!%p5916_p2)
}
  0xfc   : > { %s5920_s24 = scalar_lea.vmem %s654_s2, 512  ;;  %p5928_p10 = scmp.lt.s32.totalorder %s654_s2, %s654_s2 }
  0xfd   : > { %p5921_p5 = scmp.ne.s32.totalorder %s654_s2, %s5920_s24  ;;  %p5929_p11 = scmp.lt.s32.totalorder %s5920_s24, %s5920_s24 }
  0xff   : > { %p5923_p7 = pnand %p5921_p5, %p6338_p8  ;;  %p5930_p12 = por %p5929_p11, %p5928_p10 }
 0x101   : > { %p5924_p9 = pneg %p5923_p7 }
 0x103   : > { %p5931_p4 = pnand %p5930_p12, %p5924_p9 }
 0x105   : > { %5934 = shalt.err (!%p5931_p4)
}
 0x106   : > { %s7356_s15 = smov 8   ;;  %s7357_s21 = smov 128  }
 0x107   : > { %5590 = dma.hbm_to_vmem [thread:$0]  (!%p6324_p6), %s7355_s14, 512, %s654_s2, [#allocation15], %s7357_s21, %s7357_s21, %s7356_s15  }
 0x108   : > { %s7358_s18 = sld [smem:[#allocation48_spill]] }
 0x10e   : > { %s5935_s12 = scalar_lea.hbm %s7358_s18, 1024 }
 0x10f   : > { %p5936_p1 = scmp.ne.s32.totalorder %s7358_s18, %s5935_s12  ;;  %p5942_p0 = scmp.lt.u32.totalorder %s5935_s12, %s7358_s18 }
 0x111   : > { %p5938_p3 = pnand %p5936_p1, %p6338_p8 }
 0x113   : > { %p5939_p13 = pneg %p5938_p3 }
 0x115   : > { %p5944_p2 = pnand %p5942_p0, %p5939_p13 }
 0x117   : > { %5947 = shalt.err (!%p5944_p2)
}
 0x118   : > { %s5948_s4 = scalar_lea.vmem %s686_s0, 1024  ;;  %p5956_p10 = scmp.lt.s32.totalorder %s686_s0, %s686_s0 }
 0x119   : > { %p5949_p5 = scmp.ne.s32.totalorder %s686_s0, %s5948_s4  ;;  %p5957_p11 = scmp.lt.s32.totalorder %s5948_s4, %s5948_s4 }
 0x11b   : > { %p5951_p7 = pnand %p5949_p5, %p6338_p8  ;;  %p5958_p12 = por %p5957_p11, %p5956_p10 }
 0x11d   : > { %p5952_p9 = pneg %p5951_p7 }
 0x11f   : > { %p5959_p4 = pnand %p5958_p12, %p5952_p9 }
 0x121   : > { %5962 = shalt.err (!%p5959_p4)
}
 0x122   : > { %5596 = dma.hbm_to_vmem [thread:$0]  (!%p6324_p6), %s7358_s18, 1024, %s686_s0, [#allocation18], %s7357_s21, %s7357_s21, %s7356_s15  }
 0x123   : > { %s6160_s24 = smov [#allocation20]   ;;  %s7359_s20 = sld [smem:[#allocation50_spill]] }
 0x124   : > { %s701_s16 = sshll.u32 %s6160_s24, 4  ;;  %s702_s16 = int_to_ptr.vmem [resolvable:$true] %s701_s16 }
 0x129   : > { %s5963_s7 = scalar_lea.hbm %s7359_s20, 1024 }
 0x12a   : > { %p5964_p1 = scmp.ne.s32.totalorder %s7359_s20, %s5963_s7  ;;  %p5970_p0 = scmp.lt.u32.totalorder %s5963_s7, %s7359_s20 }
 0x12c   : > { %p5966_p3 = pnand %p5964_p1, %p6338_p8 }
 0x12e   : > { %p5967_p13 = pneg %p5966_p3 }
 0x130   : > { %p5972_p2 = pnand %p5970_p0, %p5967_p13 }
 0x132   : > { %5975 = shalt.err (!%p5972_p2)
}
 0x133   : > { %s5976_s0 = scalar_lea.vmem %s702_s16, 1024  ;;  %p5984_p10 = scmp.lt.s32.totalorder %s702_s16, %s702_s16 }
 0x134   : > { %p5977_p5 = scmp.ne.s32.totalorder %s702_s16, %s5976_s0  ;;  %p5985_p11 = scmp.lt.s32.totalorder %s5976_s0, %s5976_s0 }
 0x136   : > { %p5979_p7 = pnand %p5977_p5, %p6338_p8  ;;  %p5986_p12 = por %p5985_p11, %p5984_p10 }
 0x138   : > { %p5980_p9 = pneg %p5979_p7 }
 0x13a   : > { %p5987_p4 = pnand %p5986_p12, %p5980_p9 }
 0x13c   : > { %5990 = shalt.err (!%p5987_p4)
}
 0x13d   : > { %5599 = dma.hbm_to_vmem [thread:$0]  (!%p6324_p6), %s7359_s20, 1024, %s702_s16, [#allocation21], %s7357_s21, %s7357_s21, %s7356_s15  }
 0x13e   : > { %s4427_s26 = sadd.s32 4294967294, %s6145_s30   ;;  %s6554_s5 = sadd.s32 1, %s6145_s30  }
 0x13f   : > { %s50_s2 = ssub.s32 %s6145_s30, %s6554_s5  ;;  %s53_s22 = sadd.s32 1, %s6141_s29 }
 0x140   : > { %p51_p8 = scmp.eq.s32.totalorder %s50_s2, 0  ;;  %p60_p1 = scmp.ne.s32.totalorder %s6141_s29, %s6137_s28 }
 0x141   : > { %p61_p3 = scmp.eq.s32.totalorder %s6145_s30, 0  ;;  %p66_p13 = scmp.ne.s32.totalorder %s6137_s28, %s6133_s3 }
 0x142   : > { %s6565_s24 = scalar_select %p51_p8, %s6141_s29, %s53_s22  }
 0x143   : > { %p6567_p0 = por %p61_p3, %p60_p1  ;;  %p7361_p2 = scmp.eq.s32.totalorder %s6306_s23, 0 }
 0x144   : > { %p541_p5 = scmp.eq.s32.totalorder %s6306_s23, 1  ;;  %p547_p7 = scmp.eq.s32.totalorder %s4427_s26, 1 }
 0x145   : > { %p6573_p6 = por %p7361_p2, %p66_p13  ;;  %p5621_p9 = scmp.lt.s32.totalorder %s6145_s30, 2 }
 0x146   : > { %s6580_s27 = sand.u32 1, %s6141_s29   ;;  %p6582_p10 = por %p541_p5, %p60_p1 }
 0x147   : > { %s7362_s16 = scalar_select %p6573_p6, 1, 0 }
 0x148   : > { %s7363_s7 = scalar_select %p6582_p10, 1, 0 }
 0x149   : > { %p6586_p11 = por %p547_p7, %p66_p13  ;;  %s4440_s6 = sshll.u32 %s6580_s27, 4 }
 0x14a   : > { %s4555_s19 = sshll.u32 %s6145_s30, 8  ;;  %s7365_s11 = sld [smem:[#allocation32_spill]] }
 0x14b   : > { %s7364_s12 = scalar_select %p6586_p11, 1, 0 }
 0x14c   : > { %s722_s26 = scalar_lea.vmem [#allocation2], %s4440_s6  ;;  %p6601_p12 = pnand %p5621_p9, %p6567_p0 }
 0x14d   : > { %s729_s2 = sshll.u32 %s722_s26, 4  ;;  %s719_s14 = scalar_lea.sflag [#allocation3], %s6580_s27  ;;  %s6597_s2 = int_to_ptr.vmem [resolvable:$true] %s729_s2 }
 0x14e   : > { %p5993_p8 = pneg %p6601_p12 }
 0x150   : > { %s6595_s4 = scalar_lea.hbm %s7365_s11, %s4555_s19  ;;  %s5996_s17 = scalar_lea.hbm %s7365_s11, 512 }
 0x151   : > { %s5991_s13 = scalar_lea.hbm %s6595_s4, 256  ;;  %p5997_p13 = scmp.lt.u32.totalorder %s6595_s4, %s7365_s11 }
 0x152   : > { %p5992_p4 = scmp.ne.s32.totalorder %s6595_s4, %s5991_s13  ;;  %p5998_p0 = scmp.lt.u32.totalorder %s5996_s17, %s5991_s13 }
 0x153   : > { %p6000_p5 = scmp.lt.u32.totalorder %s5991_s13, %s6595_s4 }
 0x154   : > { %p5994_p1 = pnand %p5993_p8, %p5992_p4  ;;  %p5999_p2 = por %p5998_p0, %p5997_p13 }
 0x156   : > { %p5995_p3 = pneg %p5994_p1  ;;  %p6001_p7 = por %p6000_p5, %p5999_p2 }
 0x158   : > { %p6002_p9 = pnand %p6001_p7, %p5995_p3 }
 0x15a   : > { %6005 = shalt.err (!%p6002_p9)
}
 0x15b   : > { %s6006_s9 = scalar_lea.vmem %s6597_s2, 256  ;;  %s6161_s6 = smov [#allocation2]  }
 0x15c   : > { %p6007_p4 = scmp.ne.s32.totalorder %s6597_s2, %s6006_s9  ;;  %s6011_s19 = sshll.u32 %s6161_s6, 4  ;;  %s6012_s19 = int_to_ptr.vmem [resolvable:$false] %s6011_s19 }
 0x15d   : > { %s6013_s0 = scalar_lea.vmem %s6012_s19, 512  ;;  %p6014_p10 = scmp.lt.s32.totalorder %s6597_s2, %s6012_s19 }
 0x15e   : > { %p6009_p1 = pnand %p6007_p4, %p5993_p8  ;;  %p6015_p13 = scmp.lt.s32.totalorder %s6013_s0, %s6006_s9 }
 0x160   : > { %p6010_p11 = pneg %p6009_p1  ;;  %p6016_p0 = por %p6015_p13, %p6014_p10 }
 0x162   : > { %p6017_p2 = pnand %p6016_p0, %p6010_p11 }
 0x164   : > { %6020 = shalt.err (!%p6017_p2)
}
 0x165   : > { %5603 = dma.hbm_to_vmem [thread:$0]  (!%p6601_p12), %s6595_s4, 256, %s6597_s2, %s719_s14, %s7357_s21, %s7357_s21, %s7356_s15  }
 0x166   : > { %s4443_s13 = sshll.u32 %s6145_s30, 4  ;;  %s748_s17 = scalar_lea.vmem [#allocation5], %s6580_s27 }
 0x167   : > { %s755_s9 = sshll.u32 %s748_s17, 4  ;;  %s7367_s19 = sld [smem:[#allocation34_spill]]  ;;  %s756_s9 = int_to_ptr.vmem [resolvable:$true] %s755_s9 }
 0x168   : > { %s7368_s11 = sand.u32 1, %s6145_s30  }
 0x169   : > { %s746_s18 = scalar_lea.sflag [#allocation6], %s7368_s11 }
 0x16d   : > { %s6642_s0 = scalar_lea.hbm %s7367_s19, %s4443_s13  ;;  %s6026_s21 = scalar_lea.hbm %s7367_s19, 32 }
 0x16e   : > { %s6021_s20 = scalar_lea.hbm %s6642_s0, 16  ;;  %p6027_p5 = scmp.lt.u32.totalorder %s6642_s0, %s7367_s19 }
 0x16f   : > { %p6022_p10 = scmp.ne.s32.totalorder %s6642_s0, %s6021_s20  ;;  %p6028_p7 = scmp.lt.u32.totalorder %s6026_s21, %s6021_s20 }
 0x170   : > { %p6030_p4 = scmp.lt.u32.totalorder %s6021_s20, %s6642_s0 }
 0x171   : > { %p6024_p11 = pnand %p6022_p10, %p5993_p8  ;;  %p6029_p9 = por %p6028_p7, %p6027_p5 }
 0x173   : > { %p6025_p3 = pneg %p6024_p11  ;;  %p6031_p1 = por %p6030_p4, %p6029_p9 }
 0x175   : > { %p6032_p13 = pnand %p6031_p1, %p6025_p3 }
 0x177   : > { %6035 = shalt.err (!%p6032_p13)
}
 0x178   : > { %s6036_s11 = scalar_lea.vmem %s756_s9, 16  ;;  %s6162_s2 = smov [#allocation5]  }
 0x179   : > { %p6037_p0 = scmp.ne.s32.totalorder %s756_s9, %s6036_s11  ;;  %s6041_s13 = sshll.u32 %s6162_s2, 4  ;;  %s6042_s13 = int_to_ptr.vmem [resolvable:$false] %s6041_s13 }
 0x17a   : > { %s6043_s17 = scalar_lea.vmem %s6042_s13, 32  ;;  %p6044_p11 = scmp.lt.s32.totalorder %s756_s9, %s6042_s13 }
 0x17b   : > { %p6039_p2 = pnand %p6037_p0, %p5993_p8  ;;  %p6045_p6 = scmp.lt.s32.totalorder %s6043_s17, %s6036_s11 }
 0x17d   : > { %p6040_p10 = pneg %p6039_p2  ;;  %p6046_p5 = por %p6045_p6, %p6044_p11 }
 0x17f   : > { %p6047_p7 = pnand %p6046_p5, %p6040_p10 }
 0x181   : > { %6050 = shalt.err (!%p6047_p7)
}
 0x182   : > { %5606 = dma.hbm_to_vmem [thread:$0]  (!%p6601_p12), %s6642_s0, 16, %s756_s9, %s746_s18  }
 0x183   : > { %p7369_p3 = scmp.ne.s32.totalorder %s7345_s1, 0 }
 0x184   : > { %s6668_s20 = sand.u32 (!%p7369_p3), 1, %s6137_s28   ;;  %p7370_p6 = scmp.ne.s32.totalorder (!%p7369_p3), %s7362_s16, 0 }
 0x185   : > { %764 = sbr.rel (%p7369_p3) target bundleno = 4144 (0x1030), region = 108  ;;  %s4445_s26 = sshll.u32 (!%p7369_p3), %s6668_s20, 4 }
 0x186   : > { %s767_s6 = scalar_lea.sflag (!%p7369_p3), [#allocation3], %s6668_s20  ;;  %s770_s14 = scalar_lea.vmem (!%p7369_p3), [#allocation2], %s4445_s26 }
 0x18c   : > { %6096 = dma.done.wait (%p7370_p6), %s767_s6, 256  }
 0x18d   : > { %6098 = vsyncadd (%p7370_p6), %s767_s6, 4294967040  ;;  %s775_s18 = sand.u32 1, %s6306_s23   ;;  %s778_s22 = scalar_lea.vmem [#allocation5], %s6668_s20 }
 0x18e   : > { %s776_s1 = scalar_lea.sflag [#allocation6], %s775_s18 }
 0x18f   : > { %6100 = dma.done.wait (%p7370_p6), %s776_s1, 16  }
 0x190   : > { %6102 = vsyncadd (%p7370_p6), %s776_s1, 4294967280  ;;  %p7371_p12 = scmp.eq.s32.totalorder %s6306_s23, 0 }
 0x192   : > { %6104 = dma.done.wait (%p7371_p12), [#allocation6], 16   ;;  %p7372_p8 = pmov %p7371_p12 }
 0x194   : > { %6106 = vsyncadd (%p7372_p8), [#allocation6], 4294967280  ;;  %p7373_p9 = pmov %p7372_p8 }
 0x195   : > { %p7374_p4 = pmov %p7372_p8 }
 0x196   : > { %6108 = dma.done.wait (%p7373_p9), [#allocation9], 528  }
 0x197   : > { %6110 = vsyncadd (%p7374_p4), [#allocation9], 4294966768  ;;  %p7375_p1 = pmov %p7374_p4 }
 0x199   : > { %6112 = dma.done.wait (%p7375_p1), [#allocation12], 48   ;;  %p7376_p13 = pmov %p7375_p1 }
 0x19a   : > { %p7377_p0 = pmov %p7375_p1 }
 0x19b   : > { %6114 = vsyncadd (%p7376_p13), [#allocation12], 4294967248 }
 0x19c   : > { %6116 = dma.done.wait (%p7377_p0), [#allocation15], 1024   ;;  %p7378_p2 = pmov %p7377_p0 }
 0x19d   : > { %p7379_p10 = pmov %p7377_p0 }
 0x19e   : > { %6118 = vsyncadd (%p7378_p2), [#allocation15], 4294966272 }
 0x19f   : > { %6120 = dma.done.wait (%p7379_p10), [#allocation18], 5632   ;;  %p7380_p11 = pmov %p7377_p0 }
 0x1a0   : > { %p7381_p5 = pmov %p7377_p0 }
 0x1a1   : > { %6122 = vsyncadd (%p7380_p11), [#allocation18], 4294961664 }
 0x1a2   : > { %6124 = dma.done.wait (%p7381_p5), [#allocation21], 1024   ;;  %p7382_p7 = pmov %p7377_p0 }
 0x1a3   : > { %v889_v0 = vld [vmem:[%s770_s14] sm:$0xff]  ;;  %vm893_vm0 = vcmask 523264   ;;  %v890_v1 = vld [vmem:[%s770_s14 + $0x8] sm:$0xff]  ;;  %s7383_s0 = sld [smem:[#allocation35_spill]]  ;;  %v6163_v42 = vmov 0.0|0.0   ;;  %vm6164_vm5 = vmmov 0  }
 0x1a4   : > { %6126 = vsyncadd (%p7382_p7), [#allocation21], 4294966272  ;;  %v891_v2 = vmul.f32 %v889_v0, %v889_v0  ;;  %v892_v3 = vmul.f32 %v890_v1, %v890_v1  ;;  %v1016_v18 = vld [vmem:[#allocation14] sm:$0xff]  ;;  %v1017_v19 = vld [vmem:[#allocation14 + $0x8] sm:$0xff]  ;;  %v6165_v43 = vmov 0.0   ;;  %p886_p3 = scmp.lt.s32.totalorder %s6306_s23, 1 }
 0x1a5   : > { %v5217_v20 = vpack.c.bf16 %v1017_v19, %v1016_v18  ;;  %v1018_v39 = vld [vmem:[#allocation14 + $0x10] sm:$0xff]  ;;  %v1019_v40 = vld [vmem:[#allocation14 + $0x18] sm:$0xff]  ;;  %v1111_v46 = vld [vmem:[#allocation10 + $0x8] sm:$0xff]  ;;  %vm1027_vm6 = vcmask 261120   ;;  %s7384_s4 = sld [smem:[#allocation33_spill]]  ;;  %s7386_s13 = sld [smem:[#allocation43_spill]] }
 0x1a6   : > { %v894_v4 = vsel %vm893_vm0, %v891_v2, 0.0  ;;  %v897_v5 = vsel %vm893_vm0, %v892_v3, 0.0  ;;  %v5221_v41 = vpack.c.bf16 %v1019_v40, %v1018_v39  ;;  %v4457_v44 = vld [vmem:[#allocation7] ss:$0 sm:$0xff]  ;;  %v1110_v45 = vld [vmem:[#allocation10] sm:$0xff]  ;;  %v1112_v52 = vld [vmem:[#allocation10 + $0x10] sm:$0xff] }
 0x1a7   : > { %895 = vadd.xlane.f32.xlu0 %v894_v4  ;;  %5218 = vmatprep.subr.bf16.mxu1 %v5217_v20  ;;  %v5226_v50 = vpack.c.bf16 %v1111_v46, %v1110_v45  ;;  %v1113_v53 = vld [vmem:[#allocation10 + $0x18] sm:$0xff]  ;;  %s887_s15 = scalar_select %p886_p3, %s6306_s23, 1  ;;  %v1278_v55 = vld [vmem:[#allocation16] sm:$0xff]  ;;  %v1279_v56 = vld [vmem:[#allocation16 + $0x8] sm:$0xff]  ;;  %vm2410_vm11 = vcmask 130048  }
 0x1a8   : > { %5220 = vmatpush3.bf16.msra.mxu1 %v5217_v20  ;;  %v5229_v54 = vpack.c.bf16 %v1113_v53, %v1112_v52  ;;  %v6756_v58 = vpack.c.bf16 %v1279_v56, %v1278_v55  ;;  %v1280_v59 = vld [vmem:[#allocation16 + $0x10] sm:$0xff]  ;;  %v1281_v60 = vld [vmem:[#allocation16 + $0x18] sm:$0xff]  ;;  %v1295_v2 = vld [vmem:[%s7289_s8 + $0x10] sm:$0xff]  ;;  %s885_s21 = scalar_lea.vmem [#allocation22], %s4445_s26  ;;  %s7392_s17 = sld [smem:[#allocation51_spill]] }
 0x1a9   : > { %v920_v6 = vld [vmem:[%s7383_s0] sm:$0xff]  ;;  %v921_v7 = vld [vmem:[%s7383_s0 + $0x8] sm:$0xff]  ;;  %v922_v9 = vld [vmem:[%s7383_s0 + $0x10] sm:$0xff]  ;;  %5222 = vmatprep.subr.bf16.mxu1 %v5221_v41  ;;  %v6761_v61 = vpack.c.bf16 %v1281_v60, %v1280_v59  ;;  %s4230_s27 = sshll.u32 %s885_s21, 4  ;;  %s7393_s18 = sld [smem:[#allocation52_spill]]  ;;  %s7230_s27 = int_to_ptr.vmem [resolvable:$true] %s4230_s27 }
 0x1aa   : > { %v5201_v8 = vpack.c.bf16 %v921_v7, %v920_v6  ;;  %v923_v10 = vld [vmem:[%s7383_s0 + $0x18] sm:$0xff]  ;;  %v924_v12 = vld [vmem:[%s7383_s0 + $0x20] sm:$0xff]  ;;  %v925_v13 = vld [vmem:[%s7383_s0 + $0x28] sm:$0xff]  ;;  %s4217_s26 = scalar_lea.sflag [#allocation4], %s6668_s20  ;;  %p7394_p12 = scmp.ne.s32.totalorder %s7363_s7, 0 }
 0x1ab   : > { %898 = vadd.xlane.f32.xlu0 %v897_v5  ;;  %v5205_v11 = vpack.c.bf16 %v923_v10, %v922_v9  ;;  %v926_v14 = vld [vmem:[%s7383_s0 + $0x30] sm:$0xff]  ;;  %v5209_v15 = vpack.c.bf16 %v925_v13, %v924_v12  ;;  %v927_v16 = vld [vmem:[%s7383_s0 + $0x38] sm:$0xff]  ;;  %s888_s11 = scalar_lea.vmem %s7384_s4, %s887_s15  ;;  %v6767_v62 = vld [vmem:[#allocation8] sm:$0x1]  ;;  %s7385_s4 = sld [smem:[#allocation45_spill]] }
 0x1ac   : > { %5202 = vmatprep.subr.bf16.mxu0 %v5201_v8  ;;  %v5213_v17 = vpack.c.bf16 %v927_v16, %v926_v14  ;;  %5224 = vmatpush3.bf16.msra.mxu1 %v5221_v41  ;;  %v1109_v57 = vld [vmem:[%s888_s11] sm:$0x1]  ;;  %v1296_v3 = vld [vmem:[%s7289_s8 + $0x18] sm:$0xff]  ;;  %v4468_v6 = vld [vmem:[%s7291_s10 + $0x28] sm:$0xff]  ;;  %s7391_s15 = sld [smem:[#allocation49_spill]]  ;;  %s6167_s16 = smov [#allocation22]  }
 0x1ad   : > { %5204 = vmatpush3.bf16.msra.mxu0 %v5201_v8  ;;  %5225 = vmatprep.subr.bf16.mxu1 %v6163_v42  ;;  %v1293_v63 = vld [vmem:[%s7289_s8] sm:$0xff]  ;;  %v5235_v4 = vpack.c.bf16 %v1296_v3, %v1295_v2  ;;  %v4469_v8 = vld [vmem:[%s7291_s10 + $0x30] sm:$0xff]  ;;  %v4470_v9 = vld [vmem:[%s7291_s10 + $0x38] sm:$0xff]  ;;  %s6055_s9 = sshll.u32 %s6167_s16, 4  ;;  %s6056_s9 = int_to_ptr.vmem [resolvable:$false] %s6055_s9 }
 0x1ae   : > { %5206 = vmatprep.subr.bf16.mxu0 %v5205_v11  ;;  %v4467_v5 = vld [vmem:[%s7291_s10 + $0x20] sm:$0xff]  ;;  %v6804_v10 = vpack.c.bf16 %v4470_v9, %v4469_v8  ;;  %v1217_v52 = vld [vmem:[#allocation17] sm:$0xff]  ;;  %v1233_v56 = vld [vmem:[#allocation17 + $0x68] sm:$0xff]  ;;  %p6058_p4 = scmp.lt.s32.totalorder %s7230_s27, %s6056_s9 }
 0x1af   : > { %v6794_v7 = vpack.c.bf16 %v4468_v6, %v4467_v5  ;;  %v1114_v13 = vld [vmem:[#allocation11] sm:$0x1]  ;;  %v1239_v40 = vld [vmem:[#allocation17 + $0x90] sm:$0xff]  ;;  %v1232_v55 = vld [vmem:[#allocation17 + $0x60] sm:$0xff] }
 0x1b0   : > { %v1266_v20 = vld [vmem:[%s7291_s10] sm:$0xff]  ;;  %v6862_v59 = vpack.c.bf16 %v1233_v56, %v1232_v55  ;;  %v1228_v5 = vld [vmem:[#allocation17 + $0x48] sm:$0xff]  ;;  %v1242_v8 = vld [vmem:[#allocation17 + $0xa0] sm:$0xff] }
 0x1b1   : > { %5208 = vmatpush3.bf16.msra.mxu0 %v5205_v11  ;;  %v1225_v39 = vld [vmem:[#allocation17 + $0x38] sm:$0xff]  ;;  %v1219_v60 = vld [vmem:[#allocation17 + $0x10] sm:$0xff]  ;;  %v1243_v9 = vld [vmem:[#allocation17 + $0xa8] sm:$0xff] }
 0x1b2   : > { %5210 = vmatprep.subr.bf16.mxu0 %v5209_v15  ;;  %v1240_v41 = vld [vmem:[#allocation17 + $0x98] sm:$0xff]  ;;  %vm7017_vm8 = vmpackc.low %vm1027_vm6, %vm1027_vm6 }
 0x1b3   : > { %v4508_v56 = vld [vmem:[%s7289_s8 + $0x20] sm:$0xff] }
 0x1b5   : > { %5212 = vmatpush3.bf16.msra.mxu0 %v5209_v15 }
 0x1b6   : > { %5214 = vmatprep.subr.bf16.mxu0 %v5213_v17 }
 0x1b9   : > { %5216 = vmatpush3.bf16.msra.mxu0 %v5213_v17 }
 0x1ba   : > { %5231 = vmatprep.subr.bf16.mxu0 %v6163_v42 }
 0x234   : > { %v896_v21 = vpop.xlane.xlu0 %895 }
 0x235   : > { %5685 = vrsqrt.f32 %v896_v21  ;;  %vm902_vm1 = vcmp.eq.f32.partialorder %v896_v21, inf  ;;  %v905_v25 = vand.u32 2147483648, %v896_v21  ;;  %vm904_vm2 = vcmp.eq.f32.partialorder %v896_v21, 0.0 }
 0x238   : > { %v899_v22 = vpop.xlane.xlu0 %898 }
 0x239   : > { %5687 = vrsqrt.f32 %v899_v22  ;;  %vm909_vm3 = vcmp.eq.f32.partialorder %v899_v22, inf  ;;  %v912_v31 = vand.u32 2147483648, %v899_v22  ;;  %vm911_vm4 = vcmp.eq.f32.partialorder %v899_v22, 0.0 }
 0x23f   : > { %v5686_v23 = vpop.eup %5685 }
 0x240   : > { %v901_v24 = vmul.f32 %v5686_v23, %v896_v21 }
 0x242   : > { %v903_v26 = vsel %vm902_vm1, %v896_v21, %v901_v24  ;;  %v1267_v21 = vld [vmem:[%s7291_s10 + $0x8] sm:$0xff] }
 0x243   : > { %v5688_v27 = vpop.eup %5687  ;;  %v906_v28 = vsel %vm904_vm2, %v905_v25, %v903_v26  ;;  %v6819_v24 = vpack.c.bf16 %v1267_v21, %v1266_v20  ;;  %v1268_v25 = vld [vmem:[%s7291_s10 + $0x10] sm:$0xff]  ;;  %v1269_v26 = vld [vmem:[%s7291_s10 + $0x18] sm:$0xff]  ;;  %v1245_v20 = vld [vmem:[#allocation17 + $0xb8] sm:$0xff] }
 0x244   : > { %v908_v29 = vmul.f32 %v5688_v27, %v899_v22  ;;  %v914_v30 = vmax.f32 %v906_v28, 1e-12  ;;  %v6832_v28 = vpack.c.bf16 %v1269_v26, %v1268_v25  ;;  %v1253_v25 = vld [vmem:[#allocation17 + $0xe8] sm:$0xff] }
 0x246   : > { %v910_v32 = vsel %vm909_vm3, %v899_v22, %v908_v29  ;;  %5689 = vrcp.f32 %v914_v30  ;;  %v1222_v29 = vld [vmem:[#allocation17 + $0x20] sm:$0xff]  ;;  %v1223_v30 = vld [vmem:[#allocation17 + $0x28] sm:$0xff] }
 0x247   : > { %v913_v33 = vsel %vm911_vm4, %v912_v31, %v910_v32  ;;  %v1237_v31 = vld [vmem:[#allocation17 + $0x80] sm:$0xff]  ;;  %v6838_v32 = vpack.c.bf16 %v1223_v30, %v1222_v29  ;;  %v1254_v30 = vld [vmem:[#allocation17 + $0xf0] sm:$0xff] }
 0x248   : > { %v915_v34 = vmax.f32 %v913_v33, 1e-12  ;;  %v1238_v33 = vld [vmem:[#allocation17 + $0x88] sm:$0xff] }
 0x24a   : > { %5691 = vrcp.f32 %v915_v34  ;;  %v6840_v34 = vpack.c.bf16 %v1238_v33, %v1237_v31  ;;  %v1255_v31 = vld [vmem:[#allocation17 + $0xf8] sm:$0xff] }
 0x250   : > { %v5690_v35 = vpop.eup %5689 }
 0x251   : > { %v918_v36 = vmul.f32 %v5690_v35, %v889_v0  ;;  %v1294_v0 = vld [vmem:[%s7289_s8 + $0x8] sm:$0xff]  ;;  %v1194_v35 = vlaneseq }
 0x253   : > { %4796 = vmatprep.mubr.msk.f32.mxu0 %vm893_vm0, %v918_v36  ;;  %v1195_v36 = vshrl.u32 %v1194_v35, 7 }
 0x254   : > { %v5692_v37 = vpop.eup %5691 }
 0x255   : > { %v919_v38 = vmul.f32 %v5692_v37, %v890_v1  ;;  %v5232_v1 = vpack.c.bf16 %v1294_v0, %v1293_v63  ;;  %v1297_v37 = vld [vmem:[#allocation13] sm:$0x1]  ;;  %v1234_v63 = vld [vmem:[#allocation17 + $0x70] sm:$0xff] }
 0x256   : > { %v1235_v0 = vld [vmem:[#allocation17 + $0x78] sm:$0xff] }
 0x257   : > { %4797 = vmatmul.mubr.msk.f32.vlgmr.msra.gmra.mrb[0].mxu0 %vm893_vm0, %v919_v38  ;;  %v1224_v38 = vld [vmem:[#allocation17 + $0x30] sm:$0xff]  ;;  %v6879_v3 = vpack.c.bf16 %v1235_v0, %v1234_v63  ;;  %v4510_v63 = vld [vmem:[%s7289_s8 + $0x30] sm:$0xff] }
 0x258   : > { %4829 = vmatprep.mubr.msk.f32.mxu0 %vm6164_vm5, %v6165_v43  ;;  %5233 = vmatpush3.bf16.msra.mxu0 %v5232_v1  ;;  %v6871_v1 = vld [vmem:[%s7385_s4] sm:$0x1]  ;;  %v4511_v0 = vld [vmem:[%s7289_s8 + $0x38] sm:$0xff]  ;;  %s7387_s4 = sld [smem:[#allocation41_spill]] }
 0x259   : > { %5234 = vmatprep.subr.bf16.mxu0 %v6163_v42 }
 0x25c   : > { %5236 = vmatpush3.bf16.msra.mxu0 %v5235_v4  ;;  %v1227_v4 = vld [vmem:[#allocation17 + $0x40] sm:$0xff] }
 0x25d   : > { %5243 = vmatprep.subr.bf16.mxu0 %v6163_v42 }
 0x32a   : > { %v4798_v47 = vpop.f32.mrb[0].mxu0 }
 0x32b   : > { %v1007_v48 = vpop.f32.mrb[1].mxu0  ;;  %v6743_v51 = vadd.f32 %v4798_v47, %v4457_v44 }
 0x32c   : > { %v6741_v49 = vadd.f32 %v4457_v44, %v1007_v48  ;;  %v6844_v44 = vsub.s32 0, %v1195_v36  ;;  %v6846_v48 = vpack.c.bf16 %v1225_v39, %v1224_v38  ;;  %v6934_v36 = vpack.c.bf16 %v1255_v31, %v1254_v30  ;;  %v1248_v38 = vld [vmem:[#allocation17 + $0xc8] sm:$0xff]  ;;  %v1249_v39 = vld [vmem:[#allocation17 + $0xd0] sm:$0xff] }
 0x32e   : > { %4807 = vmatprep.mubr.msk.f32.mxu1 %vm1027_vm6, %v6741_v49  ;;  %v6852_v53 = vrot.slane %v6767_v62, %v6844_v44 }
 0x32f   : > { %4808 = vmatmul.mubr.msk.f32.vlgmr.msra.gmra.mrb[0].mxu1 %vm1027_vm6, %v6743_v51 }
 0x330   : > { %5227 = vmatpush3.bf16.msra.mxu1 %v5226_v50  ;;  %4818 = vmatprep.mubr.msk.f32.mxu1 %vm6164_vm5, %v6165_v43  ;;  %v6848_v50 = vpack.c.bf16 %v1240_v41, %v1239_v40  ;;  %v1250_v40 = vld [vmem:[#allocation17 + $0xd8] sm:$0xff] }
 0x331   : > { %5228 = vmatprep.subr.bf16.mxu1 %v6163_v42  ;;  %v6946_v41 = vpack.c.bf16 %v1250_v40, %v1249_v39  ;;  %v7030_v40 = vld [vmem:[%s7387_s4 + $0x1] sm:$0x1] }
 0x334   : > { %5230 = vmatpush3.bf16.msra.mxu1 %v5229_v54  ;;  %v1218_v54 = vld [vmem:[#allocation17 + $0x8] sm:$0xff] }
 0x335   : > { %5237 = vmatprep.subr.bf16.mxu1 %v6163_v42 }
 0x337   : > { %4819 = vmatmul.mubr.msk.f32.vlgmr.msra.gmra.mrb[2].mxu1 %vm1027_vm6, %v1109_v57  ;;  %v6860_v57 = vpack.c.bf16 %v1218_v54, %v1217_v52  ;;  %v1259_v52 = vld [vmem:[#allocation17 + $0x110] sm:$0xff]  ;;  %v1260_v54 = vld [vmem:[#allocation17 + $0x118] sm:$0xff] }
 0x338   : > { %5239 = vmatpush3.bf16.msra.mxu1 %v6756_v58  ;;  %4840 = vmatprep.mubr.msk.f32.mxu1 %vm6164_vm5, %v6165_v43  ;;  %v6958_v55 = vpack.c.bf16 %v1260_v54, %v1259_v52 }
 0x339   : > { %5240 = vmatprep.subr.bf16.mxu1 %v6163_v42 }
 0x33c   : > { %5242 = vmatpush3.bf16.msra.mxu1 %v6761_v61 }
 0x33d   : > { %5249 = vmatprep.subr.bf16.mxu1 %v6163_v42 }
 0x33f   : > { %4841 = vmatmul.mubr.msk.f32.vlgmr.msra.gmra.mrb[4].mxu1 %vm1027_vm6, %v6767_v62  ;;  %v1220_v62 = vld [vmem:[#allocation17 + $0x18] sm:$0xff] }
 0x340   : > { %4862 = vmatprep.mubr.msk.f32.mxu1 %vm6164_vm5, %v6165_v43  ;;  %5251 = vmatpush3.bf16.msra.mxu1 %v6794_v7  ;;  %v6877_v2 = vpack.c.bf16 %v1220_v62, %v1219_v60  ;;  %v4509_v60 = vld [vmem:[%s7289_s8 + $0x28] sm:$0xff] }
 0x341   : > { %5252 = vmatprep.subr.bf16.mxu1 %v6163_v42  ;;  %v5354_v62 = vpack.c.bf16 %v4509_v60, %v4508_v56 }
 0x344   : > { %5254 = vmatpush3.bf16.msra.mxu1 %v6804_v10 }
 0x345   : > { %5280 = vmatprep.subr.bf16.mxu1 %v6840_v34 }
 0x402   : > { %v6807_v11 = vpop.f32.mrb[0].mxu1 }
 0x403   : > { %v6809_v12 = vpop.f32.mrb[1].mxu1 }
 0x40a   : > { %v1184_v14 = vpop.f32.mrb[2].mxu1 }
 0x40b   : > { %v1185_v15 = vadd.f32 %v1184_v14, %v1114_v13  ;;  %v4820_v16 = vpop.f32.mrb[3].mxu1  ;;  %v6893_v13 = vpack.c.bf16 %v1228_v5, %v1227_v4  ;;  %v4460_v14 = vld [vmem:[%s7386_s13] ss:$0 sm:$0xff]  ;;  %v5357_v4 = vpack.c.bf16 %v4511_v0, %v4510_v63  ;;  %s7388_s13 = sld [smem:[#allocation47_spill]] }
 0x40c   : > { %v6905_v21 = vadd.f32 %v4460_v14, %v6809_v12  ;;  %v6927_v33 = vadd.f32 %v6807_v11, %v4460_v14  ;;  %v4557_v5 = vld [vmem:[%s778_s22] ss:$0 sm:$0xff]  ;;  %s4556_s22 = sshll.u32 %s6306_s23, 8  ;;  %s6051_s23 = scalar_lea.vmem %s7230_s27, 256 }
 0x40d   : > { %v1189_v17 = vmul.f32 1.442695, %v1185_v15  ;;  %vm1188_vm7 = vcmp.gt.f32.partialorder %v1185_v15, 0.0  ;;  %1199 = vbcast.lane.b32.xlu1 %v4557_v5, 256  ;;  %s7235_s1 = scalar_lea.hbm %s7393_s18, %s4556_s22  ;;  %p6052_p6 = scmp.ne.s32.totalorder %s7230_s27, %s6051_s23 }
 0x40f   : > { %5693 = vpow2.f32 %v1189_v17  ;;  %v1229_v17 = vld [vmem:[#allocation17 + $0x50] sm:$0xff]  ;;  %p6053_p8 = pnand %p6052_p6, %p7394_p12 }
 0x411   : > { %1203 = vbcast.lane.b32.xlu1 %v4557_v5, 264  ;;  %p6054_p9 = pneg %p6053_p8 }
 0x412   : > { %v6811_v18 = vpop.f32.mrb[4].mxu1 }
 0x413   : > { %v4842_v19 = vpop.f32.mrb[5].mxu1  ;;  %v1442_v6 = vadd.f32 %v6811_v18, %v6871_v1  ;;  %v1230_v18 = vld [vmem:[#allocation17 + $0x58] sm:$0xff] }
 0x414   : > { %v1244_v19 = vld [vmem:[#allocation17 + $0xb0] sm:$0xff] }
 0x415   : > { %v1452_v16 = vrot.slane %v1442_v6, %v6844_v44  ;;  %v6915_v29 = vpack.c.bf16 %v1245_v20, %v1244_v19 }
 0x417   : > { %v1596_v26 = vmul.f32 %v1452_v16, %v6905_v21  ;;  %v1597_v35 = vmul.f32 %v1452_v16, %v6927_v33  ;;  %v7008_v16 = vld [vmem:[%s7388_s13 + $0x1] ss:$0 sm:$0xff] }
 0x419   : > { %v5694_v22 = vpop.eup %5693 }
 0x41a   : > { %v4464_v23 = vadd.f32 -1.0, %v5694_v22  ;;  %v6910_v22 = vpack.c.bf16 %v1230_v18, %v1229_v17 }
 0x41c   : > { %v6827_v27 = vsel %vm1188_vm7, %v1185_v15, %v4464_v23  ;;  %v6900_v15 = vpack.c.bf16 %v1243_v9, %v1242_v8  ;;  %v1252_v23 = vld [vmem:[#allocation17 + $0xe0] sm:$0xff] }
 0x41d   : > { %4830 = vmatmul.mubr.msk.f32.vlgmr.msra.gmra.mrb[2].mxu0 %vm1027_vm6, %v6827_v27  ;;  %v6922_v12 = vpack.c.bf16 %v1253_v25, %v1252_v23 }
 0x41e   : > { %5245 = vmatpush3.bf16.msra.mxu0 %v6819_v24  ;;  %4851 = vmatprep.mubr.msk.f32.mxu0 %vm6164_vm5, %v6165_v43 }
 0x41f   : > { %5246 = vmatprep.subr.bf16.mxu0 %v6163_v42 }
 0x422   : > { %5248 = vmatpush3.bf16.msra.mxu0 %v6832_v28 }
 0x423   : > { %5256 = vmatprep.subr.bf16.mxu0 %v6838_v32 }
 0x4f0   : > { %v1367_v45 = vpop.f32.mrb[2].mxu0 }
 0x4f1   : > { %v1368_v46 = vadd.f32 %v1367_v45, %v1297_v37  ;;  %v4831_v47 = vpop.f32.mrb[3].mxu0  ;;  %v1247_v37 = vld [vmem:[#allocation17 + $0xc0] sm:$0xff] }
 0x4f2   : > { %v6942_v11 = vpack.c.bf16 %v1248_v38, %v1247_v37  ;;  %v1257_v45 = vld [vmem:[#allocation17 + $0x100] sm:$0xff] }
 0x4f3   : > { %4852 = vmatmul.mubr.msk.f32.vlgmr.msra.gmra.mrb[4].mxu0 %vm1027_vm6, %v1368_v46  ;;  %4863 = vmatmul.mubr.msk.f32.vlgmr.msra.gmra.mrb[6].mxu1 %vm1027_vm6, %v1368_v46  ;;  %v1258_v46 = vld [vmem:[#allocation17 + $0x108] sm:$0xff] }
 0x4f4   : > { %5258 = vmatpush3.bf16.msra.mxu0 %v6838_v32  ;;  %5282 = vmatpush3.bf16.msra.mxu1 %v6840_v34  ;;  %v6954_v47 = vpack.c.bf16 %v1258_v46, %v1257_v45  ;;  %v7036_v46 = vld [vmem:[%s7388_s13 + $0x2] ss:$0 sm:$0xff] }
 0x4f5   : > { %5260 = vmatprep.subr.bf16.mxu0 %v6846_v48  ;;  %5284 = vmatprep.subr.bf16.mxu1 %v6848_v50 }
 0x4f6   : > { %4873 = vmatprep.mubr.msk.f32.mxu0 %vm1027_vm6, %v6852_v53  ;;  %4906 = vmatprep.mubr.msk.f32.mxu1 %vm1027_vm6, %v6852_v53 }
 0x4f8   : > { %5262 = vmatpush3.bf16.msra.mxu0 %v6846_v48  ;;  %5286 = vmatpush3.bf16.msra.mxu1 %v6848_v50 }
 0x4f9   : > { %5264 = vmatprep.subr.bf16.mxu0 %v6860_v57  ;;  %5288 = vmatprep.subr.bf16.mxu1 %v6862_v59 }
 0x4fb   : > { %4874 = vmatmul.mubr.msk.f32.vlgmr.msra.gmra.mrb[6].mxu0 %vm1027_vm6, %v6852_v53  ;;  %4907 = vmatmul.mubr.msk.f32.vlgmr.msra.gmra.mrb[8].mxu1 %vm1027_vm6, %v6852_v53 }
 0x4fc   : > { %5266 = vmatpush3.bf16.msra.mxu0 %v6860_v57  ;;  %4884 = vmatprep.mubr.msk.f32.mxu0 %vm1027_vm6, %v6741_v49 }
 0x4fd   : > { %5290 = vmatpush3.bf16.msra.mxu1 %v6862_v59  ;;  %4917 = vmatprep.mubr.msk.f32.mxu1 %vm1027_vm6, %v6741_v49 }
 0x4fe   : > { %5268 = vmatprep.subr.bf16.mxu0 %v6877_v2  ;;  %5292 = vmatprep.subr.bf16.mxu1 %v6879_v3 }
 0x500   : > { %5270 = vmatpush3.bf16.msra.mxu0 %v6877_v2 }
 0x501   : > { %5294 = vmatpush3.bf16.msra.mxu1 %v6879_v3  ;;  %5272 = vmatprep.subr.bf16.mxu0 %v6893_v13 }
 0x502   : > { %5296 = vmatprep.subr.bf16.mxu1 %v6900_v15 }
 0x503   : > { %4885 = vmatmul.mubr.msk.f32.vlgmr.msra.gmra.mrb[6].mxu0 %vm1027_vm6, %v6743_v51 }
 0x504   : > { %4918 = vmatmul.mubr.msk.f32.vlgmr.msra.gmra.mrb[8].mxu1 %vm1027_vm6, %v6743_v51  ;;  %5274 = vmatpush3.bf16.msra.mxu0 %v6893_v13 }
 0x505   : > { %4895 = vmatprep.mubr.msk.f32.mxu0 %vm1027_vm6, %v1596_v26  ;;  %5298 = vmatpush3.bf16.msra.mxu1 %v6900_v15 }
 0x506   : > { %4928 = vmatprep.mubr.msk.f32.mxu1 %vm1027_vm6, %v1596_v26  ;;  %5276 = vmatprep.subr.bf16.mxu0 %v6910_v22 }
 0x507   : > { %5300 = vmatprep.subr.bf16.mxu1 %v6915_v29 }
 0x508   : > { %5278 = vmatpush3.bf16.msra.mxu0 %v6910_v22 }
 0x509   : > { %5302 = vmatpush3.bf16.msra.mxu1 %v6915_v29  ;;  %5304 = vmatprep.subr.bf16.mxu0 %v6922_v12 }
 0x50b   : > { %4896 = vmatmul.mubr.msk.f32.vlgmr.msra.gmra.mrb[6].mxu0 %vm1027_vm6, %v1597_v35 }
 0x50c   : > { %4929 = vmatmul.mubr.msk.f32.vlgmr.msra.gmra.mrb[8].mxu1 %vm1027_vm6, %v1597_v35  ;;  %5306 = vmatpush3.bf16.msra.mxu0 %v6922_v12 }
 0x50d   : > { %5308 = vmatprep.subr.bf16.mxu0 %v6934_v36  ;;  %4939 = vmatprep.mubr.msk.f32.mxu0 %vm1027_vm6, %v6852_v53 }
 0x510   : > { %5310 = vmatpush3.bf16.msra.mxu0 %v6934_v36 }
 0x511   : > { %5312 = vmatprep.subr.bf16.mxu0 %v6942_v11 }
 0x513   : > { %4940 = vmatmul.mubr.msk.f32.vlgmr.msra.gmra.mrb[8].mxu0 %vm1027_vm6, %v6852_v53 }
 0x514   : > { %5314 = vmatpush3.bf16.msra.mxu0 %v6942_v11  ;;  %4950 = vmatprep.mubr.msk.f32.mxu0 %vm1027_vm6, %v6741_v49 }
 0x515   : > { %5316 = vmatprep.subr.bf16.mxu0 %v6946_v41 }
 0x518   : > { %5318 = vmatpush3.bf16.msra.mxu0 %v6946_v41 }
 0x519   : > { %5320 = vmatprep.subr.bf16.mxu0 %v6954_v47 }
 0x51b   : > { %4951 = vmatmul.mubr.msk.f32.vlgmr.msra.gmra.mrb[8].mxu0 %vm1027_vm6, %v6743_v51 }
 0x51c   : > { %5322 = vmatpush3.bf16.msra.mxu0 %v6954_v47  ;;  %4961 = vmatprep.mubr.msk.f32.mxu0 %vm1027_vm6, %v1596_v26 }
 0x51d   : > { %5324 = vmatprep.subr.bf16.mxu0 %v6958_v55 }
 0x520   : > { %5326 = vmatpush3.bf16.msra.mxu0 %v6958_v55 }
 0x521   : > { %5353 = vmatprep.subr.bf16.mxu0 %v6163_v42 }
 0x523   : > { %4962 = vmatmul.mubr.msk.f32.vlgmr.msra.gmra.mrb[8].mxu0 %vm1027_vm6, %v1597_v35 }
 0x524   : > { %5355 = vmatpush3.bf16.msra.mxu0 %v5354_v62  ;;  %5008 = vmatprep.mubr.msk.f32.mxu0 %vm6164_vm5, %v6165_v43 }
 0x525   : > { %5356 = vmatprep.subr.bf16.mxu0 %v6163_v42 }
 0x528   : > { %5358 = vmatpush3.bf16.msra.mxu0 %v5357_v4 }
 0x529   : > { %5367 = vmatprep.subr.bf16.mxu0 %v6163_v42 }
 0x52b   : > { %5009 = vmatmul.mubr.msk.f32.vlgmr.msra.gmra.mrb[10].mxu0 %vm1027_vm6, %v6827_v27 }
 0x52c   : > { %5369 = vmatpush3.bf16.msra.mxu0 %v6819_v24  ;;  %5030 = vmatprep.mubr.msk.f32.mxu0 %vm6164_vm5, %v6165_v43  ;;  %v6997_v24 = vld [vmem:[%s7387_s4] sm:$0x1] }
 0x52d   : > { %5370 = vmatprep.subr.bf16.mxu0 %v6163_v42 }
 0x530   : > { %5372 = vmatpush3.bf16.msra.mxu0 %v6832_v28  ;;  %v7003_v28 = vld [vmem:[%s7388_s13] ss:$0 sm:$0xff] }
 0x531   : > { %5380 = vmatprep.subr.bf16.mxu0 %v6838_v32 }
 0x5c6   : > { %v1522_v6 = vpop.f32.mrb[4].mxu0  ;;  %v1592_v8 = vpop.f32.mrb[6].mxu1 }
 0x5c7   : > { %v4853_v9 = vpop.f32.mrb[5].mxu0  ;;  %v4864_v14 = vpop.f32.mrb[7].mxu1  ;;  %v1523_v27 = vadd.f32 %v1522_v6, %v6997_v24  ;;  %v1593_v45 = vadd.f32 %v7030_v40, %v1592_v8  ;;  %v2684_v6 = vld [vmem:[#allocation13 + $0x1] sm:$0x1] }
 0x5c9   : > { %v2314_v20 = vrot.slane %v1523_v27, %v6844_v44  ;;  %v2320_v54 = vrot.slane %v1593_v45, %v6844_v44  ;;  %v1200_v27 = vpop.permute.xlu1 %1199 }
 0x5de   : > { %v4897_v17 = vpop.f32.mrb[6].mxu0 }
 0x5df   : > { %v4930_v18 = vpop.f32.mrb[8].mxu1  ;;  %v1822_v19 = vpop.f32.mrb[7].mxu0  ;;  %v1840_v39 = vadd.f32 %v4897_v17, %v7003_v28 }
 0x5e0   : > { %v2075_v23 = vadd.f32 %v4930_v18, %v7008_v16  ;;  %v1839_v25 = vadd.f32 %v7003_v28, %v1822_v19  ;;  %v2057_v26 = vpop.f32.mrb[9].mxu1  ;;  %v1204_v17 = vpop.permute.xlu1 %1203  ;;  %v1211_v19 = vmul.f32 %v4557_v5, %v1200_v27 }
 0x5e1   : > { %v2074_v30 = vadd.f32 %v7008_v16, %v2057_v26  ;;  %v1212_v18 = vmul.f32 %v4557_v5, %v1204_v17 }
 0x5e2   : > { %v2316_v31 = vmul.f32 %v2314_v20, %v2075_v23  ;;  %4968 = vmatprep.mubr.msk.f32.mxu1 %vm1027_vm6, %v1839_v25  ;;  %vm1213_vm10 = vcmp.gt.f32.partialorder %v1211_v19, 0.5 }
 0x5e3   : > { %v2315_v35 = vmul.f32 %v2314_v20, %v2074_v30  ;;  %vm1214_vm9 = vcmp.gt.f32.partialorder %v1212_v18, 0.5  ;;  %v6166_v20 = vmov -1e+30  }
 0x5e4   : > { %v7049_v23 = vsel %vm1214_vm9, 0.0, %v6166_v20  ;;  %v7051_v25 = vsel %vm1213_vm10, 0.0, %v6166_v20  ;;  %v1290_v20 = vld [vmem:[#allocation19 + $0x30] sm:$0xff] }
 0x5e5   : > { %v5327_v38 = vpack.c.bf16 %v2316_v31, %v2315_v35 }
 0x5e7   : > { %5329 = vmatprep.subr.msk.bf16.mxu1 %vm7017_vm8, %v5327_v38 }
 0x5e8   : > { %5332 = vmatpush3.bf16.xpose.msk.msra.mxu1 %vm7017_vm8, %v5327_v38 }
 0x5ef   : > { %4969 = vmatmul.mubr.msk.f32.vlgmr.msra.gmra.mrb[10].mxu1 %vm1027_vm6, %v1840_v39 }
 0x5f6   : > { %v4963_v52 = vpop.f32.mrb[8].mxu0 }
 0x5f7   : > { %v2310_v56 = vadd.f32 %v4963_v52, %v7036_v46  ;;  %v2292_v60 = vpop.f32.mrb[9].mxu0 }
 0x5f8   : > { %v2309_v62 = vadd.f32 %v7036_v46, %v2292_v60 }
 0x5f9   : > { %v2322_v63 = vmul.f32 %v2320_v54, %v2310_v56 }
 0x5fa   : > { %v2321_v0 = vmul.f32 %v2320_v54, %v2309_v62 }
 0x5fc   : > { %v5333_v4 = vpack.c.bf16 %v2322_v63, %v2321_v0 }
 0x5fe   : > { %5334 = vmatprep.subr.bf16.mxu1 %v5333_v4  ;;  %v2751_v9 = vpop.f32.mrb[10].mxu0 }
 0x5ff   : > { %v7041_v8 = vadd.f32 %v2751_v9, %v2684_v6  ;;  %5336 = vmatpush3.bf16.msra.mxu1 %v5333_v4  ;;  %v5010_v14 = vpop.f32.mrb[11].mxu0  ;;  %v1288_v6 = vld [vmem:[#allocation19 + $0x20] sm:$0xff]  ;;  %v1289_v9 = vld [vmem:[#allocation19 + $0x28] sm:$0xff] }
 0x600   : > { %v7061_v14 = vpack.c.bf16 %v1289_v9, %v1288_v6 }
 0x601   : > { %5031 = vmatmul.mubr.msk.f32.vlgmr.msra.gmra.mrb[12].mxu0 %vm1027_vm6, %v7041_v8 }
 0x602   : > { %5382 = vmatpush3.bf16.msra.mxu0 %v6838_v32  ;;  %5338 = vmatprep.subr.bf16.mxu1 %v7061_v14 }
 0x603   : > { %5384 = vmatprep.subr.bf16.mxu0 %v6846_v48 }
 0x606   : > { %5386 = vmatpush3.bf16.msra.mxu0 %v6846_v48 }
 0x607   : > { %5388 = vmatprep.subr.bf16.mxu0 %v6860_v57 }
 0x6c2   : > { %v4970_v26 = vpop.f32.mrb[10].mxu1 }
 0x6c3   : > { %v2407_v32 = vadd.f32 %v4970_v26, %v7049_v23  ;;  %v2401_v30 = vpop.f32.mrb[11].mxu1  ;;  %v1291_v26 = vld [vmem:[#allocation19 + $0x38] sm:$0xff] }
 0x6c4   : > { %v2402_v48 = vadd.f32 %v2401_v30, %v7051_v25 }
 0x6c5   : > { %v2414_v31 = vsel %vm2410_vm11, %v2407_v32, -inf }
 0x6c6   : > { %2415 = vmax.xlane.f32.xlu1 %v2414_v31  ;;  %v2411_v35 = vsel %vm2410_vm11, %v2402_v48, -inf  ;;  %v1283_v31 = vld [vmem:[#allocation19] sm:$0xff] }
 0x6c7   : > { %2412 = vmax.xlane.f32.xlu0 %v2411_v35  ;;  %v1284_v35 = vld [vmem:[#allocation19 + $0x8] sm:$0xff] }
 0x6d4   : > { %v7057_v5 = vpop.f32.mrb[12].mxu0 }
 0x6d5   : > { %v5032_v38 = vpop.f32.mrb[13].mxu0 }
 0x6d6   : > { %v7071_v38 = vpack.c.bf16 %v1284_v35, %v1283_v31 }
 0x753   : > { %v2416_v39 = vpop.xlane.xlu1 %2415 }
 0x754   : > { %v2418_v45 = vsub.f32 %v2407_v32, %v2416_v39  ;;  %v2413_v52 = vpop.xlane.xlu0 %2412  ;;  %v1285_v39 = vld [vmem:[#allocation19 + $0x10] sm:$0xff] }
 0x755   : > { %v2417_v54 = vsub.f32 %v2402_v48, %v2413_v52  ;;  %v7065_v48 = vpack.c.bf16 %v1291_v26, %v1290_v20 }
 0x756   : > { %v2421_v56 = vmul.f32 1.442695, %v2418_v45  ;;  %v1286_v45 = vld [vmem:[#allocation19 + $0x18] sm:$0xff] }
 0x757   : > { %v2419_v60 = vmul.f32 1.442695, %v2417_v54 }
 0x759   : > { %5695 = vpow2.f32 %v2419_v60  ;;  %v7093_v60 = vld [vmem:[%s7391_s15] ss:$0 sm:$0xff]  ;;  %s6057_s15 = scalar_lea.vmem %s6056_s9, 512 }
 0x75a   : > { %5697 = vpow2.f32 %v2421_v56  ;;  %v7074_v56 = vpack.c.bf16 %v1286_v45, %v1285_v39  ;;  %p6059_p1 = scmp.lt.s32.totalorder %s6057_s15, %s6051_s23 }
 0x75c   : > { %p6060_p13 = por %p6059_p1, %p6058_p4 }
 0x75e   : > { %p6061_p0 = pnand %p6060_p13, %p6054_p9 }
 0x763   : > { %v5696_v62 = vpop.eup %5695 }
 0x764   : > { %v2423_v63 = vsel %vm2410_vm11, %v5696_v62, 0.0  ;;  %v5698_v0 = vpop.eup %5697 }
 0x765   : > { %2424 = vadd.xlane.f32.xlu0 %v2423_v63  ;;  %v2426_v4 = vsel %vm2410_vm11, %v5698_v0, 0.0 }
 0x769   : > { %2427 = vadd.xlane.f32.xlu0 %v2426_v4 }
 0x7f2   : > { %v2425_v27 = vpop.xlane.xlu0 %2424 }
 0x7f3   : > { %5699 = vrcp.f32 %v2425_v27 }
 0x7f6   : > { %v2428_v17 = vpop.xlane.xlu0 %2427 }
 0x7f7   : > { %5701 = vrcp.f32 %v2428_v17 }
 0x7fd   : > { %v5700_v18 = vpop.eup %5699 }
 0x7fe   : > { %v2431_v19 = vmul.f32 %v5700_v18, %v5696_v62 }
 0x800   : > { %4975 = vmatprep.mubr.msk.f32.mxu1 %vm2410_vm11, %v2431_v19 }
 0x801   : > { %v5702_v32 = vpop.eup %5701 }
 0x802   : > { %v2432_v30 = vmul.f32 %v5702_v32, %v5698_v0 }
 0x804   : > { %4976 = vmatmul.mubr.msk.f32.vlgmr.msra.gmra.mrb[12].mxu1 %vm2410_vm11, %v2432_v30 }
 0x805   : > { %5340 = vmatpush3.bf16.msra.mxu1 %v7061_v14 }
 0x806   : > { %5342 = vmatprep.subr.bf16.mxu1 %v7065_v48 }
 0x809   : > { %5344 = vmatpush3.bf16.msra.mxu1 %v7065_v48 }
 0x80a   : > { %5346 = vmatprep.subr.bf16.mxu1 %v7071_v38 }
 0x8d7   : > { %v4977_v52 = vpop.f32.mrb[12].mxu1 }
 0x8d8   : > { %v2505_v54 = vpop.f32.mrb[13].mxu1 }
 0x8d9   : > { %4986 = vmatprep.mubr.msk.f32.mxu1 %vm1027_vm6, %v2505_v54 }
 0x8da   : > { %4987 = vmatmul.mubr.msk.f32.vlgmr.msra.gmra.mrb[14].mxu1 %vm1027_vm6, %v4977_v52 }
 0x8db   : > { %5348 = vmatpush3.bf16.msra.mxu1 %v7071_v38  ;;  %4997 = vmatprep.mubr.msk.f32.mxu1 %vm1027_vm6, %v6852_v53 }
 0x8dc   : > { %5350 = vmatprep.subr.bf16.mxu1 %v7074_v56 }
 0x8df   : > { %5352 = vmatpush3.bf16.msra.mxu1 %v7074_v56 }
 0x8e0   : > { %5360 = vmatprep.subr.bf16.mxu1 %v6756_v58 }
 0x8e2   : > { %4998 = vmatmul.mubr.msk.f32.vlgmr.msra.gmra.mrb[14].mxu1 %vm1027_vm6, %v6852_v53 }
 0x8e3   : > { %5362 = vmatpush3.bf16.msra.mxu1 %v6756_v58 }
 0x8e4   : > { %5364 = vmatprep.subr.bf16.mxu1 %v6761_v61 }
 0x8e7   : > { %5366 = vmatpush3.bf16.msra.mxu1 %v6761_v61 }
 0x8e8   : > { %5373 = vmatprep.subr.bf16.mxu1 %v6163_v42 }
 0x9b5   : > { %v4999_v62 = vpop.f32.mrb[14].mxu1 }
 0x9b6   : > { %v2661_v63 = vpop.f32.mrb[15].mxu1  ;;  %v7099_v53 = vadd.f32 %v4999_v62, %v7093_v60  ;;  %v4045_v62 = vld [vmem:[#allocation20 + $0x20] sm:$0xff] }
 0x9b7   : > { %v7096_v0 = vadd.f32 %v7093_v60, %v2661_v63  ;;  %v4046_v63 = vld [vmem:[#allocation20 + $0x28] sm:$0xff] }
 0x9b9   : > { %5019 = vmatprep.mubr.msk.f32.mxu1 %vm1027_vm6, %v7096_v0  ;;  %5052 = vmatprep.mubr.msk.f32.mxu0 %vm1027_vm6, %v7096_v0 }
 0x9ba   : > { %5020 = vmatmul.mubr.msk.f32.vlgmr.msra.gmra.mrb[16].mxu1 %vm1027_vm6, %v7099_v53  ;;  %5053 = vmatmul.mubr.msk.f32.vlgmr.msra.gmra.mrb[14].mxu0 %vm1027_vm6, %v7099_v53 }
 0x9bb   : > { %5375 = vmatpush3.bf16.msra.mxu1 %v6794_v7  ;;  %5390 = vmatpush3.bf16.msra.mxu0 %v6860_v57 }
 0x9bc   : > { %5063 = vmatprep.mubr.msk.f32.mxu0 %vm1027_vm6, %v6741_v49  ;;  %5376 = vmatprep.subr.bf16.mxu1 %v6163_v42  ;;  %v2759_v42 = vrot.slane %v6871_v1, %v6844_v44 }
 0x9bd   : > { %5392 = vmatprep.subr.bf16.mxu0 %v6877_v2  ;;  %5041 = vmatprep.mubr.msk.f32.mxu1 %vm6164_vm5, %v6165_v43 }
 0x9bf   : > { %5378 = vmatpush3.bf16.msra.mxu1 %v6804_v10  ;;  %5394 = vmatpush3.bf16.msra.mxu0 %v6877_v2 }
 0x9c0   : > { %5404 = vmatprep.subr.bf16.mxu1 %v6840_v34  ;;  %5396 = vmatprep.subr.bf16.mxu0 %v6893_v13 }
 0x9c2   : > { %5042 = vmatmul.mubr.msk.f32.vlgmr.msra.gmra.mrb[18].mxu1 %vm1027_vm6, %v7041_v8  ;;  %5064 = vmatmul.mubr.msk.f32.vlgmr.msra.gmra.mrb[14].mxu0 %vm1027_vm6, %v6743_v51 }
 0x9c3   : > { %5406 = vmatpush3.bf16.msra.mxu1 %v6840_v34  ;;  %5085 = vmatprep.mubr.msk.f32.mxu1 %vm1027_vm6, %v7096_v0 }
 0x9c4   : > { %5408 = vmatprep.subr.bf16.mxu1 %v6848_v50  ;;  %5398 = vmatpush3.bf16.msra.mxu0 %v6893_v13 }
 0x9c5   : > { %5400 = vmatprep.subr.bf16.mxu0 %v6910_v22 }
 0x9c7   : > { %5410 = vmatpush3.bf16.msra.mxu1 %v6848_v50 }
 0x9c8   : > { %5412 = vmatprep.subr.bf16.mxu1 %v6862_v59  ;;  %5402 = vmatpush3.bf16.msra.mxu0 %v6910_v22 }
 0x9c9   : > { %5428 = vmatprep.subr.bf16.mxu0 %v6922_v12 }
 0x9ca   : > { %5086 = vmatmul.mubr.msk.f32.vlgmr.msra.gmra.mrb[20].mxu1 %vm1027_vm6, %v7099_v53 }
 0x9cb   : > { %5414 = vmatpush3.bf16.msra.mxu1 %v6862_v59  ;;  %5096 = vmatprep.mubr.msk.f32.mxu1 %vm1027_vm6, %v6741_v49  ;;  %v2912_v59 = vadd.f32 %v7057_v5, %v6997_v24 }
 0x9cc   : > { %5416 = vmatprep.subr.bf16.mxu1 %v6879_v3 }
 0x9cf   : > { %5418 = vmatpush3.bf16.msra.mxu1 %v6879_v3  ;;  %v3683_v3 = vrot.slane %v2912_v59, %v6844_v44 }
 0x9d0   : > { %5420 = vmatprep.subr.bf16.mxu1 %v6900_v15 }
 0x9d2   : > { %5097 = vmatmul.mubr.msk.f32.vlgmr.msra.gmra.mrb[20].mxu1 %vm1027_vm6, %v6743_v51 }
 0x9d3   : > { %5422 = vmatpush3.bf16.msra.mxu1 %v6900_v15 }
 0x9d4   : > { %5424 = vmatprep.subr.bf16.mxu1 %v6915_v29 }
 0x9d7   : > { %5426 = vmatpush3.bf16.msra.mxu1 %v6915_v29 }
 0xa8d   : > { %v5021_v43 = vpop.f32.mrb[16].mxu1 }
 0xa8e   : > { %v2839_v58 = vadd.f32 %v5021_v43, %v2759_v42  ;;  %v2833_v61 = vpop.f32.mrb[17].mxu1 }
 0xa8f   : > { %v2834_v7 = vadd.f32 %v2833_v61, %v2759_v42  ;;  %v5477_v42 = vpack.c.bf16 %v4046_v63, %v4045_v62 }
 0xa90   : > { %v2986_v34 = vmul.f32 %v2839_v58, %v6927_v33 }
 0xa91   : > { %v2985_v10 = vmul.f32 %v2834_v7, %v6905_v21  ;;  %v4040_v7 = vld [vmem:[#allocation20] sm:$0xff] }
 0xa93   : > { %5074 = vmatprep.mubr.msk.f32.mxu0 %vm1027_vm6, %v2985_v10  ;;  %5107 = vmatprep.mubr.msk.f32.mxu1 %vm1027_vm6, %v2985_v10 }
 0xa94   : > { %5075 = vmatmul.mubr.msk.f32.vlgmr.msra.gmra.mrb[14].mxu0 %vm1027_vm6, %v2986_v34  ;;  %5108 = vmatmul.mubr.msk.f32.vlgmr.msra.gmra.mrb[20].mxu1 %vm1027_vm6, %v2986_v34 }
 0xa95   : > { %v2981_v50 = vpop.f32.mrb[18].mxu1  ;;  %5430 = vmatpush3.bf16.msra.mxu0 %v6922_v12  ;;  %5118 = vmatprep.mubr.msk.f32.mxu0 %vm1027_vm6, %v7096_v0 }
 0xa96   : > { %v5043_v57 = vpop.f32.mrb[19].mxu1  ;;  %5432 = vmatprep.subr.bf16.mxu0 %v6934_v36 }
 0xa99   : > { %5434 = vmatpush3.bf16.msra.mxu0 %v6934_v36 }
 0xa9a   : > { %5436 = vmatprep.subr.bf16.mxu0 %v6942_v11 }
 0xa9c   : > { %5119 = vmatmul.mubr.msk.f32.vlgmr.msra.gmra.mrb[16].mxu0 %vm1027_vm6, %v7099_v53 }
 0xa9d   : > { %5438 = vmatpush3.bf16.msra.mxu0 %v6942_v11  ;;  %5129 = vmatprep.mubr.msk.f32.mxu0 %vm1027_vm6, %v6741_v49 }
 0xa9e   : > { %5440 = vmatprep.subr.bf16.mxu0 %v6946_v41 }
 0xaa1   : > { %5442 = vmatpush3.bf16.msra.mxu0 %v6946_v41  ;;  %v2982_v41 = vadd.f32 %v7030_v40, %v2981_v50  ;;  %v4042_v50 = vld [vmem:[#allocation20 + $0x10] sm:$0xff] }
 0xaa2   : > { %5444 = vmatprep.subr.bf16.mxu0 %v6954_v47 }
 0xaa4   : > { %5130 = vmatmul.mubr.msk.f32.vlgmr.msra.gmra.mrb[16].mxu0 %vm1027_vm6, %v6743_v51 }
 0xaa5   : > { %5446 = vmatpush3.bf16.msra.mxu0 %v6954_v47  ;;  %5140 = vmatprep.mubr.msk.f32.mxu0 %vm1027_vm6, %v2985_v10  ;;  %v4041_v10 = vld [vmem:[#allocation20 + $0x8] sm:$0xff] }
 0xaa6   : > { %5448 = vmatprep.subr.bf16.mxu0 %v6958_v55 }
 0xaa9   : > { %5450 = vmatpush3.bf16.msra.mxu0 %v6958_v55  ;;  %v3689_v55 = vrot.slane %v2982_v41, %v6844_v44 }
 0xaaa   : > { %5478 = vmatprep.subr.bf16.mxu0 %v5477_v42 }
 0xaac   : > { %5141 = vmatmul.mubr.msk.f32.vlgmr.msra.gmra.mrb[16].mxu0 %vm1027_vm6, %v2986_v34  ;;  %v5485_v34 = vpack.c.bf16 %v4041_v10, %v4040_v7 }
 0xaad   : > { %5480 = vmatpush3.bf16.msra.mxu0 %v5477_v42 }
 0xb67   : > { %v5076_v1 = vpop.f32.mrb[14].mxu0  ;;  %v5109_v2 = vpop.f32.mrb[20].mxu1 }
 0xb68   : > { %v3450_v13 = vadd.f32 %v5109_v2, %v7008_v16  ;;  %v3209_v15 = vpop.f32.mrb[15].mxu0  ;;  %v3438_v21 = vpop.f32.mrb[21].mxu1  ;;  %v3221_v11 = vadd.f32 %v5076_v1, %v7003_v28 }
 0xb69   : > { %v3220_v22 = vadd.f32 %v7003_v28, %v3209_v15  ;;  %v3449_v29 = vadd.f32 %v7008_v16, %v3438_v21 }
 0xb6a   : > { %v3685_v12 = vmul.f32 %v3683_v3, %v3450_v13 }
 0xb6b   : > { %v3684_v33 = vmul.f32 %v3683_v3, %v3449_v29  ;;  %5147 = vmatprep.mubr.msk.f32.mxu1 %vm1027_vm6, %v3220_v22 }
 0xb6d   : > { %v5451_v36 = vpack.c.bf16 %v3685_v12, %v3684_v33 }
 0xb6f   : > { %5453 = vmatprep.subr.msk.bf16.mxu1 %vm7017_vm8, %v5451_v36 }
 0xb70   : > { %5456 = vmatpush3.bf16.xpose.msk.msra.mxu1 %vm7017_vm8, %v5451_v36 }
 0xb77   : > { %5148 = vmatmul.mubr.msk.f32.vlgmr.msra.gmra.mrb[22].mxu1 %vm1027_vm6, %v3221_v11 }
 0xb7f   : > { %v5142_v47 = vpop.f32.mrb[16].mxu0 }
 0xb80   : > { %v3679_v24 = vadd.f32 %v5142_v47, %v7036_v46  ;;  %v3667_v16 = vpop.f32.mrb[17].mxu0 }
 0xb81   : > { %v3678_v8 = vadd.f32 %v7036_v46, %v3667_v16 }
 0xb82   : > { %v3691_v5 = vmul.f32 %v3689_v55, %v3679_v24 }
 0xb83   : > { %v3690_v4 = vmul.f32 %v3689_v55, %v3678_v8 }
 0xb85   : > { %v5457_v6 = vpack.c.bf16 %v3691_v5, %v3690_v4 }
 0xb87   : > { %5458 = vmatprep.subr.bf16.mxu1 %v5457_v6 }
 0xb88   : > { %5460 = vmatpush3.bf16.msra.mxu1 %v5457_v6 }
 0xb89   : > { %5462 = vmatprep.subr.bf16.mxu1 %v7061_v14 }
 0xc4a   : > { %v5149_v28 = vpop.f32.mrb[22].mxu1 }
 0xc4b   : > { %v3770_v37 = vpop.f32.mrb[23].mxu1  ;;  %v3776_v40 = vadd.f32 %v5149_v28, %v7049_v23 }
 0xc4c   : > { %v3771_v9 = vadd.f32 %v3770_v37, %v7051_v25 }
 0xc4d   : > { %v3782_v27 = vsel %vm2410_vm11, %v3776_v40, -inf }
 0xc4e   : > { %v3779_v44 = vsel %vm2410_vm11, %v3771_v9, -inf }
 0xc4f   : > { %3780 = vmax.xlane.f32.xlu0 %v3779_v44 }
 0xc53   : > { %3783 = vmax.xlane.f32.xlu0 %v3782_v27 }
 0xcdc   : > { %v3781_v46 = vpop.xlane.xlu0 %3780 }
 0xcdd   : > { %v3785_v17 = vsub.f32 %v3771_v9, %v3781_v46 }
 0xcdf   : > { %v3787_v18 = vmul.f32 1.442695, %v3785_v17 }
 0xce0   : > { %v3784_v19 = vpop.xlane.xlu0 %3783 }
 0xce1   : > { %5703 = vpow2.f32 %v3787_v18  ;;  %v3786_v20 = vsub.f32 %v3776_v40, %v3784_v19 }
 0xce3   : > { %v3789_v26 = vmul.f32 1.442695, %v3786_v20 }
 0xce5   : > { %5705 = vpow2.f32 %v3789_v26 }
 0xceb   : > { %v5704_v32 = vpop.eup %5703 }
 0xcec   : > { %v3791_v30 = vsel %vm2410_vm11, %v5704_v32, 0.0 }
 0xced   : > { %3792 = vadd.xlane.f32.xlu0 %v3791_v30 }
 0xcef   : > { %v5706_v25 = vpop.eup %5705 }
 0xcf0   : > { %v3794_v23 = vsel %vm2410_vm11, %v5706_v25, 0.0 }
 0xcf1   : > { %3795 = vadd.xlane.f32.xlu0 %v3794_v23 }
 0xd7a   : > { %v3793_v31 = vpop.xlane.xlu0 %3792 }
 0xd7b   : > { %5707 = vrcp.f32 %v3793_v31 }
 0xd7e   : > { %v3796_v35 = vpop.xlane.xlu0 %3795 }
 0xd7f   : > { %5709 = vrcp.f32 %v3796_v35 }
 0xd85   : > { %v5708_v39 = vpop.eup %5707 }
 0xd86   : > { %v3799_v45 = vmul.f32 %v5708_v39, %v5704_v32 }
 0xd88   : > { %5154 = vmatprep.mubr.msk.f32.mxu1 %vm2410_vm11, %v3799_v45 }
 0xd89   : > { %v5710_v52 = vpop.eup %5709 }
 0xd8a   : > { %v3800_v54 = vmul.f32 %v5710_v52, %v5706_v25 }
 0xd8c   : > { %5155 = vmatmul.mubr.msk.f32.vlgmr.msra.gmra.mrb[24].mxu1 %vm2410_vm11, %v3800_v54 }
 0xd8d   : > { %5464 = vmatpush3.bf16.msra.mxu1 %v7061_v14  ;;  %v4047_v14 = vld [vmem:[#allocation20 + $0x30] sm:$0xff] }
 0xd8e   : > { %5466 = vmatprep.subr.bf16.mxu1 %v7065_v48 }
 0xd91   : > { %5468 = vmatpush3.bf16.msra.mxu1 %v7065_v48  ;;  %v4048_v48 = vld [vmem:[#allocation20 + $0x38] sm:$0xff] }
 0xd92   : > { %5470 = vmatprep.subr.bf16.mxu1 %v7071_v38  ;;  %v5481_v61 = vpack.c.bf16 %v4048_v48, %v4047_v14 }
 0xd94   : > { %5482 = vmatprep.subr.bf16.mxu0 %v5481_v61 }
 0xd95   : > { %5484 = vmatpush3.bf16.msra.mxu0 %v5481_v61 }
 0xd96   : > { %5486 = vmatprep.subr.bf16.mxu0 %v5485_v34 }
 0xe5f   : > { %v5156_v43 = vpop.f32.mrb[24].mxu1 }
 0xe60   : > { %v3873_v58 = vpop.f32.mrb[25].mxu1 }
 0xe61   : > { %5165 = vmatprep.mubr.msk.f32.mxu1 %vm1027_vm6, %v3873_v58 }
 0xe62   : > { %5166 = vmatmul.mubr.msk.f32.vlgmr.msra.gmra.mrb[26].mxu1 %vm1027_vm6, %v5156_v43 }
 0xe63   : > { %5472 = vmatpush3.bf16.msra.mxu1 %v7071_v38  ;;  %5176 = vmatprep.mubr.msk.f32.mxu1 %vm1027_vm6, %v7096_v0  ;;  %v4043_v0 = vld [vmem:[#allocation20 + $0x18] sm:$0xff] }
 0xe64   : > { %5474 = vmatprep.subr.bf16.mxu1 %v7074_v56 }
 0xe67   : > { %5476 = vmatpush3.bf16.msra.mxu1 %v7074_v56 }
 0xe6a   : > { %5177 = vmatmul.mubr.msk.f32.vlgmr.msra.gmra.mrb[26].mxu1 %vm1027_vm6, %v7099_v53  ;;  %v5489_v53 = vpack.c.bf16 %v4043_v0, %v4042_v50 }
 0xf3d   : > { %v5178_v38 = vpop.f32.mrb[26].mxu1 }
 0xf3e   : > { %v4029_v57 = vpop.f32.mrb[27].mxu1  ;;  %v4039_v59 = vadd.f32 %v5178_v38, %v7093_v60 }
 0xf3f   : > { %v4038_v56 = vadd.f32 %v7093_v60, %v4029_v57  ;;  %v4549_v60 = vld [vmem:[%s7392_s17] ss:$0 sm:$0xff] }
 0xf41   : > { %5187 = vmatprep.mubr.msk.f32.mxu0 %vm1027_vm6, %v4038_v56 }
 0xf42   : > { %5188 = vmatmul.mubr.msk.f32.vlgmr.msra.gmra.mrb[18].mxu0 %vm1027_vm6, %v4039_v59 }
 0xf43   : > { %5488 = vmatpush3.bf16.msra.mxu0 %v5485_v34  ;;  %5198 = vmatprep.mubr.msk.f32.mxu0 %vm1027_vm6, %v6741_v49 }
 0xf44   : > { %5490 = vmatprep.subr.bf16.mxu0 %v5489_v53 }
 0xf47   : > { %5492 = vmatpush3.bf16.msra.mxu0 %v5489_v53 }
 0xf4a   : > { %5199 = vmatmul.mubr.msk.f32.vlgmr.msra.gmra.mrb[18].mxu0 %vm1027_vm6, %v6743_v51 }
0x101d   : > { %v5200_v1 = vpop.f32.mrb[18].mxu0 }
0x101e   : > { %v4213_v49 = vadd.f32 %v5200_v1, %v4549_v60  ;;  %v4196_v2 = vpop.f32.mrb[19].mxu0 }
0x101f   : > { %v4212_v3 = vadd.f32 %v4549_v60, %v4196_v2 }
0x1020   : > { %4215 = vst.msk [vmem:[%s885_s21 + $0x8] sm:$0xff] %vm1027_vm6, %v4213_v49 }
0x1021   : > { %4214 = vst.msk [vmem:[%s885_s21] sm:$0xff] %vm1027_vm6, %v4212_v3 }
0x1022   : > { %6064 = shalt.err (!%p6061_p0)
}
0x1023   : > { %s6065_s21 = scalar_lea.hbm %s7235_s1, 256  ;;  %s6069_s17 = scalar_lea.hbm %s7393_s18, 512 }
0x1024   : > { %p6066_p2 = scmp.ne.s32.totalorder %s7235_s1, %s6065_s21  ;;  %p6070_p5 = scmp.lt.u32.totalorder %s7235_s1, %s7393_s18 }
0x1025   : > { %p6071_p7 = scmp.lt.u32.totalorder %s6069_s17, %s6065_s21  ;;  %p6073_p6 = scmp.lt.u32.totalorder %s6065_s21, %s7235_s1 }
0x1026   : > { %p6067_p10 = pnand %p6066_p2, %p7394_p12 }
0x1027   : > { %p6072_p3 = por %p6071_p7, %p6070_p5 }
0x1028   : > { %p6068_p11 = pneg %p6067_p10 }
0x1029   : > { %p6074_p8 = por %p6073_p6, %p6072_p3 }
0x102b   : > { %p6075_p9 = pnand %p6074_p8, %p6068_p11 }
0x102d   : > { %6078 = shalt.err (!%p6075_p9)
}
0x102e   : > { %s6168_s14 = smov 128   ;;  %s6169_s23 = smov 8  }
0x102f   : > { %5567 = dma.vmem_to_hbm [thread:$0]  (%p7394_p12), %s7230_s27, 256, %s7235_s1, %s4217_s26, %s6168_s14, %s6168_s14, %s6169_s23  }
0x1030 PF: > { %s4245_s16 = sand.u32 1, %s6133_s3   ;;  %p7395_p4 = scmp.ne.s32.totalorder %s7364_s12, 0 }
0x1031   : > { %p7396_p1 = scmp.ge.s32.totalorder %s6145_s30, 2  ;;  %s4246_s9 = scalar_lea.sflag [#allocation4], %s4245_s16 }
0x1033   : > { %p5608_p13 = pnand %p7396_p1, %p7395_p4 }
0x1035   : > { %6128 = dma.done.wait (!%p5608_p13), %s4246_s9, 256  }
0x1036   : > { %6130 = vsyncadd (!%p5608_p13), %s4246_s9, 4294967040  ;;  %p43_p0 = scmp.ge.s32.totalorder %s6554_s5, 4   ;;  %s7397_s3 = smov %s6137_s28 }
0x1037   : > { %s7398_s28 = smov %s6141_s29  ;;  %s7399_s29 = smov %s6565_s24 }
0x1038   : > { %s7400_s30 = smov %s6554_s5  ;;  %45 = sbr.rel (!%p43_p0) target bundleno = 34 (0x22), region = 225 }
0x103f   :  { %4251 = vsyncpa [#allocation3], 1 }
0x1040   :  { %4253 = vsyncpa [#allocation3 + $0x1], 1 }
0x1041   :  { %4254 = vsyncpa [#allocation6], 1 }
0x1042   :  { %4256 = vsyncpa [#allocation6 + $0x1], 1 }
0x1043   :  { %4257 = vsyncpa [#allocation9], 1 }
0x1044   :  { %4258 = vsyncpa [#allocation12], 1 }
0x1045   :  { %4259 = vsyncpa [#allocation15], 1 }
0x1046   :  { %4260 = vsyncpa [#allocation18], 1 }
0x1047   :  { %4261 = vsyncpa [#allocation21], 1 }
0x1048   :  { %4262 = vsyncpa [#allocation4], 1 }
0x1049   :  { %4264 = vsyncpa [#allocation4 + $0x1], 1 }

// kernel: tpu_custom_call.1
= control target key start
LH: loop header
LB: loop body
LE: loop exit
PB: predicated region body
PF: predicated region fallthrough
CT: control target
= control target key end

     0   :  { %s7281_s0 = inlined_call_operand.hbm [shape: f32[2,16,64], index: 0, kind: input, shape index: {}]   ;;  %s7282_s1 = inlined_call_operand.vmem [shape: f32[2,1,32], index: 1, kind: input, shape index: {}]   ;;  %s7283_s2 = inlined_call_operand.hbm [shape: f32[2,1,16], index: 2, kind: input, shape index: {}]   ;;  %s7284_s3 = inlined_call_operand.vmem [shape: f32[64,32], index: 3, kind: input, shape index: {}]   ;;  %s7285_s4 = inlined_call_operand.hbm [shape: f32[1,32], index: 4, kind: input, shape index: {}]   ;;  %s7286_s5 = inlined_call_operand.hbm [shape: f32[1,32], index: 5, kind: input, shape index: {}]   ;;  %s7287_s6 = inlined_call_operand.hbm [shape: f32[32,32], index: 6, kind: input, shape index: {}]   ;;  %s7288_s7 = inlined_call_operand.hbm [shape: f32[1,32], index: 7, kind: input, shape index: {}]   ;;  %s7289_s8 = inlined_call_operand.vmem [shape: f32[2,32,32], index: 8, kind: input, shape index: {}]   ;;  %s7290_s9 = inlined_call_operand.hbm [shape: f32[2,1,32], index: 9, kind: input, shape index: {}]   ;;  %s7291_s10 = inlined_call_operand.vmem [shape: f32[2,32,32], index: 10, kind: input, shape index: {}]   ;;  %s7292_s11 = inlined_call_operand.vmem [shape: f32[2,1,32], index: 11, kind: input, shape index: {}]   ;;  %s7293_s12 = inlined_call_operand.hbm [shape: f32[32,32], index: 12, kind: input, shape index: {}]   ;;  %s7294_s13 = inlined_call_operand.vmem [shape: f32[1,32], index: 13, kind: input, shape index: {}]   ;;  %s7295_s14 = inlined_call_operand.hbm [shape: f32[32,32], index: 14, kind: input, shape index: {}]   ;;  %s7296_s15 = inlined_call_operand.vmem [shape: f32[1,32], index: 15, kind: input, shape index: {}]   ;;  %s7297_s16 = inlined_call_operand.hbm [shape: f32[9,32,32], index: 16, kind: input, shape index: {}]   ;;  %s7298_s17 = inlined_call_operand.vmem [shape: f32[3,1,32], index: 17, kind: input, shape index: {}]   ;;  %s7299_s18 = inlined_call_operand.hbm [shape: f32[2,32,32], index: 18, kind: input, shape index: {}]   ;;  %s7300_s19 = inlined_call_operand.vmem [shape: f32[1,32], index: 19, kind: input, shape index: {}]   ;;  %s7301_s20 = inlined_call_operand.hbm [shape: f32[2,32,32], index: 20, kind: input, shape index: {}]   ;;  %s7302_s21 = inlined_call_operand.vmem [shape: f32[1,32], index: 21, kind: input, shape index: {}]   ;;  %s7303_s22 = inlined_call_operand.hbm [shape: f32[2,16,32], index: 22, kind: output, shape index: {}]  }
   0x1   :  { %7324 = sst [smem:[#allocation32_spill]] %s7281_s0 }
   0x2   :  { %7325 = sst [smem:[#allocation33_spill]] %s7282_s1 }
   0x3   :  { %7326 = sst [smem:[#allocation34_spill]] %s7283_s2 }
   0x4   :  { %7327 = sst [smem:[#allocation35_spill]] %s7284_s3 }
   0x5   :  { %7328 = sst [smem:[#allocation36_spill]] %s7285_s4 }
   0x6   :  { %7329 = sst [smem:[#allocation37_spill]] %s7286_s5 }
   0x7   :  { %7330 = sst [smem:[#allocation38_spill]] %s7287_s6 }
   0x8   :  { %7331 = sst [smem:[#allocation39_spill]] %s7288_s7 }
   0x9   :  { %7332 = sst [smem:[#allocation40_spill]] %s7290_s9 }
   0xa   :  { %7333 = sst [smem:[#allocation41_spill]] %s7292_s11 }
   0xb   :  { %7334 = sst [smem:[#allocation42_spill]] %s7293_s12 }
   0xc   :  { %7335 = sst [smem:[#allocation43_spill]] %s7294_s13 }
   0xd   :  { %7336 = sst [smem:[#allocation44_spill]] %s7295_s14 }
   0xe   :  { %7337 = sst [smem:[#allocation45_spill]] %s7296_s15 }
   0xf   :  { %7338 = sst [smem:[#allocation46_spill]] %s7297_s16 }
  0x10   :  { %7339 = sst [smem:[#allocation47_spill]] %s7298_s17 }
  0x11   :  { %7340 = sst [smem:[#allocation48_spill]] %s7299_s18 }
  0x12   :  { %7341 = sst [smem:[#allocation49_spill]] %s7300_s19 }
  0x13   :  { %7342 = sst [smem:[#allocation50_spill]] %s7301_s20 }
  0x14   :  { %7343 = sst [smem:[#allocation51_spill]] %s7302_s21 }
  0x15   :  { %7344 = sst [smem:[#allocation52_spill]] %s7303_s22 }
  0x16   :  { %27 = vsyncpa [#allocation3], 0 }
  0x17   :  { %29 = vsyncpa [#allocation3 + $0x1], 0 }
  0x18   :  { %30 = vsyncpa [#allocation6], 0 }
  0x19   :  { %32 = vsyncpa [#allocation6 + $0x1], 0 }
  0x1a   :  { %33 = vsyncpa [#allocation9], 0 }
  0x1b   :  { %34 = vsyncpa [#allocation12], 0 }
  0x1c   :  { %35 = vsyncpa [#allocation15], 0 }
  0x1d   :  { %36 = vsyncpa [#allocation18], 0 }
  0x1e   :  { %37 = vsyncpa [#allocation21], 0 }
  0x1f   :  { %38 = vsyncpa [#allocation4], 0 }
  0x20   :  { %40 = vsyncpa [#allocation4 + $0x1], 0  ;;  %s6285_s3 = smov 0   ;;  %s6287_s28 = smov 0  }
  0x21   :  { %s6289_s29 = smov 0   ;;  %s6291_s30 = smov 0  }
  0x22 LB: > { %s6147_s4 = smov [#allocation7]   ;;  %s6306_s23 = sadd.s32 4294967295, %s6145_s30   ;;  %s6145_s30 = sphi %s6291_s30, %s7400_s30   ;;  %s6141_s29 = sphi %s6289_s29, %s7399_s29   ;;  %s6137_s28 = sphi %s6287_s28, %s7398_s28   ;;  %s6133_s3 = sphi %s6285_s3, %s7397_s3  }
  0x23   : > { %s570_s0 = sshll.u32 %s6147_s4, 4  ;;  %p4428_p0 = scmp.ge.s32.totalorder %s6145_s30, 1  ;;  %s6311_s0 = int_to_ptr.vmem [resolvable:$true] %s570_s0 }
  0x24   : > { %p7314_p1 = scmp.eq.s32.totalorder %s6306_s23, 0  ;;  %p554_p2 = scmp.lt.s32.totalorder %s6145_s30, 3 }
  0x25   : > { %s6148_s5 = smov [#allocation8]   ;;  %s6149_s6 = smov [#allocation11]  }
  0x26   : > { %p6313_p3 = pnand %p4428_p0, %p554_p2  ;;  %s581_s24 = sshll.u32 %s6148_s5, 4  ;;  %s6320_s24 = int_to_ptr.vmem [resolvable:$true] %s581_s24 }
  0x27   : > { %s605_s25 = sshll.u32 %s6149_s6, 4  ;;  %s7347_s4 = sld [smem:[#allocation36_spill]]  ;;  %s6328_s25 = int_to_ptr.vmem [resolvable:$true] %s605_s25 }
  0x28   : > { %s7345_s1 = scalar_select %p6313_p3, 1, 0 }
  0x29   : > { %p5569_p5 = pneg %p6313_p3 }
  0x2b   : > { %p6324_p6 = pnand %p5569_p5, %p7314_p1 }
  0x2d   : > { %s5711_s22 = scalar_lea.hbm %s7347_s4, 16  ;;  %p6338_p8 = pneg %p6324_p6 }
  0x2e   : > { %p5712_p7 = scmp.ne.s32.totalorder %s7347_s4, %s5711_s22  ;;  %p5718_p11 = scmp.lt.u32.totalorder %s5711_s22, %s7347_s4 }
  0x30   : > { %p5714_p9 = pnand %p6338_p8, %p5712_p7 }
  0x32   : > { %p5715_p10 = pneg %p5714_p9 }
  0x34   : > { %p5720_p12 = pnand %p5718_p11, %p5715_p10 }
  0x36   : > { %5723 = shalt.err (!%p5720_p12)
}
  0x37   : > { %s5724_s19 = scalar_lea.vmem %s6311_s0, 16  ;;  %s5731_s21 = scalar_lea.vmem %s6311_s0, 32 }
  0x38   : > { %p5725_p13 = scmp.ne.s32.totalorder %s6311_s0, %s5724_s19  ;;  %p5732_p5 = scmp.lt.s32.totalorder %s6311_s0, %s6311_s0 }
  0x39   : > { %p5733_p7 = scmp.lt.s32.totalorder %s5731_s21, %s5724_s19 }
  0x3a   : > { %p5727_p0 = pnand %p5725_p13, %p6338_p8 }
  0x3b   : > { %p5734_p9 = por %p5733_p7, %p5732_p5 }
  0x3c   : > { %p5728_p2 = pneg %p5727_p0 }
  0x3e   : > { %p5735_p4 = pnand %p5734_p9, %p5728_p2 }
  0x40   : > { %5738 = shalt.err (!%p5735_p4)
}
  0x41   : > { %5572 = dma.hbm_to_vmem [thread:$0]  (!%p6324_p6), %s7347_s4, 16, %s6311_s0, [#allocation6]  }
  0x42   : > { %s7349_s6 = sld [smem:[#allocation37_spill]] }
  0x48   : > { %s5739_s11 = scalar_lea.hbm %s7349_s6, 16 }
  0x49   : > { %p5740_p10 = scmp.ne.s32.totalorder %s7349_s6, %s5739_s11  ;;  %p5746_p4 = scmp.lt.u32.totalorder %s5739_s11, %s7349_s6 }
  0x4b   : > { %p5742_p11 = pnand %p5740_p10, %p6338_p8 }
  0x4d   : > { %p5743_p12 = pneg %p5742_p11 }
  0x4f   : > { %p5748_p13 = pnand %p5746_p4, %p5743_p12 }
  0x51   : > { %5751 = shalt.err (!%p5748_p13)
}
  0x52   : > { %s5752_s0 = scalar_lea.vmem %s6320_s24, 16  ;;  %s5759_s13 = scalar_lea.vmem %s6320_s24, 32 }
  0x53   : > { %p5753_p0 = scmp.ne.s32.totalorder %s6320_s24, %s5752_s0  ;;  %p5760_p7 = scmp.lt.s32.totalorder %s6320_s24, %s6320_s24 }
  0x54   : > { %p5761_p9 = scmp.lt.s32.totalorder %s5759_s13, %s5752_s0 }
  0x55   : > { %p5755_p2 = pnand %p5753_p0, %p6338_p8 }
  0x56   : > { %p5762_p10 = por %p5761_p9, %p5760_p7 }
  0x57   : > { %p5756_p5 = pneg %p5755_p2 }
  0x59   : > { %p5763_p11 = pnand %p5762_p10, %p5756_p5 }
  0x5b   : > { %5766 = shalt.err (!%p5763_p11)
}
  0x5c   : > { %5575 = dma.hbm_to_vmem [thread:$0]  (!%p6324_p6), %s7349_s6, 16, %s6320_s24, [#allocation9]  }
  0x5d   : > { %s7350_s7 = sld [smem:[#allocation39_spill]] }
  0x63   : > { %s5767_s2 = scalar_lea.hbm %s7350_s7, 16 }
  0x64   : > { %p5768_p12 = scmp.ne.s32.totalorder %s7350_s7, %s5767_s2  ;;  %p5774_p0 = scmp.lt.u32.totalorder %s5767_s2, %s7350_s7 }
  0x66   : > { %p5770_p4 = pnand %p5768_p12, %p6338_p8 }
  0x68   : > { %p5771_p13 = pneg %p5770_p4 }
  0x6a   : > { %p5776_p2 = pnand %p5774_p0, %p5771_p13 }
  0x6c   : > { %5779 = shalt.err (!%p5776_p2)
}
  0x6d   : > { %s5780_s24 = scalar_lea.vmem %s6328_s25, 16  ;;  %s5787_s13 = scalar_lea.vmem %s6328_s25, 32 }
  0x6e   : > { %p5781_p5 = scmp.ne.s32.totalorder %s6328_s25, %s5780_s24  ;;  %p5788_p10 = scmp.lt.s32.totalorder %s6328_s25, %s6328_s25 }
  0x6f   : > { %p5789_p11 = scmp.lt.s32.totalorder %s5787_s13, %s5780_s24 }
  0x70   : > { %p5783_p7 = pnand %p5781_p5, %p6338_p8 }
  0x71   : > { %p5790_p12 = por %p5789_p11, %p5788_p10 }
  0x72   : > { %p5784_p9 = pneg %p5783_p7 }
  0x74   : > { %p5791_p4 = pnand %p5790_p12, %p5784_p9 }
  0x76   : > { %5794 = shalt.err (!%p5791_p4)
}
  0x77   : > { %5581 = dma.hbm_to_vmem [thread:$0]  (!%p6324_p6), %s7350_s7, 16, %s6328_s25, [#allocation12]  }
  0x78   : > { %s6150_s17 = smov [#allocation14]   ;;  %s6151_s2 = smov [#allocation17]  }
  0x79   : > { %s637_s22 = sshll.u32 %s6150_s17, 4  ;;  %s669_s27 = sshll.u32 %s6151_s2, 4  ;;  %s638_s22 = int_to_ptr.vmem [resolvable:$true] %s637_s22  ;;  %s670_s27 = int_to_ptr.vmem [resolvable:$true] %s669_s27 }
  0x7a   : > { %s7351_s12 = sld [smem:[#allocation42_spill]] }
  0x80   : > { %s5795_s0 = scalar_lea.hbm %s7351_s12, 512 }
  0x81   : > { %p5796_p13 = scmp.ne.s32.totalorder %s7351_s12, %s5795_s0  ;;  %p5802_p5 = scmp.lt.u32.totalorder %s5795_s0, %s7351_s12 }
  0x83   : > { %p5798_p0 = pnand %p5796_p13, %p6338_p8 }
  0x85   : > { %p5799_p2 = pneg %p5798_p0 }
  0x87   : > { %p5804_p7 = pnand %p5802_p5, %p5799_p2 }
  0x89   : > { %5807 = shalt.err (!%p5804_p7)
}
  0x8a   : > { %s5808_s25 = scalar_lea.vmem %s638_s22, 512  ;;  %p5816_p12 = scmp.lt.s32.totalorder %s638_s22, %s638_s22 }
  0x8b   : > { %p5809_p9 = scmp.ne.s32.totalorder %s638_s22, %s5808_s25  ;;  %p5817_p4 = scmp.lt.s32.totalorder %s5808_s25, %s5808_s25 }
  0x8d   : > { %p5811_p10 = pnand %p5809_p9, %p6338_p8  ;;  %p5818_p1 = por %p5817_p4, %p5816_p12 }
  0x8f   : > { %p5812_p11 = pneg %p5811_p10 }
  0x91   : > { %p5819_p3 = pnand %p5818_p1, %p5812_p11 }
  0x93   : > { %5822 = shalt.err (!%p5819_p3)
}
  0x94   : > { %s7317_s15 = smov 128   ;;  %s7319_s17 = smov 8  }
  0x95   : > { %5587 = dma.hbm_to_vmem [thread:$0]  (!%p6324_p6), %s7351_s12, 512, %s638_s22, [#allocation15], %s7317_s15, %s7317_s15, %s7319_s17  }
  0x96   : > { %s7352_s16 = sld [smem:[#allocation46_spill]] }
  0x9c   : > { %s5823_s0 = scalar_lea.hbm %s7352_s16, 4608 }
  0x9d   : > { %p5824_p1 = scmp.ne.s32.totalorder %s7352_s16, %s5823_s0  ;;  %p5830_p0 = scmp.lt.u32.totalorder %s5823_s0, %s7352_s16 }
  0x9f   : > { %p5826_p3 = pnand %p5824_p1, %p6338_p8 }
  0xa1   : > { %p5827_p13 = pneg %p5826_p3 }
  0xa3   : > { %p5832_p2 = pnand %p5830_p0, %p5827_p13 }
  0xa5   : > { %5835 = shalt.err (!%p5832_p2)
}
  0xa6   : > { %s5836_s4 = scalar_lea.vmem %s670_s27, 4608  ;;  %p5844_p10 = scmp.lt.s32.totalorder %s670_s27, %s670_s27 }
  0xa7   : > { %p5837_p5 = scmp.ne.s32.totalorder %s670_s27, %s5836_s4  ;;  %p5845_p11 = scmp.lt.s32.totalorder %s5836_s4, %s5836_s4 }
  0xa9   : > { %p5839_p7 = pnand %p5837_p5, %p6338_p8  ;;  %p5846_p12 = por %p5845_p11, %p5844_p10 }
  0xab   : > { %p5840_p9 = pneg %p5839_p7 }
  0xad   : > { %p5847_p4 = pnand %p5846_p12, %p5840_p9 }
  0xaf   : > { %5850 = shalt.err (!%p5847_p4)
}
  0xb0   : > { %5593 = dma.hbm_to_vmem [thread:$0]  (!%p6324_p6), %s7352_s16, 4608, %s670_s27, [#allocation18], %s7317_s15, %s7317_s15, %s7319_s17  }
  0xb1   : > { %s6154_s19 = smov [#allocation10]   ;;  %s6155_s0 = smov [#allocation13]  }
  0xb2   : > { %s591_s21 = sshll.u32 %s6154_s19, 4  ;;  %s618_s24 = sshll.u32 %s6155_s0, 4  ;;  %s592_s21 = int_to_ptr.vmem [resolvable:$true] %s591_s21  ;;  %s619_s24 = int_to_ptr.vmem [resolvable:$true] %s618_s24 }
  0xb3   : > { %s7353_s25 = sld [smem:[#allocation38_spill]] }
  0xb9   : > { %s5851_s4 = scalar_lea.hbm %s7353_s25, 512 }
  0xba   : > { %p5852_p1 = scmp.ne.s32.totalorder %s7353_s25, %s5851_s4  ;;  %p5858_p0 = scmp.lt.u32.totalorder %s5851_s4, %s7353_s25 }
  0xbc   : > { %p5854_p3 = pnand %p5852_p1, %p6338_p8 }
  0xbe   : > { %p5855_p13 = pneg %p5854_p3 }
  0xc0   : > { %p5860_p2 = pnand %p5858_p0, %p5855_p13 }
  0xc2   : > { %5863 = shalt.err (!%p5860_p2)
}
  0xc3   : > { %s5864_s27 = scalar_lea.vmem %s592_s21, 512  ;;  %p5872_p10 = scmp.lt.s32.totalorder %s592_s21, %s592_s21 }
  0xc4   : > { %p5865_p5 = scmp.ne.s32.totalorder %s592_s21, %s5864_s27  ;;  %p5873_p11 = scmp.lt.s32.totalorder %s5864_s27, %s5864_s27 }
  0xc6   : > { %p5867_p7 = pnand %p5865_p5, %p6338_p8  ;;  %p5874_p12 = por %p5873_p11, %p5872_p10 }
  0xc8   : > { %p5868_p9 = pneg %p5867_p7 }
  0xca   : > { %p5875_p4 = pnand %p5874_p12, %p5868_p9 }
  0xcc   : > { %5878 = shalt.err (!%p5875_p4)
}
  0xcd   : > { %5578 = dma.hbm_to_vmem [thread:$0]  (!%p6324_p6), %s7353_s25, 512, %s592_s21, [#allocation9], %s7317_s15, %s7317_s15, %s7319_s17  }
  0xce   : > { %s7354_s9 = sld [smem:[#allocation40_spill]] }
  0xd4   : > { %s5879_s19 = scalar_lea.hbm %s7354_s9, 32 }
  0xd5   : > { %p5880_p1 = scmp.ne.s32.totalorder %s7354_s9, %s5879_s19  ;;  %p5886_p0 = scmp.lt.u32.totalorder %s5879_s19, %s7354_s9 }
  0xd7   : > { %p5882_p3 = pnand %p5880_p1, %p6338_p8 }
  0xd9   : > { %p5883_p13 = pneg %p5882_p3 }
  0xdb   : > { %p5888_p2 = pnand %p5886_p0, %p5883_p13 }
  0xdd   : > { %5891 = shalt.err (!%p5888_p2)
}
  0xde   : > { %s5892_s22 = scalar_lea.vmem %s619_s24, 32  ;;  %p5900_p10 = scmp.lt.s32.totalorder %s619_s24, %s619_s24 }
  0xdf   : > { %p5893_p5 = scmp.ne.s32.totalorder %s619_s24, %s5892_s22  ;;  %p5901_p11 = scmp.lt.s32.totalorder %s5892_s22, %s5892_s22 }
  0xe1   : > { %p5895_p7 = pnand %p5893_p5, %p6338_p8  ;;  %p5902_p12 = por %p5901_p11, %p5900_p10 }
  0xe3   : > { %p5896_p9 = pneg %p5895_p7 }
  0xe5   : > { %p5903_p4 = pnand %p5902_p12, %p5896_p9 }
  0xe7   : > { %5906 = shalt.err (!%p5903_p4)
}
  0xe8   : > { %s6156_s21 = smov 16   ;;  %s6157_s27 = smov 1  }
  0xe9   : > { %5584 = dma.hbm_to_vmem [thread:$0]  (!%p6324_p6), %s7354_s9, 32, %s619_s24, [#allocation12], %s6156_s21, %s6156_s21, %s6157_s27  }
  0xea   : > { %s6158_s6 = smov [#allocation16]   ;;  %s6159_s19 = smov [#allocation19]  }
  0xeb   : > { %s653_s2 = sshll.u32 %s6158_s6, 4  ;;  %s685_s0 = sshll.u32 %s6159_s19, 4  ;;  %s654_s2 = int_to_ptr.vmem [resolvable:$true] %s653_s2  ;;  %s686_s0 = int_to_ptr.vmem [resolvable:$true] %s685_s0 }
  0xec   : > { %s7355_s14 = sld [smem:[#allocation44_spill]] }
  0xf2   : > { %s5907_s4 = scalar_lea.hbm %s7355_s14, 512 }
  0xf3   : > { %p5908_p1 = scmp.ne.s32.totalorder %s7355_s14, %s5907_s4  ;;  %p5914_p0 = scmp.lt.u32.totalorder %s5907_s4, %s7355_s14 }
  0xf5   : > { %p5910_p3 = pnand %p5908_p1, %p6338_p8 }
  0xf7   : > { %p5911_p13 = pneg %p5910_p3 }
  0xf9   : > { %p5916_p2 = pnand %p5914_p0, %p5911_p13 }
  0xfb   : > { %5919 = shalt.err (!%p5916_p2)
}
  0xfc   : > { %s5920_s24 = scalar_lea.vmem %s654_s2, 512  ;;  %p5928_p10 = scmp.lt.s32.totalorder %s654_s2, %s654_s2 }
  0xfd   : > { %p5921_p5 = scmp.ne.s32.totalorder %s654_s2, %s5920_s24  ;;  %p5929_p11 = scmp.lt.s32.totalorder %s5920_s24, %s5920_s24 }
  0xff   : > { %p5923_p7 = pnand %p5921_p5, %p6338_p8  ;;  %p5930_p12 = por %p5929_p11, %p5928_p10 }
 0x101   : > { %p5924_p9 = pneg %p5923_p7 }
 0x103   : > { %p5931_p4 = pnand %p5930_p12, %p5924_p9 }
 0x105   : > { %5934 = shalt.err (!%p5931_p4)
}
 0x106   : > { %s7356_s15 = smov 8   ;;  %s7357_s21 = smov 128  }
 0x107   : > { %5590 = dma.hbm_to_vmem [thread:$0]  (!%p6324_p6), %s7355_s14, 512, %s654_s2, [#allocation15], %s7357_s21, %s7357_s21, %s7356_s15  }
 0x108   : > { %s7358_s18 = sld [smem:[#allocation48_spill]] }
 0x10e   : > { %s5935_s12 = scalar_lea.hbm %s7358_s18, 1024 }
 0x10f   : > { %p5936_p1 = scmp.ne.s32.totalorder %s7358_s18, %s5935_s12  ;;  %p5942_p0 = scmp.lt.u32.totalorder %s5935_s12, %s7358_s18 }
 0x111   : > { %p5938_p3 = pnand %p5936_p1, %p6338_p8 }
 0x113   : > { %p5939_p13 = pneg %p5938_p3 }
 0x115   : > { %p5944_p2 = pnand %p5942_p0, %p5939_p13 }
 0x117   : > { %5947 = shalt.err (!%p5944_p2)
}
 0x118   : > { %s5948_s4 = scalar_lea.vmem %s686_s0, 1024  ;;  %p5956_p10 = scmp.lt.s32.totalorder %s686_s0, %s686_s0 }
 0x119   : > { %p5949_p5 = scmp.ne.s32.totalorder %s686_s0, %s5948_s4  ;;  %p5957_p11 = scmp.lt.s32.totalorder %s5948_s4, %s5948_s4 }
 0x11b   : > { %p5951_p7 = pnand %p5949_p5, %p6338_p8  ;;  %p5958_p12 = por %p5957_p11, %p5956_p10 }
 0x11d   : > { %p5952_p9 = pneg %p5951_p7 }
 0x11f   : > { %p5959_p4 = pnand %p5958_p12, %p5952_p9 }
 0x121   : > { %5962 = shalt.err (!%p5959_p4)
}
 0x122   : > { %5596 = dma.hbm_to_vmem [thread:$0]  (!%p6324_p6), %s7358_s18, 1024, %s686_s0, [#allocation18], %s7357_s21, %s7357_s21, %s7356_s15  }
 0x123   : > { %s6160_s24 = smov [#allocation20]   ;;  %s7359_s20 = sld [smem:[#allocation50_spill]] }
 0x124   : > { %s701_s16 = sshll.u32 %s6160_s24, 4  ;;  %s702_s16 = int_to_ptr.vmem [resolvable:$true] %s701_s16 }
 0x129   : > { %s5963_s7 = scalar_lea.hbm %s7359_s20, 1024 }
 0x12a   : > { %p5964_p1 = scmp.ne.s32.totalorder %s7359_s20, %s5963_s7  ;;  %p5970_p0 = scmp.lt.u32.totalorder %s5963_s7, %s7359_s20 }
 0x12c   : > { %p5966_p3 = pnand %p5964_p1, %p6338_p8 }
 0x12e   : > { %p5967_p13 = pneg %p5966_p3 }
 0x130   : > { %p5972_p2 = pnand %p5970_p0, %p5967_p13 }
 0x132   : > { %5975 = shalt.err (!%p5972_p2)
}
 0x133   : > { %s5976_s0 = scalar_lea.vmem %s702_s16, 1024  ;;  %p5984_p10 = scmp.lt.s32.totalorder %s702_s16, %s702_s16 }
 0x134   : > { %p5977_p5 = scmp.ne.s32.totalorder %s702_s16, %s5976_s0  ;;  %p5985_p11 = scmp.lt.s32.totalorder %s5976_s0, %s5976_s0 }
 0x136   : > { %p5979_p7 = pnand %p5977_p5, %p6338_p8  ;;  %p5986_p12 = por %p5985_p11, %p5984_p10 }
 0x138   : > { %p5980_p9 = pneg %p5979_p7 }
 0x13a   : > { %p5987_p4 = pnand %p5986_p12, %p5980_p9 }
 0x13c   : > { %5990 = shalt.err (!%p5987_p4)
}
 0x13d   : > { %5599 = dma.hbm_to_vmem [thread:$0]  (!%p6324_p6), %s7359_s20, 1024, %s702_s16, [#allocation21], %s7357_s21, %s7357_s21, %s7356_s15  }
 0x13e   : > { %s4427_s26 = sadd.s32 4294967294, %s6145_s30   ;;  %s6554_s5 = sadd.s32 1, %s6145_s30  }
 0x13f   : > { %s50_s2 = ssub.s32 %s6145_s30, %s6554_s5  ;;  %s53_s22 = sadd.s32 1, %s6141_s29 }
 0x140   : > { %p51_p8 = scmp.eq.s32.totalorder %s50_s2, 0  ;;  %p60_p1 = scmp.ne.s32.totalorder %s6141_s29, %s6137_s28 }
 0x141   : > { %p61_p3 = scmp.eq.s32.totalorder %s6145_s30, 0  ;;  %p66_p13 = scmp.ne.s32.totalorder %s6137_s28, %s6133_s3 }
 0x142   : > { %s6565_s24 = scalar_select %p51_p8, %s6141_s29, %s53_s22  }
 0x143   : > { %p6567_p0 = por %p61_p3, %p60_p1  ;;  %p7361_p2 = scmp.eq.s32.totalorder %s6306_s23, 0 }
 0x144   : > { %p541_p5 = scmp.eq.s32.totalorder %s6306_s23, 1  ;;  %p547_p7 = scmp.eq.s32.totalorder %s4427_s26, 1 }
 0x145   : > { %p6573_p6 = por %p7361_p2, %p66_p13  ;;  %p5621_p9 = scmp.lt.s32.totalorder %s6145_s30, 2 }
 0x146   : > { %s6580_s27 = sand.u32 1, %s6141_s29   ;;  %p6582_p10 = por %p541_p5, %p60_p1 }
 0x147   : > { %s7362_s16 = scalar_select %p6573_p6, 1, 0 }
 0x148   : > { %s7363_s7 = scalar_select %p6582_p10, 1, 0 }
 0x149   : > { %p6586_p11 = por %p547_p7, %p66_p13  ;;  %s4440_s6 = sshll.u32 %s6580_s27, 4 }
 0x14a   : > { %s4555_s19 = sshll.u32 %s6145_s30, 8  ;;  %s7365_s11 = sld [smem:[#allocation32_spill]] }
 0x14b   : > { %s7364_s12 = scalar_select %p6586_p11, 1, 0 }
 0x14c   : > { %s722_s26 = scalar_lea.vmem [#allocation2], %s4440_s6  ;;  %p6601_p12 = pnand %p5621_p9, %p6567_p0 }
 0x14d   : > { %s729_s2 = sshll.u32 %s722_s26, 4  ;;  %s719_s14 = scalar_lea.sflag [#allocation3], %s6580_s27  ;;  %s6597_s2 = int_to_ptr.vmem [resolvable:$true] %s729_s2 }
 0x14e   : > { %p5993_p8 = pneg %p6601_p12 }
 0x150   : > { %s6595_s4 = scalar_lea.hbm %s7365_s11, %s4555_s19  ;;  %s5996_s17 = scalar_lea.hbm %s7365_s11, 512 }
 0x151   : > { %s5991_s13 = scalar_lea.hbm %s6595_s4, 256  ;;  %p5997_p13 = scmp.lt.u32.totalorder %s6595_s4, %s7365_s11 }
 0x152   : > { %p5992_p4 = scmp.ne.s32.totalorder %s6595_s4, %s5991_s13  ;;  %p5998_p0 = scmp.lt.u32.totalorder %s5996_s17, %s5991_s13 }
 0x153   : > { %p6000_p5 = scmp.lt.u32.totalorder %s5991_s13, %s6595_s4 }
 0x154   : > { %p5994_p1 = pnand %p5993_p8, %p5992_p4  ;;  %p5999_p2 = por %p5998_p0, %p5997_p13 }
 0x156   : > { %p5995_p3 = pneg %p5994_p1  ;;  %p6001_p7 = por %p6000_p5, %p5999_p2 }
 0x158   : > { %p6002_p9 = pnand %p6001_p7, %p5995_p3 }
 0x15a   : > { %6005 = shalt.err (!%p6002_p9)
}
 0x15b   : > { %s6006_s9 = scalar_lea.vmem %s6597_s2, 256  ;;  %s6161_s6 = smov [#allocation2]  }
 0x15c   : > { %p6007_p4 = scmp.ne.s32.totalorder %s6597_s2, %s6006_s9  ;;  %s6011_s19 = sshll.u32 %s6161_s6, 4  ;;  %s6012_s19 = int_to_ptr.vmem [resolvable:$false] %s6011_s19 }
 0x15d   : > { %s6013_s0 = scalar_lea.vmem %s6012_s19, 512  ;;  %p6014_p10 = scmp.lt.s32.totalorder %s6597_s2, %s6012_s19 }
 0x15e   : > { %p6009_p1 = pnand %p6007_p4, %p5993_p8  ;;  %p6015_p13 = scmp.lt.s32.totalorder %s6013_s0, %s6006_s9 }
 0x160   : > { %p6010_p11 = pneg %p6009_p1  ;;  %p6016_p0 = por %p6015_p13, %p6014_p10 }
 0x162   : > { %p6017_p2 = pnand %p6016_p0, %p6010_p11 }
 0x164   : > { %6020 = shalt.err (!%p6017_p2)
}
 0x165   : > { %5603 = dma.hbm_to_vmem [thread:$0]  (!%p6601_p12), %s6595_s4, 256, %s6597_s2, %s719_s14, %s7357_s21, %s7357_s21, %s7356_s15  }
 0x166   : > { %s4443_s13 = sshll.u32 %s6145_s30, 4  ;;  %s748_s17 = scalar_lea.vmem [#allocation5], %s6580_s27 }
 0x167   : > { %s755_s9 = sshll.u32 %s748_s17, 4  ;;  %s7367_s19 = sld [smem:[#allocation34_spill]]  ;;  %s756_s9 = int_to_ptr.vmem [resolvable:$true] %s755_s9 }
 0x168   : > { %s7368_s11 = sand.u32 1, %s6145_s30  }
 0x169   : > { %s746_s18 = scalar_lea.sflag [#allocation6], %s7368_s11 }
 0x16d   : > { %s6642_s0 = scalar_lea.hbm %s7367_s19, %s4443_s13  ;;  %s6026_s21 = scalar_lea.hbm %s7367_s19, 32 }
 0x16e   : > { %s6021_s20 = scalar_lea.hbm %s6642_s0, 16  ;;  %p6027_p5 = scmp.lt.u32.totalorder %s6642_s0, %s7367_s19 }
 0x16f   : > { %p6022_p10 = scmp.ne.s32.totalorder %s6642_s0, %s6021_s20  ;;  %p6028_p7 = scmp.lt.u32.totalorder %s6026_s21, %s6021_s20 }
 0x170   : > { %p6030_p4 = scmp.lt.u32.totalorder %s6021_s20, %s6642_s0 }
 0x171   : > { %p6024_p11 = pnand %p6022_p10, %p5993_p8  ;;  %p6029_p9 = por %p6028_p7, %p6027_p5 }
 0x173   : > { %p6025_p3 = pneg %p6024_p11  ;;  %p6031_p1 = por %p6030_p4, %p6029_p9 }
 0x175   : > { %p6032_p13 = pnand %p6031_p1, %p6025_p3 }
 0x177   : > { %6035 = shalt.err (!%p6032_p13)
}
 0x178   : > { %s6036_s11 = scalar_lea.vmem %s756_s9, 16  ;;  %s6162_s2 = smov [#allocation5]  }
 0x179   : > { %p6037_p0 = scmp.ne.s32.totalorder %s756_s9, %s6036_s11  ;;  %s6041_s13 = sshll.u32 %s6162_s2, 4  ;;  %s6042_s13 = int_to_ptr.vmem [resolvable:$false] %s6041_s13 }
 0x17a   : > { %s6043_s17 = scalar_lea.vmem %s6042_s13, 32  ;;  %p6044_p11 = scmp.lt.s32.totalorder %s756_s9, %s6042_s13 }
 0x17b   : > { %p6039_p2 = pnand %p6037_p0, %p5993_p8  ;;  %p6045_p6 = scmp.lt.s32.totalorder %s6043_s17, %s6036_s11 }
 0x17d   : > { %p6040_p10 = pneg %p6039_p2  ;;  %p6046_p5 = por %p6045_p6, %p6044_p11 }
 0x17f   : > { %p6047_p7 = pnand %p6046_p5, %p6040_p10 }
 0x181   : > { %6050 = shalt.err (!%p6047_p7)
}
 0x182   : > { %5606 = dma.hbm_to_vmem [thread:$0]  (!%p6601_p12), %s6642_s0, 16, %s756_s9, %s746_s18  }
 0x183   : > { %p7369_p3 = scmp.ne.s32.totalorder %s7345_s1, 0 }
 0x184   : > { %s6668_s20 = sand.u32 (!%p7369_p3), 1, %s6137_s28   ;;  %p7370_p6 = scmp.ne.s32.totalorder (!%p7369_p3), %s7362_s16, 0 }
 0x185   : > { %764 = sbr.rel (%p7369_p3) target bundleno = 4144 (0x1030), region = 108  ;;  %s4445_s26 = sshll.u32 (!%p7369_p3), %s6668_s20, 4 }
 0x186   : > { %s767_s6 = scalar_lea.sflag (!%p7369_p3), [#allocation3], %s6668_s20  ;;  %s770_s14 = scalar_lea.vmem (!%p7369_p3), [#allocation2], %s4445_s26 }
 0x18c   : > { %6096 = dma.done.wait (%p7370_p6), %s767_s6, 256  }
 0x18d   : > { %6098 = vsyncadd (%p7370_p6), %s767_s6, 4294967040  ;;  %s775_s18 = sand.u32 1, %s6306_s23   ;;  %s778_s22 = scalar_lea.vmem [#allocation5], %s6668_s20 }
 0x18e   : > { %s776_s1 = scalar_lea.sflag [#allocation6], %s775_s18 }
 0x18f   : > { %6100 = dma.done.wait (%p7370_p6), %s776_s1, 16  }
 0x190   : > { %6102 = vsyncadd (%p7370_p6), %s776_s1, 4294967280  ;;  %p7371_p12 = scmp.eq.s32.totalorder %s6306_s23, 0 }
 0x192   : > { %6104 = dma.done.wait (%p7371_p12), [#allocation6], 16   ;;  %p7372_p8 = pmov %p7371_p12 }
 0x194   : > { %6106 = vsyncadd (%p7372_p8), [#allocation6], 4294967280  ;;  %p7373_p9 = pmov %p7372_p8 }
 0x195   : > { %p7374_p4 = pmov %p7372_p8 }
 0x196   : > { %6108 = dma.done.wait (%p7373_p9), [#allocation9], 528  }
 0x197   : > { %6110 = vsyncadd (%p7374_p4), [#allocation9], 4294966768  ;;  %p7375_p1 = pmov %p7374_p4 }
 0x199   : > { %6112 = dma.done.wait (%p7375_p1), [#allocation12], 48   ;;  %p7376_p13 = pmov %p7375_p1 }
 0x19a   : > { %p7377_p0 = pmov %p7375_p1 }
 0x19b   : > { %6114 = vsyncadd (%p7376_p13), [#allocation12], 4294967248 }
 0x19c   : > { %6116 = dma.done.wait (%p7377_p0), [#allocation15], 1024   ;;  %p7378_p2 = pmov %p7377_p0 }
 0x19d   : > { %p7379_p10 = pmov %p7377_p0 }
 0x19e   : > { %6118 = vsyncadd (%p7378_p2), [#allocation15], 4294966272 }
 0x19f   : > { %6120 = dma.done.wait (%p7379_p10), [#allocation18], 5632   ;;  %p7380_p11 = pmov %p7377_p0 }
 0x1a0   : > { %p7381_p5 = pmov %p7377_p0 }
 0x1a1   : > { %6122 = vsyncadd (%p7380_p11), [#allocation18], 4294961664 }
 0x1a2   : > { %6124 = dma.done.wait (%p7381_p5), [#allocation21], 1024   ;;  %p7382_p7 = pmov %p7377_p0 }
 0x1a3   : > { %v889_v0 = vld [vmem:[%s770_s14] sm:$0xff]  ;;  %vm893_vm0 = vcmask 523264   ;;  %v890_v1 = vld [vmem:[%s770_s14 + $0x8] sm:$0xff]  ;;  %s7383_s0 = sld [smem:[#allocation35_spill]]  ;;  %v6163_v42 = vmov 0.0|0.0   ;;  %vm6164_vm5 = vmmov 0  }
 0x1a4   : > { %6126 = vsyncadd (%p7382_p7), [#allocation21], 4294966272  ;;  %v891_v2 = vmul.f32 %v889_v0, %v889_v0  ;;  %v892_v3 = vmul.f32 %v890_v1, %v890_v1  ;;  %v1016_v18 = vld [vmem:[#allocation14] sm:$0xff]  ;;  %v1017_v19 = vld [vmem:[#allocation14 + $0x8] sm:$0xff]  ;;  %v6165_v43 = vmov 0.0   ;;  %p886_p3 = scmp.lt.s32.totalorder %s6306_s23, 1 }
 0x1a5   : > { %v5217_v20 = vpack.c.bf16 %v1017_v19, %v1016_v18  ;;  %v1018_v39 = vld [vmem:[#allocation14 + $0x10] sm:$0xff]  ;;  %v1019_v40 = vld [vmem:[#allocation14 + $0x18] sm:$0xff]  ;;  %v1111_v46 = vld [vmem:[#allocation10 + $0x8] sm:$0xff]  ;;  %vm1027_vm6 = vcmask 261120   ;;  %s7384_s4 = sld [smem:[#allocation33_spill]]  ;;  %s7386_s13 = sld [smem:[#allocation43_spill]] }
 0x1a6   : > { %v894_v4 = vsel %vm893_vm0, %v891_v2, 0.0  ;;  %v897_v5 = vsel %vm893_vm0, %v892_v3, 0.0  ;;  %v5221_v41 = vpack.c.bf16 %v1019_v40, %v1018_v39  ;;  %v4457_v44 = vld [vmem:[#allocation7] ss:$0 sm:$0xff]  ;;  %v1110_v45 = vld [vmem:[#allocation10] sm:$0xff]  ;;  %v1112_v52 = vld [vmem:[#allocation10 + $0x10] sm:$0xff] }
 0x1a7   : > { %895 = vadd.xlane.f32.xlu0 %v894_v4  ;;  %5218 = vmatprep.subr.bf16.mxu1 %v5217_v20  ;;  %v5226_v50 = vpack.c.bf16 %v1111_v46, %v1110_v45  ;;  %v1113_v53 = vld [vmem:[#allocation10 + $0x18] sm:$0xff]  ;;  %s887_s15 = scalar_select %p886_p3, %s6306_s23, 1  ;;  %v1278_v55 = vld [vmem:[#allocation16] sm:$0xff]  ;;  %v1279_v56 = vld [vmem:[#allocation16 + $0x8] sm:$0xff]  ;;  %vm2410_vm11 = vcmask 130048  }
 0x1a8   : > { %5220 = vmatpush3.bf16.msra.mxu1 %v5217_v20  ;;  %v5229_v54 = vpack.c.bf16 %v1113_v53, %v1112_v52  ;;  %v6756_v58 = vpack.c.bf16 %v1279_v56, %v1278_v55  ;;  %v1280_v59 = vld [vmem:[#allocation16 + $0x10] sm:$0xff]  ;;  %v1281_v60 = vld [vmem:[#allocation16 + $0x18] sm:$0xff]  ;;  %v1295_v2 = vld [vmem:[%s7289_s8 + $0x10] sm:$0xff]  ;;  %s885_s21 = scalar_lea.vmem [#allocation22], %s4445_s26  ;;  %s7392_s17 = sld [smem:[#allocation51_spill]] }
 0x1a9   : > { %v920_v6 = vld [vmem:[%s7383_s0] sm:$0xff]  ;;  %v921_v7 = vld [vmem:[%s7383_s0 + $0x8] sm:$0xff]  ;;  %v922_v9 = vld [vmem:[%s7383_s0 + $0x10] sm:$0xff]  ;;  %5222 = vmatprep.subr.bf16.mxu1 %v5221_v41  ;;  %v6761_v61 = vpack.c.bf16 %v1281_v60, %v1280_v59  ;;  %s4230_s27 = sshll.u32 %s885_s21, 4  ;;  %s7393_s18 = sld [smem:[#allocation52_spill]]  ;;  %s7230_s27 = int_to_ptr.vmem [resolvable:$true] %s4230_s27 }
 0x1aa   : > { %v5201_v8 = vpack.c.bf16 %v921_v7, %v920_v6  ;;  %v923_v10 = vld [vmem:[%s7383_s0 + $0x18] sm:$0xff]  ;;  %v924_v12 = vld [vmem:[%s7383_s0 + $0x20] sm:$0xff]  ;;  %v925_v13 = vld [vmem:[%s7383_s0 + $0x28] sm:$0xff]  ;;  %s4217_s26 = scalar_lea.sflag [#allocation4], %s6668_s20  ;;  %p7394_p12 = scmp.ne.s32.totalorder %s7363_s7, 0 }
 0x1ab   : > { %898 = vadd.xlane.f32.xlu0 %v897_v5  ;;  %v5205_v11 = vpack.c.bf16 %v923_v10, %v922_v9  ;;  %v926_v14 = vld [vmem:[%s7383_s0 + $0x30] sm:$0xff]  ;;  %v5209_v15 = vpack.c.bf16 %v925_v13, %v924_v12  ;;  %v927_v16 = vld [vmem:[%s7383_s0 + $0x38] sm:$0xff]  ;;  %s888_s11 = scalar_lea.vmem %s7384_s4, %s887_s15  ;;  %v6767_v62 = vld [vmem:[#allocation8] sm:$0x1]  ;;  %s7385_s4 = sld [smem:[#allocation45_spill]] }
 0x1ac   : > { %5202 = vmatprep.subr.bf16.mxu0 %v5201_v8  ;;  %v5213_v17 = vpack.c.bf16 %v927_v16, %v926_v14  ;;  %5224 = vmatpush3.bf16.msra.mxu1 %v5221_v41  ;;  %v1109_v57 = vld [vmem:[%s888_s11] sm:$0x1]  ;;  %v1296_v3 = vld [vmem:[%s7289_s8 + $0x18] sm:$0xff]  ;;  %v4468_v6 = vld [vmem:[%s7291_s10 + $0x28] sm:$0xff]  ;;  %s7391_s15 = sld [smem:[#allocation49_spill]]  ;;  %s6167_s16 = smov [#allocation22]  }
 0x1ad   : > { %5204 = vmatpush3.bf16.msra.mxu0 %v5201_v8  ;;  %5225 = vmatprep.subr.bf16.mxu1 %v6163_v42  ;;  %v1293_v63 = vld [vmem:[%s7289_s8] sm:$0xff]  ;;  %v5235_v4 = vpack.c.bf16 %v1296_v3, %v1295_v2  ;;  %v4469_v8 = vld [vmem:[%s7291_s10 + $0x30] sm:$0xff]  ;;  %v4470_v9 = vld [vmem:[%s7291_s10 + $0x38] sm:$0xff]  ;;  %s6055_s9 = sshll.u32 %s6167_s16, 4  ;;  %s6056_s9 = int_to_ptr.vmem [resolvable:$false] %s6055_s9 }
 0x1ae   : > { %5206 = vmatprep.subr.bf16.mxu0 %v5205_v11  ;;  %v4467_v5 = vld [vmem:[%s7291_s10 + $0x20] sm:$0xff]  ;;  %v6804_v10 = vpack.c.bf16 %v4470_v9, %v4469_v8  ;;  %v1217_v52 = vld [vmem:[#allocation17] sm:$0xff]  ;;  %v1233_v56 = vld [vmem:[#allocation17 + $0x68] sm:$0xff]  ;;  %p6058_p4 = scmp.lt.s32.totalorder %s7230_s27, %s6056_s9 }
 0x1af   : > { %v6794_v7 = vpack.c.bf16 %v4468_v6, %v4467_v5  ;;  %v1114_v13 = vld [vmem:[#allocation11] sm:$0x1]  ;;  %v1239_v40 = vld [vmem:[#allocation17 + $0x90] sm:$0xff]  ;;  %v1232_v55 = vld [vmem:[#allocation17 + $0x60] sm:$0xff] }
 0x1b0   : > { %v1266_v20 = vld [vmem:[%s7291_s10] sm:$0xff]  ;;  %v6862_v59 = vpack.c.bf16 %v1233_v56, %v1232_v55  ;;  %v1228_v5 = vld [vmem:[#allocation17 + $0x48] sm:$0xff]  ;;  %v1242_v8 = vld [vmem:[#allocation17 + $0xa0] sm:$0xff] }
 0x1b1   : > { %5208 = vmatpush3.bf16.msra.mxu0 %v5205_v11  ;;  %v1225_v39 = vld [vmem:[#allocation17 + $0x38] sm:$0xff]  ;;  %v1219_v60 = vld [vmem:[#allocation17 + $0x10] sm:$0xff]  ;;  %v1243_v9 = vld [vmem:[#allocation17 + $0xa8] sm:$0xff] }
 0x1b2   : > { %5210 = vmatprep.subr.bf16.mxu0 %v5209_v15  ;;  %v1240_v41 = vld [vmem:[#allocation17 + $0x98] sm:$0xff]  ;;  %vm7017_vm8 = vmpackc.low %vm1027_vm6, %vm1027_vm6 }
 0x1b3   : > { %v4508_v56 = vld [vmem:[%s7289_s8 + $0x20] sm:$0xff] }
 0x1b5   : > { %5212 = vmatpush3.bf16.msra.mxu0 %v5209_v15 }
 0x1b6   : > { %5214 = vmatprep.subr.bf16.mxu0 %v5213_v17 }
 0x1b9   : > { %5216 = vmatpush3.bf16.msra.mxu0 %v5213_v17 }
 0x1ba   : > { %5231 = vmatprep.subr.bf16.mxu0 %v6163_v42 }
 0x234   : > { %v896_v21 = vpop.xlane.xlu0 %895 }
 0x235   : > { %5685 = vrsqrt.f32 %v896_v21  ;;  %vm902_vm1 = vcmp.eq.f32.partialorder %v896_v21, inf  ;;  %v905_v25 = vand.u32 2147483648, %v896_v21  ;;  %vm904_vm2 = vcmp.eq.f32.partialorder %v896_v21, 0.0 }
 0x238   : > { %v899_v22 = vpop.xlane.xlu0 %898 }
 0x239   : > { %5687 = vrsqrt.f32 %v899_v22  ;;  %vm909_vm3 = vcmp.eq.f32.partialorder %v899_v22, inf  ;;  %v912_v31 = vand.u32 2147483648, %v899_v22  ;;  %vm911_vm4 = vcmp.eq.f32.partialorder %v899_v22, 0.0 }
 0x23f   : > { %v5686_v23 = vpop.eup %5685 }
 0x240   : > { %v901_v24 = vmul.f32 %v5686_v23, %v896_v21 }
 0x242   : > { %v903_v26 = vsel %vm902_vm1, %v896_v21, %v901_v24  ;;  %v1267_v21 = vld [vmem:[%s7291_s10 + $0x8] sm:$0xff] }
 0x243   : > { %v5688_v27 = vpop.eup %5687  ;;  %v906_v28 = vsel %vm904_vm2, %v905_v25, %v903_v26  ;;  %v6819_v24 = vpack.c.bf16 %v1267_v21, %v1266_v20  ;;  %v1268_v25 = vld [vmem:[%s7291_s10 + $0x10] sm:$0xff]  ;;  %v1269_v26 = vld [vmem:[%s7291_s10 + $0x18] sm:$0xff]  ;;  %v1245_v20 = vld [vmem:[#allocation17 + $0xb8] sm:$0xff] }
 0x244   : > { %v908_v29 = vmul.f32 %v5688_v27, %v899_v22  ;;  %v914_v30 = vmax.f32 %v906_v28, 1e-12  ;;  %v6832_v28 = vpack.c.bf16 %v1269_v26, %v1268_v25  ;;  %v1253_v25 = vld [vmem:[#allocation17 + $0xe8] sm:$0xff] }
 0x246   : > { %v910_v32 = vsel %vm909_vm3, %v899_v22, %v908_v29  ;;  %5689 = vrcp.f32 %v914_v30  ;;  %v1222_v29 = vld [vmem:[#allocation17 + $0x20] sm:$0xff]  ;;  %v1223_v30 = vld [vmem:[#allocation17 + $0x28] sm:$0xff] }
 0x247   : > { %v913_v33 = vsel %vm911_vm4, %v912_v31, %v910_v32  ;;  %v1237_v31 = vld [vmem:[#allocation17 + $0x80] sm:$0xff]  ;;  %v6838_v32 = vpack.c.bf16 %v1223_v30, %v1222_v29  ;;  %v1254_v30 = vld [vmem:[#allocation17 + $0xf0] sm:$0xff] }
 0x248   : > { %v915_v34 = vmax.f32 %v913_v33, 1e-12  ;;  %v1238_v33 = vld [vmem:[#allocation17 + $0x88] sm:$0xff] }
 0x24a   : > { %5691 = vrcp.f32 %v915_v34  ;;  %v6840_v34 = vpack.c.bf16 %v1238_v33, %v1237_v31  ;;  %v1255_v31 = vld [vmem:[#allocation17 + $0xf8] sm:$0xff] }
 0x250   : > { %v5690_v35 = vpop.eup %5689 }
 0x251   : > { %v918_v36 = vmul.f32 %v5690_v35, %v889_v0  ;;  %v1294_v0 = vld [vmem:[%s7289_s8 + $0x8] sm:$0xff]  ;;  %v1194_v35 = vlaneseq }
 0x253   : > { %4796 = vmatprep.mubr.msk.f32.mxu0 %vm893_vm0, %v918_v36  ;;  %v1195_v36 = vshrl.u32 %v1194_v35, 7 }
 0x254   : > { %v5692_v37 = vpop.eup %5691 }
 0x255   : > { %v919_v38 = vmul.f32 %v5692_v37, %v890_v1  ;;  %v5232_v1 = vpack.c.bf16 %v1294_v0, %v1293_v63  ;;  %v1297_v37 = vld [vmem:[#allocation13] sm:$0x1]  ;;  %v1234_v63 = vld [vmem:[#allocation17 + $0x70] sm:$0xff] }
 0x256   : > { %v1235_v0 = vld [vmem:[#allocation17 + $0x78] sm:$0xff] }
 0x257   : > { %4797 = vmatmul.mubr.msk.f32.vlgmr.msra.gmra.mrb[0].mxu0 %vm893_vm0, %v919_v38  ;;  %v1224_v38 = vld [vmem:[#allocation17 + $0x30] sm:$0xff]  ;;  %v6879_v3 = vpack.c.bf16 %v1235_v0, %v1234_v63  ;;  %v4510_v63 = vld [vmem:[%s7289_s8 + $0x30] sm:$0xff] }
 0x258   : > { %4829 = vmatprep.mubr.msk.f32.mxu0 %vm6164_vm5, %v6165_v43  ;;  %5233 = vmatpush3.bf16.msra.mxu0 %v5232_v1  ;;  %v6871_v1 = vld [vmem:[%s7385_s4] sm:$0x1]  ;;  %v4511_v0 = vld [vmem:[%s7289_s8 + $0x38] sm:$0xff]  ;;  %s7387_s4 = sld [smem:[#allocation41_spill]] }
 0x259   : > { %5234 = vmatprep.subr.bf16.mxu0 %v6163_v42 }
 0x25c   : > { %5236 = vmatpush3.bf16.msra.mxu0 %v5235_v4  ;;  %v1227_v4 = vld [vmem:[#allocation17 + $0x40] sm:$0xff] }
 0x25d   : > { %5243 = vmatprep.subr.bf16.mxu0 %v6163_v42 }
 0x32a   : > { %v4798_v47 = vpop.f32.mrb[0].mxu0 }
 0x32b   : > { %v1007_v48 = vpop.f32.mrb[1].mxu0  ;;  %v6743_v51 = vadd.f32 %v4798_v47, %v4457_v44 }
 0x32c   : > { %v6741_v49 = vadd.f32 %v4457_v44, %v1007_v48  ;;  %v6844_v44 = vsub.s32 0, %v1195_v36  ;;  %v6846_v48 = vpack.c.bf16 %v1225_v39, %v1224_v38  ;;  %v6934_v36 = vpack.c.bf16 %v1255_v31, %v1254_v30  ;;  %v1248_v38 = vld [vmem:[#allocation17 + $0xc8] sm:$0xff]  ;;  %v1249_v39 = vld [vmem:[#allocation17 + $0xd0] sm:$0xff] }
 0x32e   : > { %4807 = vmatprep.mubr.msk.f32.mxu1 %vm1027_vm6, %v6741_v49  ;;  %v6852_v53 = vrot.slane %v6767_v62, %v6844_v44 }
 0x32f   : > { %4808 = vmatmul.mubr.msk.f32.vlgmr.msra.gmra.mrb[0].mxu1 %vm1027_vm6, %v6743_v51 }
 0x330   : > { %5227 = vmatpush3.bf16.msra.mxu1 %v5226_v50  ;;  %4818 = vmatprep.mubr.msk.f32.mxu1 %vm6164_vm5, %v6165_v43  ;;  %v6848_v50 = vpack.c.bf16 %v1240_v41, %v1239_v40  ;;  %v1250_v40 = vld [vmem:[#allocation17 + $0xd8] sm:$0xff] }
 0x331   : > { %5228 = vmatprep.subr.bf16.mxu1 %v6163_v42  ;;  %v6946_v41 = vpack.c.bf16 %v1250_v40, %v1249_v39  ;;  %v7030_v40 = vld [vmem:[%s7387_s4 + $0x1] sm:$0x1] }
 0x334   : > { %5230 = vmatpush3.bf16.msra.mxu1 %v5229_v54  ;;  %v1218_v54 = vld [vmem:[#allocation17 + $0x8] sm:$0xff] }
 0x335   : > { %5237 = vmatprep.subr.bf16.mxu1 %v6163_v42 }
 0x337   : > { %4819 = vmatmul.mubr.msk.f32.vlgmr.msra.gmra.mrb[2].mxu1 %vm1027_vm6, %v1109_v57  ;;  %v6860_v57 = vpack.c.bf16 %v1218_v54, %v1217_v52  ;;  %v1259_v52 = vld [vmem:[#allocation17 + $0x110] sm:$0xff]  ;;  %v1260_v54 = vld [vmem:[#allocation17 + $0x118] sm:$0xff] }
 0x338   : > { %5239 = vmatpush3.bf16.msra.mxu1 %v6756_v58  ;;  %4840 = vmatprep.mubr.msk.f32.mxu1 %vm6164_vm5, %v6165_v43  ;;  %v6958_v55 = vpack.c.bf16 %v1260_v54, %v1259_v52 }
 0x339   : > { %5240 = vmatprep.subr.bf16.mxu1 %v6163_v42 }
 0x33c   : > { %5242 = vmatpush3.bf16.msra.mxu1 %v6761_v61 }
 0x33d   : > { %5249 = vmatprep.subr.bf16.mxu1 %v6163_v42 }
 0x33f   : > { %4841 = vmatmul.mubr.msk.f32.vlgmr.msra.gmra.mrb[4].mxu1 %vm1027_vm6, %v6767_v62  ;;  %v1220_v62 = vld [vmem:[#allocation17 + $0x18] sm:$0xff] }
 0x340   : > { %4862 = vmatprep.mubr.msk.f32.mxu1 %vm6164_vm5, %v6165_v43  ;;  %5251 = vmatpush3.bf16.msra.mxu1 %v6794_v7  ;;  %v6877_v2 = vpack.c.bf16 %v1220_v62, %v1219_v60  ;;  %v4509_v60 = vld [vmem:[%s7289_s8 + $0x28] sm:$0xff] }
 0x341   : > { %5252 = vmatprep.subr.bf16.mxu1 %v6163_v42  ;;  %v5354_v62 = vpack.c.bf16 %v4509_v60, %v4508_v56 }
 0x344   : > { %5254 = vmatpush3.bf16.msra.mxu1 %v6804_v10 }
 0x345   : > { %5280 = vmatprep.subr.bf16.mxu1 %v6840_v34 }
 0x402   : > { %v6807_v11 = vpop.f32.mrb[0].mxu1 }
 0x403   : > { %v6809_v12 = vpop.f32.mrb[1].mxu1 }
 0x40a   : > { %v1184_v14 = vpop.f32.mrb[2].mxu1 }
 0x40b   : > { %v1185_v15 = vadd.f32 %v1184_v14, %v1114_v13  ;;  %v4820_v16 = vpop.f32.mrb[3].mxu1  ;;  %v6893_v13 = vpack.c.bf16 %v1228_v5, %v1227_v4  ;;  %v4460_v14 = vld [vmem:[%s7386_s13] ss:$0 sm:$0xff]  ;;  %v5357_v4 = vpack.c.bf16 %v4511_v0, %v4510_v63  ;;  %s7388_s13 = sld [smem:[#allocation47_spill]] }
 0x40c   : > { %v6905_v21 = vadd.f32 %v4460_v14, %v6809_v12  ;;  %v6927_v33 = vadd.f32 %v6807_v11, %v4460_v14  ;;  %v4557_v5 = vld [vmem:[%s778_s22] ss:$0 sm:$0xff]  ;;  %s4556_s22 = sshll.u32 %s6306_s23, 8  ;;  %s6051_s23 = scalar_lea.vmem %s7230_s27, 256 }
 0x40d   : > { %v1189_v17 = vmul.f32 1.442695, %v1185_v15  ;;  %vm1188_vm7 = vcmp.gt.f32.partialorder %v1185_v15, 0.0  ;;  %1199 = vbcast.lane.b32.xlu1 %v4557_v5, 256  ;;  %s7235_s1 = scalar_lea.hbm %s7393_s18, %s4556_s22  ;;  %p6052_p6 = scmp.ne.s32.totalorder %s7230_s27, %s6051_s23 }
 0x40f   : > { %5693 = vpow2.f32 %v1189_v17  ;;  %v1229_v17 = vld [vmem:[#allocation17 + $0x50] sm:$0xff]  ;;  %p6053_p8 = pnand %p6052_p6, %p7394_p12 }
 0x411   : > { %1203 = vbcast.lane.b32.xlu1 %v4557_v5, 264  ;;  %p6054_p9 = pneg %p6053_p8 }
 0x412   : > { %v6811_v18 = vpop.f32.mrb[4].mxu1 }
 0x413   : > { %v4842_v19 = vpop.f32.mrb[5].mxu1  ;;  %v1442_v6 = vadd.f32 %v6811_v18, %v6871_v1  ;;  %v1230_v18 = vld [vmem:[#allocation17 + $0x58] sm:$0xff] }
 0x414   : > { %v1244_v19 = vld [vmem:[#allocation17 + $0xb0] sm:$0xff] }
 0x415   : > { %v1452_v16 = vrot.slane %v1442_v6, %v6844_v44  ;;  %v6915_v29 = vpack.c.bf16 %v1245_v20, %v1244_v19 }
 0x417   : > { %v1596_v26 = vmul.f32 %v1452_v16, %v6905_v21  ;;  %v1597_v35 = vmul.f32 %v1452_v16, %v6927_v33  ;;  %v7008_v16 = vld [vmem:[%s7388_s13 + $0x1] ss:$0 sm:$0xff] }
 0x419   : > { %v5694_v22 = vpop.eup %5693 }
 0x41a   : > { %v4464_v23 = vadd.f32 -1.0, %v5694_v22  ;;  %v6910_v22 = vpack.c.bf16 %v1230_v18, %v1229_v17 }
 0x41c   : > { %v6827_v27 = vsel %vm1188_vm7, %v1185_v15, %v4464_v23  ;;  %v6900_v15 = vpack.c.bf16 %v1243_v9, %v1242_v8  ;;  %v1252_v23 = vld [vmem:[#allocation17 + $0xe0] sm:$0xff] }
 0x41d   : > { %4830 = vmatmul.mubr.msk.f32.vlgmr.msra.gmra.mrb[2].mxu0 %vm1027_vm6, %v6827_v27  ;;  %v6922_v12 = vpack.c.bf16 %v1253_v25, %v1252_v23 }
 0x41e   : > { %5245 = vmatpush3.bf16.msra.mxu0 %v6819_v24  ;;  %4851 = vmatprep.mubr.msk.f32.mxu0 %vm6164_vm5, %v6165_v43 }
 0x41f   : > { %5246 = vmatprep.subr.bf16.mxu0 %v6163_v42 }
 0x422   : > { %5248 = vmatpush3.bf16.msra.mxu0 %v6832_v28 }
 0x423   : > { %5256 = vmatprep.subr.bf16.mxu0 %v6838_v32 }
 0x4f0   : > { %v1367_v45 = vpop.f32.mrb[2].mxu0 }
 0x4f1   : > { %v1368_v46 = vadd.f32 %v1367_v45, %v1297_v37  ;;  %v4831_v47 = vpop.f32.mrb[3].mxu0  ;;  %v1247_v37 = vld [vmem:[#allocation17 + $0xc0] sm:$0xff] }
 0x4f2   : > { %v6942_v11 = vpack.c.bf16 %v1248_v38, %v1247_v37  ;;  %v1257_v45 = vld [vmem:[#allocation17 + $0x100] sm:$0xff] }
 0x4f3   : > { %4852 = vmatmul.mubr.msk.f32.vlgmr.msra.gmra.mrb[4].mxu0 %vm1027_vm6, %v1368_v46  ;;  %4863 = vmatmul.mubr.msk.f32.vlgmr.msra.gmra.mrb[6].mxu1 %vm1027_vm6, %v1368_v46  ;;  %v1258_v46 = vld [vmem:[#allocation17 + $0x108] sm:$0xff] }
 0x4f4   : > { %5258 = vmatpush3.bf16.msra.mxu0 %v6838_v32  ;;  %5282 = vmatpush3.bf16.msra.mxu1 %v6840_v34  ;;  %v6954_v47 = vpack.c.bf16 %v1258_v46, %v1257_v45  ;;  %v7036_v46 = vld [vmem:[%s7388_s13 + $0x2] ss:$0 sm:$0xff] }
 0x4f5   : > { %5260 = vmatprep.subr.bf16.mxu0 %v6846_v48  ;;  %5284 = vmatprep.subr.bf16.mxu1 %v6848_v50 }
 0x4f6   : > { %4873 = vmatprep.mubr.msk.f32.mxu0 %vm1027_vm6, %v6852_v53  ;;  %4906 = vmatprep.mubr.msk.f32.mxu1 %vm1027_vm6, %v6852_v53 }
 0x4f8   : > { %5262 = vmatpush3.bf16.msra.mxu0 %v6846_v48  ;;  %5286 = vmatpush3.bf16.msra.mxu1 %v6848_v50 }
 0x4f9   : > { %5264 = vmatprep.subr.bf16.mxu0 %v6860_v57  ;;  %5288 = vmatprep.subr.bf16.mxu1 %v6862_v59 }
 0x4fb   : > { %4874 = vmatmul.mubr.msk.f32.vlgmr.msra.gmra.mrb[6].mxu0 %vm1027_vm6, %v6852_v53  ;;  %4907 = vmatmul.mubr.msk.f32.vlgmr.msra.gmra.mrb[8].mxu1 %vm1027_vm6, %v6852_v53 }
 0x4fc   : > { %5266 = vmatpush3.bf16.msra.mxu0 %v6860_v57  ;;  %4884 = vmatprep.mubr.msk.f32.mxu0 %vm1027_vm6, %v6741_v49 }
 0x4fd   : > { %5290 = vmatpush3.bf16.msra.mxu1 %v6862_v59  ;;  %4917 = vmatprep.mubr.msk.f32.mxu1 %vm1027_vm6, %v6741_v49 }
 0x4fe   : > { %5268 = vmatprep.subr.bf16.mxu0 %v6877_v2  ;;  %5292 = vmatprep.subr.bf16.mxu1 %v6879_v3 }
 0x500   : > { %5270 = vmatpush3.bf16.msra.mxu0 %v6877_v2 }
 0x501   : > { %5294 = vmatpush3.bf16.msra.mxu1 %v6879_v3  ;;  %5272 = vmatprep.subr.bf16.mxu0 %v6893_v13 }
 0x502   : > { %5296 = vmatprep.subr.bf16.mxu1 %v6900_v15 }
 0x503   : > { %4885 = vmatmul.mubr.msk.f32.vlgmr.msra.gmra.mrb[6].mxu0 %vm1027_vm6, %v6743_v51 }
 0x504   : > { %4918 = vmatmul.mubr.msk.f32.vlgmr.msra.gmra.mrb[8].mxu1 %vm1027_vm6, %v6743_v51  ;;  %5274 = vmatpush3.bf16.msra.mxu0 %v6893_v13 }
 0x505   : > { %4895 = vmatprep.mubr.msk.f32.mxu0 %vm1027_vm6, %v1596_v26  ;;  %5298 = vmatpush3.bf16.msra.mxu1 %v6900_v15 }
 0x506   : > { %4928 = vmatprep.mubr.msk.f32.mxu1 %vm1027_vm6, %v1596_v26  ;;  %5276 = vmatprep.subr.bf16.mxu0 %v6910_v22 }
 0x507   : > { %5300 = vmatprep.subr.bf16.mxu1 %v6915_v29 }
 0x508   : > { %5278 = vmatpush3.bf16.msra.mxu0 %v6910_v22 }
 0x509   : > { %5302 = vmatpush3.bf16.msra.mxu1 %v6915_v29  ;;  %5304 = vmatprep.subr.bf16.mxu0 %v6922_v12 }
 0x50b   : > { %4896 = vmatmul.mubr.msk.f32.vlgmr.msra.gmra.mrb[6].mxu0 %vm1027_vm6, %v1597_v35 }
 0x50c   : > { %4929 = vmatmul.mubr.msk.f32.vlgmr.msra.gmra.mrb[8].mxu1 %vm1027_vm6, %v1597_v35  ;;  %5306 = vmatpush3.bf16.msra.mxu0 %v6922_v12 }
 0x50d   : > { %5308 = vmatprep.subr.bf16.mxu0 %v6934_v36  ;;  %4939 = vmatprep.mubr.msk.f32.mxu0 %vm1027_vm6, %v6852_v53 }
 0x510   : > { %5310 = vmatpush3.bf16.msra.mxu0 %v6934_v36 }
 0x511   : > { %5312 = vmatprep.subr.bf16.mxu0 %v6942_v11 }
 0x513   : > { %4940 = vmatmul.mubr.msk.f32.vlgmr.msra.gmra.mrb[8].mxu0 %vm1027_vm6, %v6852_v53 }
 0x514   : > { %5314 = vmatpush3.bf16.msra.mxu0 %v6942_v11  ;;  %4950 = vmatprep.mubr.msk.f32.mxu0 %vm1027_vm6, %v6741_v49 }
 0x515   : > { %5316 = vmatprep.subr.bf16.mxu0 %v6946_v41 }
 0x518   : > { %5318 = vmatpush3.bf16.msra.mxu0 %v6946_v41 }
 0x519   : > { %5320 = vmatprep.subr.bf16.mxu0 %v6954_v47 }
 0x51b   : > { %4951 = vmatmul.mubr.msk.f32.vlgmr.msra.gmra.mrb[8].mxu0 %vm1027_vm6, %v6743_v51 }
 0x51c   : > { %5322 = vmatpush3.bf16.msra.mxu0 %v6954_v47  ;;  %4961 = vmatprep.mubr.msk.f32.mxu0 %vm1027_vm6, %v1596_v26 }
 0x51d   : > { %5324 = vmatprep.subr.bf16.mxu0 %v6958_v55 }
 0x520   : > { %5326 = vmatpush3.bf16.msra.mxu0 %v6958_v55 }
 0x521   : > { %5353 = vmatprep.subr.bf16.mxu0 %v6163_v42 }
 0x523   : > { %4962 = vmatmul.mubr.msk.f32.vlgmr.msra.gmra.mrb[8].mxu0 %vm1027_vm6, %v1597_v35 }
 0x524   : > { %5355 = vmatpush3.bf16.msra.mxu0 %v5354_v62  ;;  %5008 = vmatprep.mubr.msk.f32.mxu0 %vm6164_vm5, %v6165_v43 }
 0x525   : > { %5356 = vmatprep.subr.bf16.mxu0 %v6163_v42 }
 0x528   : > { %5358 = vmatpush3.bf16.msra.mxu0 %v5357_v4 }
 0x529   : > { %5367 = vmatprep.subr.bf16.mxu0 %v6163_v42 }
 0x52b   : > { %5009 = vmatmul.mubr.msk.f32.vlgmr.msra.gmra.mrb[10].mxu0 %vm1027_vm6, %v6827_v27 }
 0x52c   : > { %5369 = vmatpush3.bf16.msra.mxu0 %v6819_v24  ;;  %5030 = vmatprep.mubr.msk.f32.mxu0 %vm6164_vm5, %v6165_v43  ;;  %v6997_v24 = vld [vmem:[%s7387_s4] sm:$0x1] }
 0x52d   : > { %5370 = vmatprep.subr.bf16.mxu0 %v6163_v42 }
 0x530   : > { %5372 = vmatpush3.bf16.msra.mxu0 %v6832_v28  ;;  %v7003_v28 = vld [vmem:[%s7388_s13] ss:$0 sm:$0xff] }
 0x531   : > { %5380 = vmatprep.subr.bf16.mxu0 %v6838_v32 }
 0x5c6   : > { %v1522_v6 = vpop.f32.mrb[4].mxu0  ;;  %v1592_v8 = vpop.f32.mrb[6].mxu1 }
 0x5c7   : > { %v4853_v9 = vpop.f32.mrb[5].mxu0  ;;  %v4864_v14 = vpop.f32.mrb[7].mxu1  ;;  %v1523_v27 = vadd.f32 %v1522_v6, %v6997_v24  ;;  %v1593_v45 = vadd.f32 %v7030_v40, %v1592_v8  ;;  %v2684_v6 = vld [vmem:[#allocation13 + $0x1] sm:$0x1] }
 0x5c9   : > { %v2314_v20 = vrot.slane %v1523_v27, %v6844_v44  ;;  %v2320_v54 = vrot.slane %v1593_v45, %v6844_v44  ;;  %v1200_v27 = vpop.permute.xlu1 %1199 }
 0x5de   : > { %v4897_v17 = vpop.f32.mrb[6].mxu0 }
 0x5df   : > { %v4930_v18 = vpop.f32.mrb[8].mxu1  ;;  %v1822_v19 = vpop.f32.mrb[7].mxu0  ;;  %v1840_v39 = vadd.f32 %v4897_v17, %v7003_v28 }
 0x5e0   : > { %v2075_v23 = vadd.f32 %v4930_v18, %v7008_v16  ;;  %v1839_v25 = vadd.f32 %v7003_v28, %v1822_v19  ;;  %v2057_v26 = vpop.f32.mrb[9].mxu1  ;;  %v1204_v17 = vpop.permute.xlu1 %1203  ;;  %v1211_v19 = vmul.f32 %v4557_v5, %v1200_v27 }
 0x5e1   : > { %v2074_v30 = vadd.f32 %v7008_v16, %v2057_v26  ;;  %v1212_v18 = vmul.f32 %v4557_v5, %v1204_v17 }
 0x5e2   : > { %v2316_v31 = vmul.f32 %v2314_v20, %v2075_v23  ;;  %4968 = vmatprep.mubr.msk.f32.mxu1 %vm1027_vm6, %v1839_v25  ;;  %vm1213_vm10 = vcmp.gt.f32.partialorder %v1211_v19, 0.5 }
 0x5e3   : > { %v2315_v35 = vmul.f32 %v2314_v20, %v2074_v30  ;;  %vm1214_vm9 = vcmp.gt.f32.partialorder %v1212_v18, 0.5  ;;  %v6166_v20 = vmov -1e+30  }
 0x5e4   : > { %v7049_v23 = vsel %vm1214_vm9, 0.0, %v6166_v20  ;;  %v7051_v25 = vsel %vm1213_vm10, 0.0, %v6166_v20  ;;  %v1290_v20 = vld [vmem:[#allocation19 + $0x30] sm:$0xff] }
 0x5e5   : > { %v5327_v38 = vpack.c.bf16 %v2316_v31, %v2315_v35 }
 0x5e7   : > { %5329 = vmatprep.subr.msk.bf16.mxu1 %vm7017_vm8, %v5327_v38 }
 0x5e8   : > { %5332 = vmatpush3.bf16.xpose.msk.msra.mxu1 %vm7017_vm8, %v5327_v38 }
 0x5ef   : > { %4969 = vmatmul.mubr.msk.f32.vlgmr.msra.gmra.mrb[10].mxu1 %vm1027_vm6, %v1840_v39 }
 0x5f6   : > { %v4963_v52 = vpop.f32.mrb[8].mxu0 }
 0x5f7   : > { %v2310_v56 = vadd.f32 %v4963_v52, %v7036_v46  ;;  %v2292_v60 = vpop.f32.mrb[9].mxu0 }
 0x5f8   : > { %v2309_v62 = vadd.f32 %v7036_v46, %v2292_v60 }
 0x5f9   : > { %v2322_v63 = vmul.f32 %v2320_v54, %v2310_v56 }
 0x5fa   : > { %v2321_v0 = vmul.f32 %v2320_v54, %v2309_v62 }
 0x5fc   : > { %v5333_v4 = vpack.c.bf16 %v2322_v63, %v2321_v0 }
 0x5fe   : > { %5334 = vmatprep.subr.bf16.mxu1 %v5333_v4  ;;  %v2751_v9 = vpop.f32.mrb[10].mxu0 }
 0x5ff   : > { %v7041_v8 = vadd.f32 %v2751_v9, %v2684_v6  ;;  %5336 = vmatpush3.bf16.msra.mxu1 %v5333_v4  ;;  %v5010_v14 = vpop.f32.mrb[11].mxu0  ;;  %v1288_v6 = vld [vmem:[#allocation19 + $0x20] sm:$0xff]  ;;  %v1289_v9 = vld [vmem:[#allocation19 + $0x28] sm:$0xff] }
 0x600   : > { %v7061_v14 = vpack.c.bf16 %v1289_v9, %v1288_v6 }
 0x601   : > { %5031 = vmatmul.mubr.msk.f32.vlgmr.msra.gmra.mrb[12].mxu0 %vm1027_vm6, %v7041_v8 }
 0x602   : > { %5382 = vmatpush3.bf16.msra.mxu0 %v6838_v32  ;;  %5338 = vmatprep.subr.bf16.mxu1 %v7061_v14 }
 0x603   : > { %5384 = vmatprep.subr.bf16.mxu0 %v6846_v48 }
 0x606   : > { %5386 = vmatpush3.bf16.msra.mxu0 %v6846_v48 }
 0x607   : > { %5388 = vmatprep.subr.bf16.mxu0 %v6860_v57 }
 0x6c2   : > { %v4970_v26 = vpop.f32.mrb[10].mxu1 }
 0x6c3   : > { %v2407_v32 = vadd.f32 %v4970_v26, %v7049_v23  ;;  %v2401_v30 = vpop.f32.mrb[11].mxu1  ;;  %v1291_v26 = vld [vmem:[#allocation19 + $0x38] sm:$0xff] }
 0x6c4   : > { %v2402_v48 = vadd.f32 %v2401_v30, %v7051_v25 }
 0x6c5   : > { %v2414_v31 = vsel %vm2410_vm11, %v2407_v32, -inf }
 0x6c6   : > { %2415 = vmax.xlane.f32.xlu1 %v2414_v31  ;;  %v2411_v35 = vsel %vm2410_vm11, %v2402_v48, -inf  ;;  %v1283_v31 = vld [vmem:[#allocation19] sm:$0xff] }
 0x6c7   : > { %2412 = vmax.xlane.f32.xlu0 %v2411_v35  ;;  %v1284_v35 = vld [vmem:[#allocation19 + $0x8] sm:$0xff] }
 0x6d4   : > { %v7057_v5 = vpop.f32.mrb[12].mxu0 }
 0x6d5   : > { %v5032_v38 = vpop.f32.mrb[13].mxu0 }
 0x6d6   : > { %v7071_v38 = vpack.c.bf16 %v1284_v35, %v1283_v31 }
 0x753   : > { %v2416_v39 = vpop.xlane.xlu1 %2415 }
 0x754   : > { %v2418_v45 = vsub.f32 %v2407_v32, %v2416_v39  ;;  %v2413_v52 = vpop.xlane.xlu0 %2412  ;;  %v1285_v39 = vld [vmem:[#allocation19 + $0x10] sm:$0xff] }
 0x755   : > { %v2417_v54 = vsub.f32 %v2402_v48, %v2413_v52  ;;  %v7065_v48 = vpack.c.bf16 %v1291_v26, %v1290_v20 }
 0x756   : > { %v2421_v56 = vmul.f32 1.442695, %v2418_v45  ;;  %v1286_v45 = vld [vmem:[#allocation19 + $0x18] sm:$0xff] }
 0x757   : > { %v2419_v60 = vmul.f32 1.442695, %v2417_v54 }
 0x759   : > { %5695 = vpow2.f32 %v2419_v60  ;;  %v7093_v60 = vld [vmem:[%s7391_s15] ss:$0 sm:$0xff]  ;;  %s6057_s15 = scalar_lea.vmem %s6056_s9, 512 }
 0x75a   : > { %5697 = vpow2.f32 %v2421_v56  ;;  %v7074_v56 = vpack.c.bf16 %v1286_v45, %v1285_v39  ;;  %p6059_p1 = scmp.lt.s32.totalorder %s6057_s15, %s6051_s23 }
 0x75c   : > { %p6060_p13 = por %p6059_p1, %p6058_p4 }
 0x75e   : > { %p6061_p0 = pnand %p6060_p13, %p6054_p9 }
 0x763   : > { %v5696_v62 = vpop.eup %5695 }
 0x764   : > { %v2423_v63 = vsel %vm2410_vm11, %v5696_v62, 0.0  ;;  %v5698_v0 = vpop.eup %5697 }
 0x765   : > { %2424 = vadd.xlane.f32.xlu0 %v2423_v63  ;;  %v2426_v4 = vsel %vm2410_vm11, %v5698_v0, 0.0 }
 0x769   : > { %2427 = vadd.xlane.f32.xlu0 %v2426_v4 }
 0x7f2   : > { %v2425_v27 = vpop.xlane.xlu0 %2424 }
 0x7f3   : > { %5699 = vrcp.f32 %v2425_v27 }
 0x7f6   : > { %v2428_v17 = vpop.xlane.xlu0 %2427 }
 0x7f7   : > { %5701 = vrcp.f32 %v2428_v17 }
 0x7fd   : > { %v5700_v18 = vpop.eup %5699 }
 0x7fe   : > { %v2431_v19 = vmul.f32 %v5700_v18, %v5696_v62 }
 0x800   : > { %4975 = vmatprep.mubr.msk.f32.mxu1 %vm2410_vm11, %v2431_v19 }
 0x801   : > { %v5702_v32 = vpop.eup %5701 }
 0x802   : > { %v2432_v30 = vmul.f32 %v5702_v32, %v5698_v0 }
 0x804   : > { %4976 = vmatmul.mubr.msk.f32.vlgmr.msra.gmra.mrb[12].mxu1 %vm2410_vm11, %v2432_v30 }
 0x805   : > { %5340 = vmatpush3.bf16.msra.mxu1 %v7061_v14 }
 0x806   : > { %5342 = vmatprep.subr.bf16.mxu1 %v7065_v48 }
 0x809   : > { %5344 = vmatpush3.bf16.msra.mxu1 %v7065_v48 }
 0x80a   : > { %5346 = vmatprep.subr.bf16.mxu1 %v7071_v38 }
 0x8d7   : > { %v4977_v52 = vpop.f32.mrb[12].mxu1 }
 0x8d8   : > { %v2505_v54 = vpop.f32.mrb[13].mxu1 }
 0x8d9   : > { %4986 = vmatprep.mubr.msk.f32.mxu1 %vm1027_vm6, %v2505_v54 }
 0x8da   : > { %4987 = vmatmul.mubr.msk.f32.vlgmr.msra.gmra.mrb[14].mxu1 %vm1027_vm6, %v4977_v52 }
 0x8db   : > { %5348 = vmatpush3.bf16.msra.mxu1 %v7071_v38  ;;  %4997 = vmatprep.mubr.msk.f32.mxu1 %vm1027_vm6, %v6852_v53 }
 0x8dc   : > { %5350 = vmatprep.subr.bf16.mxu1 %v7074_v56 }
 0x8df   : > { %5352 = vmatpush3.bf16.msra.mxu1 %v7074_v56 }
 0x8e0   : > { %5360 = vmatprep.subr.bf16.mxu1 %v6756_v58 }
 0x8e2   : > { %4998 = vmatmul.mubr.msk.f32.vlgmr.msra.gmra.mrb[14].mxu1 %vm1027_vm6, %v6852_v53 }
 0x8e3   : > { %5362 = vmatpush3.bf16.msra.mxu1 %v6756_v58 }
 0x8e4   : > { %5364 = vmatprep.subr.bf16.mxu1 %v6761_v61 }
 0x8e7   : > { %5366 = vmatpush3.bf16.msra.mxu1 %v6761_v61 }
 0x8e8   : > { %5373 = vmatprep.subr.bf16.mxu1 %v6163_v42 }
 0x9b5   : > { %v4999_v62 = vpop.f32.mrb[14].mxu1 }
 0x9b6   : > { %v2661_v63 = vpop.f32.mrb[15].mxu1  ;;  %v7099_v53 = vadd.f32 %v4999_v62, %v7093_v60  ;;  %v4045_v62 = vld [vmem:[#allocation20 + $0x20] sm:$0xff] }
 0x9b7   : > { %v7096_v0 = vadd.f32 %v7093_v60, %v2661_v63  ;;  %v4046_v63 = vld [vmem:[#allocation20 + $0x28] sm:$0xff] }
 0x9b9   : > { %5019 = vmatprep.mubr.msk.f32.mxu1 %vm1027_vm6, %v7096_v0  ;;  %5052 = vmatprep.mubr.msk.f32.mxu0 %vm1027_vm6, %v7096_v0 }
 0x9ba   : > { %5020 = vmatmul.mubr.msk.f32.vlgmr.msra.gmra.mrb[16].mxu1 %vm1027_vm6, %v7099_v53  ;;  %5053 = vmatmul.mubr.msk.f32.vlgmr.msra.gmra.mrb[14].mxu0 %vm1027_vm6, %v7099_v53 }
 0x9bb   : > { %5375 = vmatpush3.bf16.msra.mxu1 %v6794_v7  ;;  %5390 = vmatpush3.bf16.msra.mxu0 %v6860_v57 }
 0x9bc   : > { %5063 = vmatprep.mubr.msk.f32.mxu0 %vm1027_vm6, %v6741_v49  ;;  %5376 = vmatprep.subr.bf16.mxu1 %v6163_v42  ;;  %v2759_v42 = vrot.slane %v6871_v1, %v6844_v44 }
 0x9bd   : > { %5392 = vmatprep.subr.bf16.mxu0 %v6877_v2  ;;  %5041 = vmatprep.mubr.msk.f32.mxu1 %vm6164_vm5, %v6165_v43 }
 0x9bf   : > { %5378 = vmatpush3.bf16.msra.mxu1 %v6804_v10  ;;  %5394 = vmatpush3.bf16.msra.mxu0 %v6877_v2 }
 0x9c0   : > { %5404 = vmatprep.subr.bf16.mxu1 %v6840_v34  ;;  %5396 = vmatprep.subr.bf16.mxu0 %v6893_v13 }
 0x9c2   : > { %5042 = vmatmul.mubr.msk.f32.vlgmr.msra.gmra.mrb[18].mxu1 %vm1027_vm6, %v7041_v8  ;;  %5064 = vmatmul.mubr.msk.f32.vlgmr.msra.gmra.mrb[14].mxu0 %vm1027_vm6, %v6743_v51 }
 0x9c3   : > { %5406 = vmatpush3.bf16.msra.mxu1 %v6840_v34  ;;  %5085 = vmatprep.mubr.msk.f32.mxu1 %vm1027_vm6, %v7096_v0 }
 0x9c4   : > { %5408 = vmatprep.subr.bf16.mxu1 %v6848_v50  ;;  %5398 = vmatpush3.bf16.msra.mxu0 %v6893_v13 }
 0x9c5   : > { %5400 = vmatprep.subr.bf16.mxu0 %v6910_v22 }
 0x9c7   : > { %5410 = vmatpush3.bf16.msra.mxu1 %v6848_v50 }
 0x9c8   : > { %5412 = vmatprep.subr.bf16.mxu1 %v6862_v59  ;;  %5402 = vmatpush3.bf16.msra.mxu0 %v6910_v22 }
 0x9c9   : > { %5428 = vmatprep.subr.bf16.mxu0 %v6922_v12 }
 0x9ca   : > { %5086 = vmatmul.mubr.msk.f32.vlgmr.msra.gmra.mrb[20].mxu1 %vm1027_vm6, %v7099_v53 }
 0x9cb   : > { %5414 = vmatpush3.bf16.msra.mxu1 %v6862_v59  ;;  %5096 = vmatprep.mubr.msk.f32.mxu1 %vm1027_vm6, %v6741_v49  ;;  %v2912_v59 = vadd.f32 %v7057_v5, %v6997_v24 }
 0x9cc   : > { %5416 = vmatprep.subr.bf16.mxu1 %v6879_v3 }
 0x9cf   : > { %5418 = vmatpush3.bf16.msra.mxu1 %v6879_v3  ;;  %v3683_v3 = vrot.slane %v2912_v59, %v6844_v44 }
 0x9d0   : > { %5420 = vmatprep.subr.bf16.mxu1 %v6900_v15 }
 0x9d2   : > { %5097 = vmatmul.mubr.msk.f32.vlgmr.msra.gmra.mrb[20].mxu1 %vm1027_vm6, %v6743_v51 }
 0x9d3   : > { %5422 = vmatpush3.bf16.msra.mxu1 %v6900_v15 }
 0x9d4   : > { %5424 = vmatprep.subr.bf16.mxu1 %v6915_v29 }
 0x9d7   : > { %5426 = vmatpush3.bf16.msra.mxu1 %v6915_v29 }
 0xa8d   : > { %v5021_v43 = vpop.f32.mrb[16].mxu1 }
 0xa8e   : > { %v2839_v58 = vadd.f32 %v5021_v43, %v2759_v42  ;;  %v2833_v61 = vpop.f32.mrb[17].mxu1 }
 0xa8f   : > { %v2834_v7 = vadd.f32 %v2833_v61, %v2759_v42  ;;  %v5477_v42 = vpack.c.bf16 %v4046_v63, %v4045_v62 }
 0xa90   : > { %v2986_v34 = vmul.f32 %v2839_v58, %v6927_v33 }
 0xa91   : > { %v2985_v10 = vmul.f32 %v2834_v7, %v6905_v21  ;;  %v4040_v7 = vld [vmem:[#allocation20] sm:$0xff] }
 0xa93   : > { %5074 = vmatprep.mubr.msk.f32.mxu0 %vm1027_vm6, %v2985_v10  ;;  %5107 = vmatprep.mubr.msk.f32.mxu1 %vm1027_vm6, %v2985_v10 }
 0xa94   : > { %5075 = vmatmul.mubr.msk.f32.vlgmr.msra.gmra.mrb[14].mxu0 %vm1027_vm6, %v2986_v34  ;;  %5108 = vmatmul.mubr.msk.f32.vlgmr.msra.gmra.mrb[20].mxu1 %vm1027_vm6, %v2986_v34 }
 0xa95   : > { %v2981_v50 = vpop.f32.mrb[18].mxu1  ;;  %5430 = vmatpush3.bf16.msra.mxu0 %v6922_v12  ;;  %5118 = vmatprep.mubr.msk.f32.mxu0 %vm1027_vm6, %v7096_v0 }
 0xa96   : > { %v5043_v57 = vpop.f32.mrb[19].mxu1  ;;  %5432 = vmatprep.subr.bf16.mxu0 %v6934_v36 }
 0xa99   : > { %5434 = vmatpush3.bf16.msra.mxu0 %v6934_v36 }
 0xa9a   : > { %5436 = vmatprep.subr.bf16.mxu0 %v6942_v11 }
 0xa9c   : > { %5119 = vmatmul.mubr.msk.f32.vlgmr.msra.gmra.mrb[16].mxu0 %vm1027_vm6, %v7099_v53 }
 0xa9d   : > { %5438 = vmatpush3.bf16.msra.mxu0 %v6942_v11  ;;  %5129 = vmatprep.mubr.msk.f32.mxu0 %vm1027_vm6, %v6741_v49 }
 0xa9e   : > { %5440 = vmatprep.subr.bf16.mxu0 %v6946_v41 }
 0xaa1   : > { %5442 = vmatpush3.bf16.msra.mxu0 %v6946_v41  ;;  %v2982_v41 = vadd.f32 %v7030_v40, %v2981_v50  ;;  %v4042_v50 = vld [vmem:[#allocation20 + $0x10] sm:$0xff] }
 0xaa2   : > { %5444 = vmatprep.subr.bf16.mxu0 %v6954_v47 }
 0xaa4   : > { %5130 = vmatmul.mubr.msk.f32.vlgmr.msra.gmra.mrb[16].mxu0 %vm1027_vm6, %v6743_v51 }
 0xaa5   : > { %5446 = vmatpush3.bf16.msra.mxu0 %v6954_v47  ;;  %5140 = vmatprep.mubr.msk.f32.mxu0 %vm1027_vm6, %v2985_v10  ;;  %v4041_v10 = vld [vmem:[#allocation20 + $0x8] sm:$0xff] }
 0xaa6   : > { %5448 = vmatprep.subr.bf16.mxu0 %v6958_v55 }
 0xaa9   : > { %5450 = vmatpush3.bf16.msra.mxu0 %v6958_v55  ;;  %v3689_v55 = vrot.slane %v2982_v41, %v6844_v44 }
 0xaaa   : > { %5478 = vmatprep.subr.bf16.mxu0 %v5477_v42 }
 0xaac   : > { %5141 = vmatmul.mubr.msk.f32.vlgmr.msra.gmra.mrb[16].mxu0 %vm1027_vm6, %v2986_v34  ;;  %v5485_v34 = vpack.c.bf16 %v4041_v10, %v4040_v7 }
 0xaad   : > { %5480 = vmatpush3.bf16.msra.mxu0 %v5477_v42 }
 0xb67   : > { %v5076_v1 = vpop.f32.mrb[14].mxu0  ;;  %v5109_v2 = vpop.f32.mrb[20].mxu1 }
 0xb68   : > { %v3450_v13 = vadd.f32 %v5109_v2, %v7008_v16  ;;  %v3209_v15 = vpop.f32.mrb[15].mxu0  ;;  %v3438_v21 = vpop.f32.mrb[21].mxu1  ;;  %v3221_v11 = vadd.f32 %v5076_v1, %v7003_v28 }
 0xb69   : > { %v3220_v22 = vadd.f32 %v7003_v28, %v3209_v15  ;;  %v3449_v29 = vadd.f32 %v7008_v16, %v3438_v21 }
 0xb6a   : > { %v3685_v12 = vmul.f32 %v3683_v3, %v3450_v13 }
 0xb6b   : > { %v3684_v33 = vmul.f32 %v3683_v3, %v3449_v29  ;;  %5147 = vmatprep.mubr.msk.f32.mxu1 %vm1027_vm6, %v3220_v22 }
 0xb6d   : > { %v5451_v36 = vpack.c.bf16 %v3685_v12, %v3684_v33 }
 0xb6f   : > { %5453 = vmatprep.subr.msk.bf16.mxu1 %vm7017_vm8, %v5451_v36 }
 0xb70   : > { %5456 = vmatpush3.bf16.xpose.msk.msra.mxu1 %vm7017_vm8, %v5451_v36 }
 0xb77   : > { %5148 = vmatmul.mubr.msk.f32.vlgmr.msra.gmra.mrb[22].mxu1 %vm1027_vm6, %v3221_v11 }
 0xb7f   : > { %v5142_v47 = vpop.f32.mrb[16].mxu0 }
 0xb80   : > { %v3679_v24 = vadd.f32 %v5142_v47, %v7036_v46  ;;  %v3667_v16 = vpop.f32.mrb[17].mxu0 }
 0xb81   : > { %v3678_v8 = vadd.f32 %v7036_v46, %v3667_v16 }
 0xb82   : > { %v3691_v5 = vmul.f32 %v3689_v55, %v3679_v24 }
 0xb83   : > { %v3690_v4 = vmul.f32 %v3689_v55, %v3678_v8 }
 0xb85   : > { %v5457_v6 = vpack.c.bf16 %v3691_v5, %v3690_v4 }
 0xb87   : > { %5458 = vmatprep.subr.bf16.mxu1 %v5457_v6 }
 0xb88   : > { %5460 = vmatpush3.bf16.msra.mxu1 %v5457_v6 }
 0xb89   : > { %5462 = vmatprep.subr.bf16.mxu1 %v7061_v14 }
 0xc4a   : > { %v5149_v28 = vpop.f32.mrb[22].mxu1 }
 0xc4b   : > { %v3770_v37 = vpop.f32.mrb[23].mxu1  ;;  %v3776_v40 = vadd.f32 %v5149_v28, %v7049_v23 }
 0xc4c   : > { %v3771_v9 = vadd.f32 %v3770_v37, %v7051_v25 }
 0xc4d   : > { %v3782_v27 = vsel %vm2410_vm11, %v3776_v40, -inf }
 0xc4e   : > { %v3779_v44 = vsel %vm2410_vm11, %v3771_v9, -inf }
 0xc4f   : > { %3780 = vmax.xlane.f32.xlu0 %v3779_v44 }
 0xc53   : > { %3783 = vmax.xlane.f32.xlu0 %v3782_v27 }
 0xcdc   : > { %v3781_v46 = vpop.xlane.xlu0 %3780 }
 0xcdd   : > { %v3785_v17 = vsub.f32 %v3771_v9, %v3781_v46 }
 0xcdf   : > { %v3787_v18 = vmul.f32 1.442695, %v3785_v17 }
 0xce0   : > { %v3784_v19 = vpop.xlane.xlu0 %3783 }
 0xce1   : > { %5703 = vpow2.f32 %v3787_v18  ;;  %v3786_v20 = vsub.f32 %v3776_v40, %v3784_v19 }
 0xce3   : > { %v3789_v26 = vmul.f32 1.442695, %v3786_v20 }
 0xce5   : > { %5705 = vpow2.f32 %v3789_v26 }
 0xceb   : > { %v5704_v32 = vpop.eup %5703 }
 0xcec   : > { %v3791_v30 = vsel %vm2410_vm11, %v5704_v32, 0.0 }
 0xced   : > { %3792 = vadd.xlane.f32.xlu0 %v3791_v30 }
 0xcef   : > { %v5706_v25 = vpop.eup %5705 }
 0xcf0   : > { %v3794_v23 = vsel %vm2410_vm11, %v5706_v25, 0.0 }
 0xcf1   : > { %3795 = vadd.xlane.f32.xlu0 %v3794_v23 }
 0xd7a   : > { %v3793_v31 = vpop.xlane.xlu0 %3792 }
 0xd7b   : > { %5707 = vrcp.f32 %v3793_v31 }
 0xd7e   : > { %v3796_v35 = vpop.xlane.xlu0 %3795 }
 0xd7f   : > { %5709 = vrcp.f32 %v3796_v35 }
 0xd85   : > { %v5708_v39 = vpop.eup %5707 }
 0xd86   : > { %v3799_v45 = vmul.f32 %v5708_v39, %v5704_v32 }
 0xd88   : > { %5154 = vmatprep.mubr.msk.f32.mxu1 %vm2410_vm11, %v3799_v45 }
 0xd89   : > { %v5710_v52 = vpop.eup %5709 }
 0xd8a   : > { %v3800_v54 = vmul.f32 %v5710_v52, %v5706_v25 }
 0xd8c   : > { %5155 = vmatmul.mubr.msk.f32.vlgmr.msra.gmra.mrb[24].mxu1 %vm2410_vm11, %v3800_v54 }
 0xd8d   : > { %5464 = vmatpush3.bf16.msra.mxu1 %v7061_v14  ;;  %v4047_v14 = vld [vmem:[#allocation20 + $0x30] sm:$0xff] }
 0xd8e   : > { %5466 = vmatprep.subr.bf16.mxu1 %v7065_v48 }
 0xd91   : > { %5468 = vmatpush3.bf16.msra.mxu1 %v7065_v48  ;;  %v4048_v48 = vld [vmem:[#allocation20 + $0x38] sm:$0xff] }
 0xd92   : > { %5470 = vmatprep.subr.bf16.mxu1 %v7071_v38  ;;  %v5481_v61 = vpack.c.bf16 %v4048_v48, %v4047_v14 }
 0xd94   : > { %5482 = vmatprep.subr.bf16.mxu0 %v5481_v61 }
 0xd95   : > { %5484 = vmatpush3.bf16.msra.mxu0 %v5481_v61 }
 0xd96   : > { %5486 = vmatprep.subr.bf16.mxu0 %v5485_v34 }
 0xe5f   : > { %v5156_v43 = vpop.f32.mrb[24].mxu1 }
 0xe60   : > { %v3873_v58 = vpop.f32.mrb[25].mxu1 }
 0xe61   : > { %5165 = vmatprep.mubr.msk.f32.mxu1 %vm1027_vm6, %v3873_v58 }
 0xe62   : > { %5166 = vmatmul.mubr.msk.f32.vlgmr.msra.gmra.mrb[26].mxu1 %vm1027_vm6, %v5156_v43 }
 0xe63   : > { %5472 = vmatpush3.bf16.msra.mxu1 %v7071_v38  ;;  %5176 = vmatprep.mubr.msk.f32.mxu1 %vm1027_vm6, %v7096_v0  ;;  %v4043_v0 = vld [vmem:[#allocation20 + $0x18] sm:$0xff] }
 0xe64   : > { %5474 = vmatprep.subr.bf16.mxu1 %v7074_v56 }
 0xe67   : > { %5476 = vmatpush3.bf16.msra.mxu1 %v7074_v56 }
 0xe6a   : > { %5177 = vmatmul.mubr.msk.f32.vlgmr.msra.gmra.mrb[26].mxu1 %vm1027_vm6, %v7099_v53  ;;  %v5489_v53 = vpack.c.bf16 %v4043_v0, %v4042_v50 }
 0xf3d   : > { %v5178_v38 = vpop.f32.mrb[26].mxu1 }
 0xf3e   : > { %v4029_v57 = vpop.f32.mrb[27].mxu1  ;;  %v4039_v59 = vadd.f32 %v5178_v38, %v7093_v60 }
 0xf3f   : > { %v4038_v56 = vadd.f32 %v7093_v60, %v4029_v57  ;;  %v4549_v60 = vld [vmem:[%s7392_s17] ss:$0 sm:$0xff] }
 0xf41   : > { %5187 = vmatprep.mubr.msk.f32.mxu0 %vm1027_vm6, %v4038_v56 }
 0xf42   : > { %5188 = vmatmul.mubr.msk.f32.vlgmr.msra.gmra.mrb[18].mxu0 %vm1027_vm6, %v4039_v59 }
 0xf43   : > { %5488 = vmatpush3.bf16.msra.mxu0 %v5485_v34  ;;  %5198 = vmatprep.mubr.msk.f32.mxu0 %vm1027_vm6, %v6741_v49 }
 0xf44   : > { %5490 = vmatprep.subr.bf16.mxu0 %v5489_v53 }
 0xf47   : > { %5492 = vmatpush3.bf16.msra.mxu0 %v5489_v53 }
 0xf4a   : > { %5199 = vmatmul.mubr.msk.f32.vlgmr.msra.gmra.mrb[18].mxu0 %vm1027_vm6, %v6743_v51 }
0x101d   : > { %v5200_v1 = vpop.f32.mrb[18].mxu0 }
0x101e   : > { %v4213_v49 = vadd.f32 %v5200_v1, %v4549_v60  ;;  %v4196_v2 = vpop.f32.mrb[19].mxu0 }
0x101f   : > { %v4212_v3 = vadd.f32 %v4549_v60, %v4196_v2 }
0x1020   : > { %4215 = vst.msk [vmem:[%s885_s21 + $0x8] sm:$0xff] %vm1027_vm6, %v4213_v49 }
0x1021   : > { %4214 = vst.msk [vmem:[%s885_s21] sm:$0xff] %vm1027_vm6, %v4212_v3 }
0x1022   : > { %6064 = shalt.err (!%p6061_p0)
}
0x1023   : > { %s6065_s21 = scalar_lea.hbm %s7235_s1, 256  ;;  %s6069_s17 = scalar_lea.hbm %s7393_s18, 512 }
0x1024   : > { %p6066_p2 = scmp.ne.s32.totalorder %s7235_s1, %s6065_s21  ;;  %p6070_p5 = scmp.lt.u32.totalorder %s7235_s1, %s7393_s18 }
0x1025   : > { %p6071_p7 = scmp.lt.u32.totalorder %s6069_s17, %s6065_s21  ;;  %p6073_p6 = scmp.lt.u32.totalorder %s6065_s21, %s7235_s1 }
0x1026   : > { %p6067_p10 = pnand %p6066_p2, %p7394_p12 }
0x1027   : > { %p6072_p3 = por %p6071_p7, %p6070_p5 }
0x1028   : > { %p6068_p11 = pneg %p6067_p10 }
0x1029   : > { %p6074_p8 = por %p6073_p6, %p6072_p3 }
0x102b   : > { %p6075_p9 = pnand %p6074_p8, %p6068_p11 }
0x102d   : > { %6078 = shalt.err (!%p6075_p9)
}
0x102e   : > { %s6168_s14 = smov 128   ;;  %s6169_s23 = smov 8  }
0x102f   : > { %5567 = dma.vmem_to_hbm [thread:$0]  (%p7394_p12), %s7230_s27, 256, %s7235_s1, %s4217_s26, %s6168_s14, %s6168_s14, %s6169_s23  }
0x1030 PF: > { %s4245_s16 = sand.u32 1, %s6133_s3   ;;  %p7395_p4 = scmp.ne.s32.totalorder %s7364_s12, 0 }
0x1031   : > { %p7396_p1 = scmp.ge.s32.totalorder %s6145_s30, 2  ;;  %s4246_s9 = scalar_lea.sflag [#allocation4], %s4245_s16 }
0x1033   : > { %p5608_p13 = pnand %p7396_p1, %p7395_p4 }
0x1035   : > { %6128 = dma.done.wait (!%p5608_p13), %s4246_s9, 256  }
0x1036   : > { %6130 = vsyncadd (!%p5608_p13), %s4246_s9, 4294967040  ;;  %p43_p0 = scmp.ge.s32.totalorder %s6554_s5, 4   ;;  %s7397_s3 = smov %s6137_s28 }
0x1037   : > { %s7398_s28 = smov %s6141_s29  ;;  %s7399_s29 = smov %s6565_s24 }
0x1038   : > { %s7400_s30 = smov %s6554_s5  ;;  %45 = sbr.rel (!%p43_p0) target bundleno = 34 (0x22), region = 225 }
0x103f   :  { %4251 = vsyncpa [#allocation3], 1 }
0x1040   :  { %4253 = vsyncpa [#allocation3 + $0x1], 1 }
0x1041   :  { %4254 = vsyncpa [#allocation6], 1 }
0x1042   :  { %4256 = vsyncpa [#allocation6 + $0x1], 1 }
0x1043   :  { %4257 = vsyncpa [#allocation9], 1 }
0x1044   :  { %4258 = vsyncpa [#allocation12], 1 }
0x1045   :  { %4259 = vsyncpa [#allocation15], 1 }
0x1046   :  { %4260 = vsyncpa [#allocation18], 1 }
0x1047   :  { %4261 = vsyncpa [#allocation21], 1 }
0x1048   :  { %4262 = vsyncpa [#allocation4], 1 }
0x1049   :  { %4264 = vsyncpa [#allocation4 + $0x1], 1 }

</bundles_post_ra>
